<compile_context>
chip_gen: v7x
topology: tpu7x:2x2x1
jax: 0.10.0
libtpu: 0.0.40
codegen_flags: <defaults>
</compile_context>

<pallas_src>
import math
import numpy as np
import jax
import jax.numpy as jnp
from jax import lax
from jax.experimental import pallas as pl
from jax.experimental.pallas import tpu as pltpu

# ---------------- configuration (small shapes, consistent with the module) ---
B = 2                  # batch
T = 64                 # number of points (B*T = 128 = one full lane dim)
DIM = 3                # point dimension
PDIM = 8               # zero-padded point dim (clean 8-deep MXU contraction)
HIDDEN = 32            # hidden_dim
C_DIM = 16             # c_dim
N_BLOCKS = 3           # n_blocks (ResnetBlockFC layers)
RESO_PLANE = 4         # plane_resolution
K_CELLS = RESO_PLANE * RESO_PLANE      # 16 plane cells per batch
KG = B * K_CELLS                       # 32 global (batch, cell) ids
UNIT_SIZE = 0.1        # voxel size for map2local
INV_UNIT = 1.0 / UNIT_SIZE
L_PE = 10
PE_DIM = 2 * L_PE * DIM                # 60 (sin_cos positional encoding)
PE_PAD = 64                            # PE dim padded to a multiple of 8
FREQ_BANDS = (2.0 ** np.linspace(0, L_PE - 1, L_PE)) * math.pi

# ----- constant PE matrix (feature-major):  pe = sin(W_PE @ p_local) ---------
# Row layout matches torch.cat([sin(f0*p), cos(f0*p), sin(f1*p), ...], dim=2).
# Cos rows get the +pi/2 phase folded in via column 3: p_local row 3 is a
# zero-pad row, so after map2local it is exactly -1 for every point.
_wpe = np.zeros((PE_PAD, PDIM), np.float32)
for _i, _f in enumerate(FREQ_BANDS):
    _base = _i * 2 * DIM
    for _d in range(DIM):
        _wpe[_base + _d, _d] = _f                      # sin rows
        _wpe[_base + DIM + _d, _d] = _f                # cos rows = sin(x + pi/2)
        _wpe[_base + DIM + _d, DIM] = -math.pi / 2.0   # (-1) * (-pi/2) = +pi/2
W_PE = jnp.asarray(_wpe)


# ============================ fused kernel ===================================
def fused_forward_kernel(p_ref, idx_ref, wpe_ref, w64_ref, w32_ref, b_ref,
                         out_ref):
    f32 = jnp.float32
    NEG = jnp.finfo(f32).min

    def mm(w, x):
        return jnp.dot(w, x, preferred_element_type=f32)

    # --- map2local:  p_local = 2*frac(p/s) - 1  (zero pad-rows -> exactly -1) -
    scaled = p_ref[...] * INV_UNIT                              # (8, 128)
    p_local = 2.0 * (scaled - jnp.floor(scaled)) - 1.0

    # --- sin/cos positional encoding: one small matmul + one sin pass --------
    pe = jnp.sin(mm(wpe_ref[...], p_local))                     # (64, 128)

    # --- fc_pos (feature-major: lane dim is B*T = 128, fully dense) ----------
    net = mm(w64_ref[0:64, :], pe) + b_ref[:, 0:1]              # (64, 128)

    # --- ResnetBlockFC 0  (2H=64 -> H=32) -------------------------------------
    h = mm(w64_ref[64:96, :], jnp.maximum(net, 0.0)) + b_ref[0:32, 1:2]
    net = (mm(w64_ref[96:128, :], net)                          # shortcut
           + mm(w32_ref[0:32, :], jnp.maximum(h, 0.0))          # fc_1
           + b_ref[0:32, 2:3])                                  # (32, 128)

    # --- pool_local: per-cell masked max over lanes, gather-back fused -------
    # Each lane (point) belongs to exactly one global cell, so `pooled` is
    # fully written; empty cells never propagate NEG (their mask is all-false).
    gidx = idx_ref[0:1, :]                                      # (1, 128) int32

    def pool_local(x):                                          # x: (32, 128)
        pooled = jnp.zeros_like(x)
        for k in range(KG):                                     # unrolled, KG=32
            mask = gidx == k                                    # (1, 128)
            cell = jnp.max(jnp.where(mask, x, NEG),
                           axis=1, keepdims=True)               # (32, 1)
            pooled = jnp.where(mask, cell, pooled)              # scatter back
        return pooled

    # --- ResnetBlockFC 1: concat([net, pooled]) split into accumulating dots -
    pooled = pool_local(net)
    h = (mm(w32_ref[32:64, :], jnp.maximum(net, 0.0))
         + mm(w32_ref[64:96, :], jnp.maximum(pooled, 0.0))
         + b_ref[0:32, 3:4])
    net = (mm(w32_ref[128:160, :], net)                         # shortcut (net)
           + mm(w32_ref[160:192, :], pooled)                    # shortcut (pool)
           + mm(w32_ref[96:128, :], jnp.maximum(h, 0.0))        # fc_1
           + b_ref[0:32, 4:5])

    # --- ResnetBlockFC 2 with fc_c folded in (outputs C_DIM=16 rows) ----------
    pooled = pool_local(net)
    h = (mm(w32_ref[192:224, :], jnp.maximum(net, 0.0))
         + mm(w32_ref[224:256, :], jnp.maximum(pooled, 0.0))
         + b_ref[0:32, 5:6])
    c = (mm(w32_ref[272:288, :], net)                           # (Wsa @ Wc)^T
         + mm(w32_ref[288:304, :], pooled)                      # (Wsb @ Wc)^T
         + mm(w32_ref[256:272, :], jnp.maximum(h, 0.0))         # (W1  @ Wc)^T
         + b_ref[0:16, 6:7])                                    # (16, 128)

    # --- generate_plane_features 'xz': scatter_mean over global cells --------
    kg_iota = lax.broadcasted_iota(jnp.int32, (KG, B * T), 0)
    onehot = (kg_iota == gidx).astype(f32)                      # (32, 128)
    sums = lax.dot_general(c, onehot, (((1,), (1,)), ((), ())),
                           preferred_element_type=f32)          # (16, 32)
    counts = idx_ref[1:2, 0:KG].astype(f32)                     # exact integers
    mean = sums / jnp.maximum(counts, 1.0)                      # exact division
    for b in range(B):                                          # (B, C, K) out
        out_ref[b, :, :] = mean[:, b * K_CELLS:(b + 1) * K_CELLS]


# ============================= parameters ====================================
def init_params(key):
    keys = iter(jax.random.split(key, 64))

    def lin(din, dout, bias=True):
        bound = 1.0 / math.sqrt(din)
        w = jax.random.uniform(next(keys), (din, dout), jnp.float32, -bound, bound)
        b = (jax.random.uniform(next(keys), (dout,), jnp.float32, -bound, bound)
             if bias else None)
        return w, b

    params = {}
    params['fc_pos'] = lin(PE_DIM, 2 * HIDDEN)           # Linear(60, 2*hidden)
    blocks = []
    for _ in range(N_BLOCKS):                             # ResnetBlockFC(2H, H)
        w0, b0 = lin(2 * HIDDEN, HIDDEN)
        # NOTE: the module inits fc_1.weight to zeros; we use random weights so
        # the numerical test actually exercises the fc_0 -> fc_1 datapath
        # (a trained model has nonzero fc_1). Forward semantics are unchanged.
        w1, b1 = lin(HIDDEN, HIDDEN)
        ws, _ = lin(2 * HIDDEN, HIDDEN, bias=False)       # shortcut, no bias
        blocks.append((w0, b0, w1, b1, ws))
    params['blocks'] = blocks
    params['fc_c'] = lin(HIDDEN, C_DIM)
    return params


def pack_weights(params):
    """Fold fc_c into block 2, transpose everything to feature-major, and pack
    the 13 original operands into 4 weight/bias slabs."""
    H = HIDDEN
    wpos, bpos = params['fc_pos']                         # (60, 64), (64,)
    wc, bc = params['fc_c']                               # (32, 16), (16,)
    bk0, bk1, bk2 = params['blocks']                      # (w0, b0, w1, b1, ws)

    # fc_pos transposed, PE dim padded 60 -> 64 (pe rows 60..63 are exactly 0).
    wpos_pad = jnp.zeros((PE_PAD, 2 * H), jnp.float32).at[:PE_DIM, :].set(wpos)
    w_in64 = jnp.concatenate([wpos_pad.T,                 # [  0: 64] fc_pos^T
                              bk0[0].T,                   # [ 64: 96] W0_0^T
                              bk0[4].T], axis=0)          # [ 96:128] Ws_0^T

    w1c = bk2[2] @ wc                                     # fold fc_c into blk 2
    wsac = bk2[4][:H] @ wc
    wsbc = bk2[4][H:] @ wc
    w_in32 = jnp.concatenate([
        bk0[2].T,        # [  0: 32] W1_0^T
        bk1[0][:H].T,    # [ 32: 64] W0_1^T (net part)
        bk1[0][H:].T,    # [ 64: 96] W0_1^T (pooled part)
        bk1[2].T,        # [ 96:128] W1_1^T
        bk1[4][:H].T,    # [128:160] Ws_1^T (net part)
        bk1[4][H:].T,    # [160:192] Ws_1^T (pooled part)
        bk2[0][:H].T,    # [192:224] W0_2^T (net part)
        bk2[0][H:].T,    # [224:256] W0_2^T (pooled part)
        w1c.T,           # [256:272] (W1_2 @ Wc)^T
        wsac.T,          # [272:288] (Ws_2 @ Wc)^T (net part)
        wsbc.T,          # [288:304] (Ws_2 @ Wc)^T (pooled part)
    ], axis=0)                                            # (304, 32)

    b1c = bk2[3] @ wc + bc                                # folded bias (16,)
    biases = jnp.zeros((2 * H, 8), jnp.float32)
    biases = biases.at[:, 0].set(bpos)
    biases = biases.at[:H, 1].set(bk0[1]).at[:H, 2].set(bk0[3])
    biases = biases.at[:H, 3].set(bk1[1]).at[:H, 4].set(bk1[3])
    biases = biases.at[:H, 5].set(bk2[1]).at[:C_DIM, 6].set(b1c)

    return {'w_pe': W_PE, 'w_in64': w_in64, 'w_in32': w_in32, 'biases': biases}


# ============================ forward (Pallas) ===============================
def patch_local_pool_pointnet_forward(packed, points, index_xz):
    """points: (B, T, 3) f32;  index_xz: (B, 1, T) int32 with values in [0, K)."""
    idx = index_xz.reshape(B, T).astype(jnp.int32)
    # Global cell id b*K + idx, plus exact per-cell counts, packed into one
    # int32 operand (row 0: per-point cell id; row 1: per-cell count).
    gidx = (jnp.arange(B, dtype=jnp.int32)[:, None] * K_CELLS + idx).reshape(-1)
    counts = jnp.sum(
        (gidx[None, :] == jnp.arange(KG, dtype=jnp.int32)[:, None]).astype(jnp.int32),
        axis=1)
    idx_pack = jnp.zeros((2, B * T), jnp.int32)
    idx_pack = idx_pack.at[0, :].set(gidx).at[1, :KG].set(counts)

    # Points transposed to feature-major (PDIM, B*T); pad rows stay 0 so the
    # map2local output of row 3 is exactly -1 (used for the cos phase fold).
    p_t = jnp.zeros((PDIM, B * T), jnp.float32)
    p_t = p_t.at[:DIM, :].set(points.reshape(B * T, DIM).T)

    # Single grid-less call: all activations stay resident in VMEM.
    # TODO(synk): for production point counts (and v7x's 64 MiB VMEM / 2 TCs)
    # add a grid over point chunks with dimension_semantics=("parallel", ...).
    fea = pl.pallas_call(
        fused_forward_kernel,
        out_shape=jax.ShapeDtypeStruct((B, C_DIM, K_CELLS), jnp.float32),
        compiler_params=pltpu.CompilerParams(vmem_limit_bytes=4 * 1024 * 1024),
        cost_estimate=pl.CostEstimate(flops=5_000_000, transcendentals=8_200,
                                      bytes_accessed=100_000),
    )(p_t, idx_pack, packed['w_pe'], packed['w_in64'], packed['w_in32'],
      packed['biases'])

    # generate_plane_features 'xz' (index.max() < reso**2 branch; unet=None).
    # Kernel already emits (B, C, K): pure metadata reshape, no transpose.
    # TODO(synk): the data-dependent fallback branch (index.max() >= reso**2)
    # has no static-shape equivalent; inputs are constructed in-range.
    return {'xz': fea.reshape(B, C_DIM, RESO_PLANE, RESO_PLANE)}


# ============================ pure-JAX reference =============================
def reference_forward(params, points, index_xz):
    idx = index_xz.reshape(B, T).astype(jnp.int32)
    scaled = points * jnp.float32(INV_UNIT)
    p = 2.0 * (scaled - jnp.floor(scaled)) - 1.0           # == remainder(p,s)/s
    parts = []
    for f in FREQ_BANDS:
        fp = p * jnp.float32(float(f))
        parts.append(jnp.sin(fp))
        parts.append(jnp.cos(fp))
    pe = jnp.concatenate(parts, axis=-1)                   # (B, T, 60)

    def lin(x, wb):
        w, b = wb
        return x @ w + b

    def resblock(x, prm):
        w0, b0, w1, b1, ws = prm
        net = jnp.maximum(x, 0.0) @ w0 + b0
        dx = jnp.maximum(net, 0.0) @ w1 + b1
        return x @ ws + dx

    net = lin(pe, params['fc_pos'])
    net = resblock(net, params['blocks'][0])
    neg = jnp.finfo(jnp.float32).min
    for blk in params['blocks'][1:]:
        mask = idx[:, :, None] == idx[:, None, :]                    # (B,T,T)
        vals = jnp.where(mask[..., None], net[:, None, :, :], neg)
        pooled = jnp.max(vals, axis=2)
        net = resblock(jnp.concatenate([net, pooled], axis=-1), blk)
    c = lin(net, params['fc_c'])                                     # (B,T,C)

    onehot = (idx[:, None, :] ==
              jnp.arange(K_CELLS, dtype=jnp.int32)[None, :, None]).astype(jnp.float32)
    sums = jnp.einsum('bkt,btc->bkc', onehot, c)
    counts = onehot.sum(-1, keepdims=True)
    mean = sums / jnp.maximum(counts, 1.0)
    fea = jnp.transpose(mean, (0, 2, 1)).reshape(B, C_DIM, RESO_PLANE, RESO_PLANE)
    return {'xz': fea}


# ================================== main =====================================
if __name__ == "__main__":
    key = jax.random.PRNGKey(0)
    kp, kpts, kidx = jax.random.split(key, 3)
    params = init_params(kp)
    packed = pack_weights(params)

    points = jax.random.uniform(kpts, (B, T, DIM), jnp.float32, 0.0, 1.0)
    index_xz = jax.random.randint(kidx, (B, 1, T), 0, K_CELLS, dtype=jnp.int32)

    fwd = jax.jit(patch_local_pool_pointnet_forward)
    out = fwd(packed, points, index_xz)
    out = jax.block_until_ready(out)

    ref = reference_forward(params, points, index_xz)
    np.testing.assert_allclose(np.asarray(out['xz']), np.asarray(ref['xz']),
                               rtol=1e-2, atol=1e-2)
    assert out['xz'].shape == (B, C_DIM, RESO_PLANE, RESO_PLANE)
    print("KERNEL_OK")
</pallas_src>

<mosaic_0001>
module attributes {stable_mosaic.version = 11 : i64} {
  func.func @fused_forward_kernel(%arg0: memref<8x128xf32, #tpu.memory_space<vmem>>, %arg1: memref<2x128xi32, #tpu.memory_space<vmem>>, %arg2: memref<64x8xf32, #tpu.memory_space<vmem>>, %arg3: memref<128x64xf32, #tpu.memory_space<vmem>>, %arg4: memref<304x32xf32, #tpu.memory_space<vmem>>, %arg5: memref<64x8xf32, #tpu.memory_space<vmem>>, %arg6: memref<2x16x16xf32, #tpu.memory_space<vmem>>) attributes {dimension_semantics = [], scalar_prefetch = 0 : i64, scratch_operands = 0 : i64, tpu.core_type = #tpu.core_type<tc>} {
    %c0 = arith.constant 0 : index
    %c0_0 = arith.constant 0 : index
    %0 = vector.load %arg0[%c0, %c0_0] : memref<8x128xf32, #tpu.memory_space<vmem>>, vector<8x128xf32>
    %cst = arith.constant 1.000000e+01 : f32
    %1 = vector.broadcast %cst : f32 to vector<8x128xf32>
    %2 = arith.mulf %0, %1 : vector<8x128xf32>
    %3 = math.floor %2 : vector<8x128xf32>
    %4 = arith.subf %2, %3 : vector<8x128xf32>
    %cst_1 = arith.constant 2.000000e+00 : f32
    %5 = vector.broadcast %cst_1 : f32 to vector<8x128xf32>
    %6 = arith.mulf %5, %4 : vector<8x128xf32>
    %cst_2 = arith.constant 1.000000e+00 : f32
    %7 = vector.broadcast %cst_2 : f32 to vector<8x128xf32>
    %8 = arith.subf %6, %7 : vector<8x128xf32>
    %c0_3 = arith.constant 0 : index
    %c0_4 = arith.constant 0 : index
    %9 = vector.load %arg2[%c0_3, %c0_4] : memref<64x8xf32, #tpu.memory_space<vmem>>, vector<64x8xf32>
    %cst_5 = arith.constant dense<0.000000e+00> : vector<64x128xf32>
    %10 = tpu.matmul %9, %8, %cst_5 {dimension_numbers = #tpu.dot_dimension_numbers<[1], [0], [0], [1], [0, 0, 1, 1], [], []>} : vector<64x8xf32>, vector<8x128xf32>, vector<64x128xf32> -> vector<64x128xf32>
    %11 = math.sin %10 : vector<64x128xf32>
    %c0_6 = arith.constant 0 : index
    %c0_7 = arith.constant 0 : index
    %12 = vector.load %arg3[%c0_6, %c0_7] : memref<128x64xf32, #tpu.memory_space<vmem>>, vector<64x64xf32>
    %cst_8 = arith.constant dense<0.000000e+00> : vector<64x128xf32>
    %13 = tpu.matmul %12, %11, %cst_8 {dimension_numbers = #tpu.dot_dimension_numbers<[1], [0], [0], [1], [0, 0, 1, 1], [], []>} : vector<64x64xf32>, vector<64x128xf32>, vector<64x128xf32> -> vector<64x128xf32>
    %c0_9 = arith.constant 0 : index
    %c0_10 = arith.constant 0 : index
    %14 = vector.load %arg5[%c0_9, %c0_10] : memref<64x8xf32, #tpu.memory_space<vmem>>, vector<64x1xf32>
    %15 = vector.broadcast %14 : vector<64x1xf32> to vector<64x128xf32>
    %16 = arith.addf %13, %15 : vector<64x128xf32>
    %c64 = arith.constant 64 : index
    %c0_11 = arith.constant 0 : index
    %17 = vector.load %arg3[%c64, %c0_11] : memref<128x64xf32, #tpu.memory_space<vmem>>, vector<32x64xf32>
    %cst_12 = arith.constant 0.000000e+00 : f32
    %18 = vector.broadcast %cst_12 : f32 to vector<64x128xf32>
    %19 = arith.maximumf %16, %18 : vector<64x128xf32>
    %cst_13 = arith.constant dense<0.000000e+00> : vector<32x128xf32>
    %20 = tpu.matmul %17, %19, %cst_13 {dimension_numbers = #tpu.dot_dimension_numbers<[1], [0], [0], [1], [0, 0, 1, 1], [], []>} : vector<32x64xf32>, vector<64x128xf32>, vector<32x128xf32> -> vector<32x128xf32>
    %c0_14 = arith.constant 0 : index
    %c1 = arith.constant 1 : index
    %21 = vector.load %arg5[%c0_14, %c1] : memref<64x8xf32, #tpu.memory_space<vmem>>, vector<32x1xf32>
    %22 = vector.broadcast %21 : vector<32x1xf32> to vector<32x128xf32>
    %23 = arith.addf %20, %22 : vector<32x128xf32>
    %c96 = arith.constant 96 : index
    %c0_15 = arith.constant 0 : index
    %24 = vector.load %arg3[%c96, %c0_15] : memref<128x64xf32, #tpu.memory_space<vmem>>, vector<32x64xf32>
    %cst_16 = arith.constant dense<0.000000e+00> : vector<32x128xf32>
    %25 = tpu.matmul %24, %16, %cst_16 {dimension_numbers = #tpu.dot_dimension_numbers<[1], [0], [0], [1], [0, 0, 1, 1], [], []>} : vector<32x64xf32>, vector<64x128xf32>, vector<32x128xf32> -> vector<32x128xf32>
    %c0_17 = arith.constant 0 : index
    %c0_18 = arith.constant 0 : index
    %26 = vector.load %arg4[%c0_17, %c0_18] : memref<304x32xf32, #tpu.memory_space<vmem>>, vector<32x32xf32>
    %cst_19 = arith.constant 0.000000e+00 : f32
    %27 = vector.broadcast %cst_19 : f32 to vector<32x128xf32>
    %28 = arith.maximumf %23, %27 : vector<32x128xf32>
    %cst_20 = arith.constant dense<0.000000e+00> : vector<32x128xf32>
    %29 = tpu.matmul %26, %28, %cst_20 {dimension_numbers = #tpu.dot_dimension_numbers<[1], [0], [0], [1], [0, 0, 1, 1], [], []>} : vector<32x32xf32>, vector<32x128xf32>, vector<32x128xf32> -> vector<32x128xf32>
    %30 = arith.addf %25, %29 : vector<32x128xf32>
    %c0_21 = arith.constant 0 : index
    %c2 = arith.constant 2 : index
    %31 = vector.load %arg5[%c0_21, %c2] : memref<64x8xf32, #tpu.memory_space<vmem>>, vector<32x1xf32>
    %32 = vector.broadcast %31 : vector<32x1xf32> to vector<32x128xf32>
    %33 = arith.addf %30, %32 : vector<32x128xf32>
    %c0_22 = arith.constant 0 : index
    %c0_23 = arith.constant 0 : index
    %34 = vector.load %arg1[%c0_22, %c0_23] : memref<2x128xi32, #tpu.memory_space<vmem>>, vector<1x128xi32>
    %cst_24 = arith.constant 0.000000e+00 : f32
    %35 = vector.broadcast %cst_24 : f32 to vector<32x128xf32>
    %c0_i32 = arith.constant 0 : i32
    %36 = vector.broadcast %c0_i32 : i32 to vector<1x128xi32>
    %37 = arith.cmpi eq, %34, %36 : vector<1x128xi32>
    %cst_25 = arith.constant -3.40282347E+38 : f32
    %38 = vector.shape_cast %37 : vector<1x128xi1> to vector<1x128xi1>
    %39 = vector.broadcast %38 : vector<1x128xi1> to vector<32x128xi1>
    %40 = vector.broadcast %cst_25 : f32 to vector<32x128xf32>
    %41 = arith.select %39, %33, %40 : vector<32x128xi1>, vector<32x128xf32>
    %cst_26 = arith.constant dense<0xFF800000> : vector<32xf32>
    %42 = vector.multi_reduction <maximumf>, %41, %cst_26 [1] : vector<32x128xf32> to vector<32xf32>
    %43 = vector.shape_cast %42 : vector<32xf32> to vector<32x1xf32>
    %44 = vector.shape_cast %37 : vector<1x128xi1> to vector<1x128xi1>
    %45 = vector.broadcast %44 : vector<1x128xi1> to vector<32x128xi1>
    %46 = vector.shape_cast %43 : vector<32x1xf32> to vector<32x1xf32>
    %47 = vector.broadcast %46 : vector<32x1xf32> to vector<32x128xf32>
    %48 = arith.select %45, %47, %35 : vector<32x128xi1>, vector<32x128xf32>
    %c1_i32 = arith.constant 1 : i32
    %49 = vector.broadcast %c1_i32 : i32 to vector<1x128xi32>
    %50 = arith.cmpi eq, %34, %49 : vector<1x128xi32>
    %cst_27 = arith.constant -3.40282347E+38 : f32
    %51 = vector.shape_cast %50 : vector<1x128xi1> to vector<1x128xi1>
    %52 = vector.broadcast %51 : vector<1x128xi1> to vector<32x128xi1>
    %53 = vector.broadcast %cst_27 : f32 to vector<32x128xf32>
    %54 = arith.select %52, %33, %53 : vector<32x128xi1>, vector<32x128xf32>
    %cst_28 = arith.constant dense<0xFF800000> : vector<32xf32>
    %55 = vector.multi_reduction <maximumf>, %54, %cst_28 [1] : vector<32x128xf32> to vector<32xf32>
    %56 = vector.shape_cast %55 : vector<32xf32> to vector<32x1xf32>
    %57 = vector.shape_cast %50 : vector<1x128xi1> to vector<1x128xi1>
    %58 = vector.broadcast %57 : vector<1x128xi1> to vector<32x128xi1>
    %59 = vector.shape_cast %56 : vector<32x1xf32> to vector<32x1xf32>
    %60 = vector.broadcast %59 : vector<32x1xf32> to vector<32x128xf32>
    %61 = arith.select %58, %60, %48 : vector<32x128xi1>, vector<32x128xf32>
    %c2_i32 = arith.constant 2 : i32
    %62 = vector.broadcast %c2_i32 : i32 to vector<1x128xi32>
    %63 = arith.cmpi eq, %34, %62 : vector<1x128xi32>
    %cst_29 = arith.constant -3.40282347E+38 : f32
    %64 = vector.shape_cast %63 : vector<1x128xi1> to vector<1x128xi1>
    %65 = vector.broadcast %64 : vector<1x128xi1> to vector<32x128xi1>
    %66 = vector.broadcast %cst_29 : f32 to vector<32x128xf32>
    %67 = arith.select %65, %33, %66 : vector<32x128xi1>, vector<32x128xf32>
    %cst_30 = arith.constant dense<0xFF800000> : vector<32xf32>
    %68 = vector.multi_reduction <maximumf>, %67, %cst_30 [1] : vector<32x128xf32> to vector<32xf32>
    %69 = vector.shape_cast %68 : vector<32xf32> to vector<32x1xf32>
    %70 = vector.shape_cast %63 : vector<1x128xi1> to vector<1x128xi1>
    %71 = vector.broadcast %70 : vector<1x128xi1> to vector<32x128xi1>
    %72 = vector.shape_cast %69 : vector<32x1xf32> to vector<32x1xf32>
    %73 = vector.broadcast %72 : vector<32x1xf32> to vector<32x128xf32>
    %74 = arith.select %71, %73, %61 : vector<32x128xi1>, vector<32x128xf32>
    %c3_i32 = arith.constant 3 : i32
    %75 = vector.broadcast %c3_i32 : i32 to vector<1x128xi32>
    %76 = arith.cmpi eq, %34, %75 : vector<1x128xi32>
    %cst_31 = arith.constant -3.40282347E+38 : f32
    %77 = vector.shape_cast %76 : vector<1x128xi1> to vector<1x128xi1>
    %78 = vector.broadcast %77 : vector<1x128xi1> to vector<32x128xi1>
    %79 = vector.broadcast %cst_31 : f32 to vector<32x128xf32>
    %80 = arith.select %78, %33, %79 : vector<32x128xi1>, vector<32x128xf32>
    %cst_32 = arith.constant dense<0xFF800000> : vector<32xf32>
    %81 = vector.multi_reduction <maximumf>, %80, %cst_32 [1] : vector<32x128xf32> to vector<32xf32>
    %82 = vector.shape_cast %81 : vector<32xf32> to vector<32x1xf32>
    %83 = vector.shape_cast %76 : vector<1x128xi1> to vector<1x128xi1>
    %84 = vector.broadcast %83 : vector<1x128xi1> to vector<32x128xi1>
    %85 = vector.shape_cast %82 : vector<32x1xf32> to vector<32x1xf32>
    %86 = vector.broadcast %85 : vector<32x1xf32> to vector<32x128xf32>
    %87 = arith.select %84, %86, %74 : vector<32x128xi1>, vector<32x128xf32>
    %c4_i32 = arith.constant 4 : i32
    %88 = vector.broadcast %c4_i32 : i32 to vector<1x128xi32>
    %89 = arith.cmpi eq, %34, %88 : vector<1x128xi32>
    %cst_33 = arith.constant -3.40282347E+38 : f32
    %90 = vector.shape_cast %89 : vector<1x128xi1> to vector<1x128xi1>
    %91 = vector.broadcast %90 : vector<1x128xi1> to vector<32x128xi1>
    %92 = vector.broadcast %cst_33 : f32 to vector<32x128xf32>
    %93 = arith.select %91, %33, %92 : vector<32x128xi1>, vector<32x128xf32>
    %cst_34 = arith.constant dense<0xFF800000> : vector<32xf32>
    %94 = vector.multi_reduction <maximumf>, %93, %cst_34 [1] : vector<32x128xf32> to vector<32xf32>
    %95 = vector.shape_cast %94 : vector<32xf32> to vector<32x1xf32>
    %96 = vector.shape_cast %89 : vector<1x128xi1> to vector<1x128xi1>
    %97 = vector.broadcast %96 : vector<1x128xi1> to vector<32x128xi1>
    %98 = vector.shape_cast %95 : vector<32x1xf32> to vector<32x1xf32>
    %99 = vector.broadcast %98 : vector<32x1xf32> to vector<32x128xf32>
    %100 = arith.select %97, %99, %87 : vector<32x128xi1>, vector<32x128xf32>
    %c5_i32 = arith.constant 5 : i32
    %101 = vector.broadcast %c5_i32 : i32 to vector<1x128xi32>
    %102 = arith.cmpi eq, %34, %101 : vector<1x128xi32>
    %cst_35 = arith.constant -3.40282347E+38 : f32
    %103 = vector.shape_cast %102 : vector<1x128xi1> to vector<1x128xi1>
    %104 = vector.broadcast %103 : vector<1x128xi1> to vector<32x128xi1>
    %105 = vector.broadcast %cst_35 : f32 to vector<32x128xf32>
    %106 = arith.select %104, %33, %105 : vector<32x128xi1>, vector<32x128xf32>
    %cst_36 = arith.constant dense<0xFF800000> : vector<32xf32>
    %107 = vector.multi_reduction <maximumf>, %106, %cst_36 [1] : vector<32x128xf32> to vector<32xf32>
    %108 = vector.shape_cast %107 : vector<32xf32> to vector<32x1xf32>
    %109 = vector.shape_cast %102 : vector<1x128xi1> to vector<1x128xi1>
    %110 = vector.broadcast %109 : vector<1x128xi1> to vector<32x128xi1>
    %111 = vector.shape_cast %108 : vector<32x1xf32> to vector<32x1xf32>
    %112 = vector.broadcast %111 : vector<32x1xf32> to vector<32x128xf32>
    %113 = arith.select %110, %112, %100 : vector<32x128xi1>, vector<32x128xf32>
    %c6_i32 = arith.constant 6 : i32
    %114 = vector.broadcast %c6_i32 : i32 to vector<1x128xi32>
    %115 = arith.cmpi eq, %34, %114 : vector<1x128xi32>
    %cst_37 = arith.constant -3.40282347E+38 : f32
    %116 = vector.shape_cast %115 : vector<1x128xi1> to vector<1x128xi1>
    %117 = vector.broadcast %116 : vector<1x128xi1> to vector<32x128xi1>
    %118 = vector.broadcast %cst_37 : f32 to vector<32x128xf32>
    %119 = arith.select %117, %33, %118 : vector<32x128xi1>, vector<32x128xf32>
    %cst_38 = arith.constant dense<0xFF800000> : vector<32xf32>
    %120 = vector.multi_reduction <maximumf>, %119, %cst_38 [1] : vector<32x128xf32> to vector<32xf32>
    %121 = vector.shape_cast %120 : vector<32xf32> to vector<32x1xf32>
    %122 = vector.shape_cast %115 : vector<1x128xi1> to vector<1x128xi1>
    %123 = vector.broadcast %122 : vector<1x128xi1> to vector<32x128xi1>
    %124 = vector.shape_cast %121 : vector<32x1xf32> to vector<32x1xf32>
    %125 = vector.broadcast %124 : vector<32x1xf32> to vector<32x128xf32>
    %126 = arith.select %123, %125, %113 : vector<32x128xi1>, vector<32x128xf32>
    %c7_i32 = arith.constant 7 : i32
    %127 = vector.broadcast %c7_i32 : i32 to vector<1x128xi32>
    %128 = arith.cmpi eq, %34, %127 : vector<1x128xi32>
    %cst_39 = arith.constant -3.40282347E+38 : f32
    %129 = vector.shape_cast %128 : vector<1x128xi1> to vector<1x128xi1>
    %130 = vector.broadcast %129 : vector<1x128xi1> to vector<32x128xi1>
    %131 = vector.broadcast %cst_39 : f32 to vector<32x128xf32>
    %132 = arith.select %130, %33, %131 : vector<32x128xi1>, vector<32x128xf32>
    %cst_40 = arith.constant dense<0xFF800000> : vector<32xf32>
    %133 = vector.multi_reduction <maximumf>, %132, %cst_40 [1] : vector<32x128xf32> to vector<32xf32>
    %134 = vector.shape_cast %133 : vector<32xf32> to vector<32x1xf32>
    %135 = vector.shape_cast %128 : vector<1x128xi1> to vector<1x128xi1>
    %136 = vector.broadcast %135 : vector<1x128xi1> to vector<32x128xi1>
    %137 = vector.shape_cast %134 : vector<32x1xf32> to vector<32x1xf32>
    %138 = vector.broadcast %137 : vector<32x1xf32> to vector<32x128xf32>
    %139 = arith.select %136, %138, %126 : vector<32x128xi1>, vector<32x128xf32>
    %c8_i32 = arith.constant 8 : i32
    %140 = vector.broadcast %c8_i32 : i32 to vector<1x128xi32>
    %141 = arith.cmpi eq, %34, %140 : vector<1x128xi32>
    %cst_41 = arith.constant -3.40282347E+38 : f32
    %142 = vector.shape_cast %141 : vector<1x128xi1> to vector<1x128xi1>
    %143 = vector.broadcast %142 : vector<1x128xi1> to vector<32x128xi1>
    %144 = vector.broadcast %cst_41 : f32 to vector<32x128xf32>
    %145 = arith.select %143, %33, %144 : vector<32x128xi1>, vector<32x128xf32>
    %cst_42 = arith.constant dense<0xFF800000> : vector<32xf32>
    %146 = vector.multi_reduction <maximumf>, %145, %cst_42 [1] : vector<32x128xf32> to vector<32xf32>
    %147 = vector.shape_cast %146 : vector<32xf32> to vector<32x1xf32>
    %148 = vector.shape_cast %141 : vector<1x128xi1> to vector<1x128xi1>
    %149 = vector.broadcast %148 : vector<1x128xi1> to vector<32x128xi1>
    %150 = vector.shape_cast %147 : vector<32x1xf32> to vector<32x1xf32>
    %151 = vector.broadcast %150 : vector<32x1xf32> to vector<32x128xf32>
    %152 = arith.select %149, %151, %139 : vector<32x128xi1>, vector<32x128xf32>
    %c9_i32 = arith.constant 9 : i32
    %153 = vector.broadcast %c9_i32 : i32 to vector<1x128xi32>
    %154 = arith.cmpi eq, %34, %153 : vector<1x128xi32>
    %cst_43 = arith.constant -3.40282347E+38 : f32
    %155 = vector.shape_cast %154 : vector<1x128xi1> to vector<1x128xi1>
    %156 = vector.broadcast %155 : vector<1x128xi1> to vector<32x128xi1>
    %157 = vector.broadcast %cst_43 : f32 to vector<32x128xf32>
    %158 = arith.select %156, %33, %157 : vector<32x128xi1>, vector<32x128xf32>
    %cst_44 = arith.constant dense<0xFF800000> : vector<32xf32>
    %159 = vector.multi_reduction <maximumf>, %158, %cst_44 [1] : vector<32x128xf32> to vector<32xf32>
    %160 = vector.shape_cast %159 : vector<32xf32> to vector<32x1xf32>
    %161 = vector.shape_cast %154 : vector<1x128xi1> to vector<1x128xi1>
    %162 = vector.broadcast %161 : vector<1x128xi1> to vector<32x128xi1>
    %163 = vector.shape_cast %160 : vector<32x1xf32> to vector<32x1xf32>
    %164 = vector.broadcast %163 : vector<32x1xf32> to vector<32x128xf32>
    %165 = arith.select %162, %164, %152 : vector<32x128xi1>, vector<32x128xf32>
    %c10_i32 = arith.constant 10 : i32
    %166 = vector.broadcast %c10_i32 : i32 to vector<1x128xi32>
    %167 = arith.cmpi eq, %34, %166 : vector<1x128xi32>
    %cst_45 = arith.constant -3.40282347E+38 : f32
    %168 = vector.shape_cast %167 : vector<1x128xi1> to vector<1x128xi1>
    %169 = vector.broadcast %168 : vector<1x128xi1> to vector<32x128xi1>
    %170 = vector.broadcast %cst_45 : f32 to vector<32x128xf32>
    %171 = arith.select %169, %33, %170 : vector<32x128xi1>, vector<32x128xf32>
    %cst_46 = arith.constant dense<0xFF800000> : vector<32xf32>
    %172 = vector.multi_reduction <maximumf>, %171, %cst_46 [1] : vector<32x128xf32> to vector<32xf32>
    %173 = vector.shape_cast %172 : vector<32xf32> to vector<32x1xf32>
    %174 = vector.shape_cast %167 : vector<1x128xi1> to vector<1x128xi1>
    %175 = vector.broadcast %174 : vector<1x128xi1> to vector<32x128xi1>
    %176 = vector.shape_cast %173 : vector<32x1xf32> to vector<32x1xf32>
    %177 = vector.broadcast %176 : vector<32x1xf32> to vector<32x128xf32>
    %178 = arith.select %175, %177, %165 : vector<32x128xi1>, vector<32x128xf32>
    %c11_i32 = arith.constant 11 : i32
    %179 = vector.broadcast %c11_i32 : i32 to vector<1x128xi32>
    %180 = arith.cmpi eq, %34, %179 : vector<1x128xi32>
    %cst_47 = arith.constant -3.40282347E+38 : f32
    %181 = vector.shape_cast %180 : vector<1x128xi1> to vector<1x128xi1>
    %182 = vector.broadcast %181 : vector<1x128xi1> to vector<32x128xi1>
    %183 = vector.broadcast %cst_47 : f32 to vector<32x128xf32>
    %184 = arith.select %182, %33, %183 : vector<32x128xi1>, vector<32x128xf32>
    %cst_48 = arith.constant dense<0xFF800000> : vector<32xf32>
    %185 = vector.multi_reduction <maximumf>, %184, %cst_48 [1] : vector<32x128xf32> to vector<32xf32>
    %186 = vector.shape_cast %185 : vector<32xf32> to vector<32x1xf32>
    %187 = vector.shape_cast %180 : vector<1x128xi1> to vector<1x128xi1>
    %188 = vector.broadcast %187 : vector<1x128xi1> to vector<32x128xi1>
    %189 = vector.shape_cast %186 : vector<32x1xf32> to vector<32x1xf32>
    %190 = vector.broadcast %189 : vector<32x1xf32> to vector<32x128xf32>
    %191 = arith.select %188, %190, %178 : vector<32x128xi1>, vector<32x128xf32>
    %c12_i32 = arith.constant 12 : i32
    %192 = vector.broadcast %c12_i32 : i32 to vector<1x128xi32>
    %193 = arith.cmpi eq, %34, %192 : vector<1x128xi32>
    %cst_49 = arith.constant -3.40282347E+38 : f32
    %194 = vector.shape_cast %193 : vector<1x128xi1> to vector<1x128xi1>
    %195 = vector.broadcast %194 : vector<1x128xi1> to vector<32x128xi1>
    %196 = vector.broadcast %cst_49 : f32 to vector<32x128xf32>
    %197 = arith.select %195, %33, %196 : vector<32x128xi1>, vector<32x128xf32>
    %cst_50 = arith.constant dense<0xFF800000> : vector<32xf32>
    %198 = vector.multi_reduction <maximumf>, %197, %cst_50 [1] : vector<32x128xf32> to vector<32xf32>
    %199 = vector.shape_cast %198 : vector<32xf32> to vector<32x1xf32>
    %200 = vector.shape_cast %193 : vector<1x128xi1> to vector<1x128xi1>
    %201 = vector.broadcast %200 : vector<1x128xi1> to vector<32x128xi1>
    %202 = vector.shape_cast %199 : vector<32x1xf32> to vector<32x1xf32>
    %203 = vector.broadcast %202 : vector<32x1xf32> to vector<32x128xf32>
    %204 = arith.select %201, %203, %191 : vector<32x128xi1>, vector<32x128xf32>
    %c13_i32 = arith.constant 13 : i32
    %205 = vector.broadcast %c13_i32 : i32 to vector<1x128xi32>
    %206 = arith.cmpi eq, %34, %205 : vector<1x128xi32>
    %cst_51 = arith.constant -3.40282347E+38 : f32
    %207 = vector.shape_cast %206 : vector<1x128xi1> to vector<1x128xi1>
    %208 = vector.broadcast %207 : vector<1x128xi1> to vector<32x128xi1>
    %209 = vector.broadcast %cst_51 : f32 to vector<32x128xf32>
    %210 = arith.select %208, %33, %209 : vector<32x128xi1>, vector<32x128xf32>
    %cst_52 = arith.constant dense<0xFF800000> : vector<32xf32>
    %211 = vector.multi_reduction <maximumf>, %210, %cst_52 [1] : vector<32x128xf32> to vector<32xf32>
    %212 = vector.shape_cast %211 : vector<32xf32> to vector<32x1xf32>
    %213 = vector.shape_cast %206 : vector<1x128xi1> to vector<1x128xi1>
    %214 = vector.broadcast %213 : vector<1x128xi1> to vector<32x128xi1>
    %215 = vector.shape_cast %212 : vector<32x1xf32> to vector<32x1xf32>
    %216 = vector.broadcast %215 : vector<32x1xf32> to vector<32x128xf32>
    %217 = arith.select %214, %216, %204 : vector<32x128xi1>, vector<32x128xf32>
    %c14_i32 = arith.constant 14 : i32
    %218 = vector.broadcast %c14_i32 : i32 to vector<1x128xi32>
    %219 = arith.cmpi eq, %34, %218 : vector<1x128xi32>
    %cst_53 = arith.constant -3.40282347E+38 : f32
    %220 = vector.shape_cast %219 : vector<1x128xi1> to vector<1x128xi1>
    %221 = vector.broadcast %220 : vector<1x128xi1> to vector<32x128xi1>
    %222 = vector.broadcast %cst_53 : f32 to vector<32x128xf32>
    %223 = arith.select %221, %33, %222 : vector<32x128xi1>, vector<32x128xf32>
    %cst_54 = arith.constant dense<0xFF800000> : vector<32xf32>
    %224 = vector.multi_reduction <maximumf>, %223, %cst_54 [1] : vector<32x128xf32> to vector<32xf32>
    %225 = vector.shape_cast %224 : vector<32xf32> to vector<32x1xf32>
    %226 = vector.shape_cast %219 : vector<1x128xi1> to vector<1x128xi1>
    %227 = vector.broadcast %226 : vector<1x128xi1> to vector<32x128xi1>
    %228 = vector.shape_cast %225 : vector<32x1xf32> to vector<32x1xf32>
    %229 = vector.broadcast %228 : vector<32x1xf32> to vector<32x128xf32>
    %230 = arith.select %227, %229, %217 : vector<32x128xi1>, vector<32x128xf32>
    %c15_i32 = arith.constant 15 : i32
    %231 = vector.broadcast %c15_i32 : i32 to vector<1x128xi32>
    %232 = arith.cmpi eq, %34, %231 : vector<1x128xi32>
    %cst_55 = arith.constant -3.40282347E+38 : f32
    %233 = vector.shape_cast %232 : vector<1x128xi1> to vector<1x128xi1>
    %234 = vector.broadcast %233 : vector<1x128xi1> to vector<32x128xi1>
    %235 = vector.broadcast %cst_55 : f32 to vector<32x128xf32>
    %236 = arith.select %234, %33, %235 : vector<32x128xi1>, vector<32x128xf32>
    %cst_56 = arith.constant dense<0xFF800000> : vector<32xf32>
    %237 = vector.multi_reduction <maximumf>, %236, %cst_56 [1] : vector<32x128xf32> to vector<32xf32>
    %238 = vector.shape_cast %237 : vector<32xf32> to vector<32x1xf32>
    %239 = vector.shape_cast %232 : vector<1x128xi1> to vector<1x128xi1>
    %240 = vector.broadcast %239 : vector<1x128xi1> to vector<32x128xi1>
    %241 = vector.shape_cast %238 : vector<32x1xf32> to vector<32x1xf32>
    %242 = vector.broadcast %241 : vector<32x1xf32> to vector<32x128xf32>
    %243 = arith.select %240, %242, %230 : vector<32x128xi1>, vector<32x128xf32>
    %c16_i32 = arith.constant 16 : i32
    %244 = vector.broadcast %c16_i32 : i32 to vector<1x128xi32>
    %245 = arith.cmpi eq, %34, %244 : vector<1x128xi32>
    %cst_57 = arith.constant -3.40282347E+38 : f32
    %246 = vector.shape_cast %245 : vector<1x128xi1> to vector<1x128xi1>
    %247 = vector.broadcast %246 : vector<1x128xi1> to vector<32x128xi1>
    %248 = vector.broadcast %cst_57 : f32 to vector<32x128xf32>
    %249 = arith.select %247, %33, %248 : vector<32x128xi1>, vector<32x128xf32>
    %cst_58 = arith.constant dense<0xFF800000> : vector<32xf32>
    %250 = vector.multi_reduction <maximumf>, %249, %cst_58 [1] : vector<32x128xf32> to vector<32xf32>
    %251 = vector.shape_cast %250 : vector<32xf32> to vector<32x1xf32>
    %252 = vector.shape_cast %245 : vector<1x128xi1> to vector<1x128xi1>
    %253 = vector.broadcast %252 : vector<1x128xi1> to vector<32x128xi1>
    %254 = vector.shape_cast %251 : vector<32x1xf32> to vector<32x1xf32>
    %255 = vector.broadcast %254 : vector<32x1xf32> to vector<32x128xf32>
    %256 = arith.select %253, %255, %243 : vector<32x128xi1>, vector<32x128xf32>
    %c17_i32 = arith.constant 17 : i32
    %257 = vector.broadcast %c17_i32 : i32 to vector<1x128xi32>
    %258 = arith.cmpi eq, %34, %257 : vector<1x128xi32>
    %cst_59 = arith.constant -3.40282347E+38 : f32
    %259 = vector.shape_cast %258 : vector<1x128xi1> to vector<1x128xi1>
    %260 = vector.broadcast %259 : vector<1x128xi1> to vector<32x128xi1>
    %261 = vector.broadcast %cst_59 : f32 to vector<32x128xf32>
    %262 = arith.select %260, %33, %261 : vector<32x128xi1>, vector<32x128xf32>
    %cst_60 = arith.constant dense<0xFF800000> : vector<32xf32>
    %263 = vector.multi_reduction <maximumf>, %262, %cst_60 [1] : vector<32x128xf32> to vector<32xf32>
    %264 = vector.shape_cast %263 : vector<32xf32> to vector<32x1xf32>
    %265 = vector.shape_cast %258 : vector<1x128xi1> to vector<1x128xi1>
    %266 = vector.broadcast %265 : vector<1x128xi1> to vector<32x128xi1>
    %267 = vector.shape_cast %264 : vector<32x1xf32> to vector<32x1xf32>
    %268 = vector.broadcast %267 : vector<32x1xf32> to vector<32x128xf32>
    %269 = arith.select %266, %268, %256 : vector<32x128xi1>, vector<32x128xf32>
    %c18_i32 = arith.constant 18 : i32
    %270 = vector.broadcast %c18_i32 : i32 to vector<1x128xi32>
    %271 = arith.cmpi eq, %34, %270 : vector<1x128xi32>
    %cst_61 = arith.constant -3.40282347E+38 : f32
    %272 = vector.shape_cast %271 : vector<1x128xi1> to vector<1x128xi1>
    %273 = vector.broadcast %272 : vector<1x128xi1> to vector<32x128xi1>
    %274 = vector.broadcast %cst_61 : f32 to vector<32x128xf32>
    %275 = arith.select %273, %33, %274 : vector<32x128xi1>, vector<32x128xf32>
    %cst_62 = arith.constant dense<0xFF800000> : vector<32xf32>
    %276 = vector.multi_reduction <maximumf>, %275, %cst_62 [1] : vector<32x128xf32> to vector<32xf32>
    %277 = vector.shape_cast %276 : vector<32xf32> to vector<32x1xf32>
    %278 = vector.shape_cast %271 : vector<1x128xi1> to vector<1x128xi1>
    %279 = vector.broadcast %278 : vector<1x128xi1> to vector<32x128xi1>
    %280 = vector.shape_cast %277 : vector<32x1xf32> to vector<32x1xf32>
    %281 = vector.broadcast %280 : vector<32x1xf32> to vector<32x128xf32>
    %282 = arith.select %279, %281, %269 : vector<32x128xi1>, vector<32x128xf32>
    %c19_i32 = arith.constant 19 : i32
    %283 = vector.broadcast %c19_i32 : i32 to vector<1x128xi32>
    %284 = arith.cmpi eq, %34, %283 : vector<1x128xi32>
    %cst_63 = arith.constant -3.40282347E+38 : f32
    %285 = vector.shape_cast %284 : vector<1x128xi1> to vector<1x128xi1>
    %286 = vector.broadcast %285 : vector<1x128xi1> to vector<32x128xi1>
    %287 = vector.broadcast %cst_63 : f32 to vector<32x128xf32>
    %288 = arith.select %286, %33, %287 : vector<32x128xi1>, vector<32x128xf32>
    %cst_64 = arith.constant dense<0xFF800000> : vector<32xf32>
    %289 = vector.multi_reduction <maximumf>, %288, %cst_64 [1] : vector<32x128xf32> to vector<32xf32>
    %290 = vector.shape_cast %289 : vector<32xf32> to vector<32x1xf32>
    %291 = vector.shape_cast %284 : vector<1x128xi1> to vector<1x128xi1>
    %292 = vector.broadcast %291 : vector<1x128xi1> to vector<32x128xi1>
    %293 = vector.shape_cast %290 : vector<32x1xf32> to vector<32x1xf32>
    %294 = vector.broadcast %293 : vector<32x1xf32> to vector<32x128xf32>
    %295 = arith.select %292, %294, %282 : vector<32x128xi1>, vector<32x128xf32>
    %c20_i32 = arith.constant 20 : i32
    %296 = vector.broadcast %c20_i32 : i32 to vector<1x128xi32>
    %297 = arith.cmpi eq, %34, %296 : vector<1x128xi32>
    %cst_65 = arith.constant -3.40282347E+38 : f32
    %298 = vector.shape_cast %297 : vector<1x128xi1> to vector<1x128xi1>
    %299 = vector.broadcast %298 : vector<1x128xi1> to vector<32x128xi1>
    %300 = vector.broadcast %cst_65 : f32 to vector<32x128xf32>
    %301 = arith.select %299, %33, %300 : vector<32x128xi1>, vector<32x128xf32>
    %cst_66 = arith.constant dense<0xFF800000> : vector<32xf32>
    %302 = vector.multi_reduction <maximumf>, %301, %cst_66 [1] : vector<32x128xf32> to vector<32xf32>
    %303 = vector.shape_cast %302 : vector<32xf32> to vector<32x1xf32>
    %304 = vector.shape_cast %297 : vector<1x128xi1> to vector<1x128xi1>
    %305 = vector.broadcast %304 : vector<1x128xi1> to vector<32x128xi1>
    %306 = vector.shape_cast %303 : vector<32x1xf32> to vector<32x1xf32>
    %307 = vector.broadcast %306 : vector<32x1xf32> to vector<32x128xf32>
    %308 = arith.select %305, %307, %295 : vector<32x128xi1>, vector<32x128xf32>
    %c21_i32 = arith.constant 21 : i32
    %309 = vector.broadcast %c21_i32 : i32 to vector<1x128xi32>
    %310 = arith.cmpi eq, %34, %309 : vector<1x128xi32>
    %cst_67 = arith.constant -3.40282347E+38 : f32
    %311 = vector.shape_cast %310 : vector<1x128xi1> to vector<1x128xi1>
    %312 = vector.broadcast %311 : vector<1x128xi1> to vector<32x128xi1>
    %313 = vector.broadcast %cst_67 : f32 to vector<32x128xf32>
    %314 = arith.select %312, %33, %313 : vector<32x128xi1>, vector<32x128xf32>
    %cst_68 = arith.constant dense<0xFF800000> : vector<32xf32>
    %315 = vector.multi_reduction <maximumf>, %314, %cst_68 [1] : vector<32x128xf32> to vector<32xf32>
    %316 = vector.shape_cast %315 : vector<32xf32> to vector<32x1xf32>
    %317 = vector.shape_cast %310 : vector<1x128xi1> to vector<1x128xi1>
    %318 = vector.broadcast %317 : vector<1x128xi1> to vector<32x128xi1>
    %319 = vector.shape_cast %316 : vector<32x1xf32> to vector<32x1xf32>
    %320 = vector.broadcast %319 : vector<32x1xf32> to vector<32x128xf32>
    %321 = arith.select %318, %320, %308 : vector<32x128xi1>, vector<32x128xf32>
    %c22_i32 = arith.constant 22 : i32
    %322 = vector.broadcast %c22_i32 : i32 to vector<1x128xi32>
    %323 = arith.cmpi eq, %34, %322 : vector<1x128xi32>
    %cst_69 = arith.constant -3.40282347E+38 : f32
    %324 = vector.shape_cast %323 : vector<1x128xi1> to vector<1x128xi1>
    %325 = vector.broadcast %324 : vector<1x128xi1> to vector<32x128xi1>
    %326 = vector.broadcast %cst_69 : f32 to vector<32x128xf32>
    %327 = arith.select %325, %33, %326 : vector<32x128xi1>, vector<32x128xf32>
    %cst_70 = arith.constant dense<0xFF800000> : vector<32xf32>
    %328 = vector.multi_reduction <maximumf>, %327, %cst_70 [1] : vector<32x128xf32> to vector<32xf32>
    %329 = vector.shape_cast %328 : vector<32xf32> to vector<32x1xf32>
    %330 = vector.shape_cast %323 : vector<1x128xi1> to vector<1x128xi1>
    %331 = vector.broadcast %330 : vector<1x128xi1> to vector<32x128xi1>
    %332 = vector.shape_cast %329 : vector<32x1xf32> to vector<32x1xf32>
    %333 = vector.broadcast %332 : vector<32x1xf32> to vector<32x128xf32>
    %334 = arith.select %331, %333, %321 : vector<32x128xi1>, vector<32x128xf32>
    %c23_i32 = arith.constant 23 : i32
    %335 = vector.broadcast %c23_i32 : i32 to vector<1x128xi32>
    %336 = arith.cmpi eq, %34, %335 : vector<1x128xi32>
    %cst_71 = arith.constant -3.40282347E+38 : f32
    %337 = vector.shape_cast %336 : vector<1x128xi1> to vector<1x128xi1>
    %338 = vector.broadcast %337 : vector<1x128xi1> to vector<32x128xi1>
    %339 = vector.broadcast %cst_71 : f32 to vector<32x128xf32>
    %340 = arith.select %338, %33, %339 : vector<32x128xi1>, vector<32x128xf32>
    %cst_72 = arith.constant dense<0xFF800000> : vector<32xf32>
    %341 = vector.multi_reduction <maximumf>, %340, %cst_72 [1] : vector<32x128xf32> to vector<32xf32>
    %342 = vector.shape_cast %341 : vector<32xf32> to vector<32x1xf32>
    %343 = vector.shape_cast %336 : vector<1x128xi1> to vector<1x128xi1>
    %344 = vector.broadcast %343 : vector<1x128xi1> to vector<32x128xi1>
    %345 = vector.shape_cast %342 : vector<32x1xf32> to vector<32x1xf32>
    %346 = vector.broadcast %345 : vector<32x1xf32> to vector<32x128xf32>
    %347 = arith.select %344, %346, %334 : vector<32x128xi1>, vector<32x128xf32>
    %c24_i32 = arith.constant 24 : i32
    %348 = vector.broadcast %c24_i32 : i32 to vector<1x128xi32>
    %349 = arith.cmpi eq, %34, %348 : vector<1x128xi32>
    %cst_73 = arith.constant -3.40282347E+38 : f32
    %350 = vector.shape_cast %349 : vector<1x128xi1> to vector<1x128xi1>
    %351 = vector.broadcast %350 : vector<1x128xi1> to vector<32x128xi1>
    %352 = vector.broadcast %cst_73 : f32 to vector<32x128xf32>
    %353 = arith.select %351, %33, %352 : vector<32x128xi1>, vector<32x128xf32>
    %cst_74 = arith.constant dense<0xFF800000> : vector<32xf32>
    %354 = vector.multi_reduction <maximumf>, %353, %cst_74 [1] : vector<32x128xf32> to vector<32xf32>
    %355 = vector.shape_cast %354 : vector<32xf32> to vector<32x1xf32>
    %356 = vector.shape_cast %349 : vector<1x128xi1> to vector<1x128xi1>
    %357 = vector.broadcast %356 : vector<1x128xi1> to vector<32x128xi1>
    %358 = vector.shape_cast %355 : vector<32x1xf32> to vector<32x1xf32>
    %359 = vector.broadcast %358 : vector<32x1xf32> to vector<32x128xf32>
    %360 = arith.select %357, %359, %347 : vector<32x128xi1>, vector<32x128xf32>
    %c25_i32 = arith.constant 25 : i32
    %361 = vector.broadcast %c25_i32 : i32 to vector<1x128xi32>
    %362 = arith.cmpi eq, %34, %361 : vector<1x128xi32>
    %cst_75 = arith.constant -3.40282347E+38 : f32
    %363 = vector.shape_cast %362 : vector<1x128xi1> to vector<1x128xi1>
    %364 = vector.broadcast %363 : vector<1x128xi1> to vector<32x128xi1>
    %365 = vector.broadcast %cst_75 : f32 to vector<32x128xf32>
    %366 = arith.select %364, %33, %365 : vector<32x128xi1>, vector<32x128xf32>
    %cst_76 = arith.constant dense<0xFF800000> : vector<32xf32>
    %367 = vector.multi_reduction <maximumf>, %366, %cst_76 [1] : vector<32x128xf32> to vector<32xf32>
    %368 = vector.shape_cast %367 : vector<32xf32> to vector<32x1xf32>
    %369 = vector.shape_cast %362 : vector<1x128xi1> to vector<1x128xi1>
    %370 = vector.broadcast %369 : vector<1x128xi1> to vector<32x128xi1>
    %371 = vector.shape_cast %368 : vector<32x1xf32> to vector<32x1xf32>
    %372 = vector.broadcast %371 : vector<32x1xf32> to vector<32x128xf32>
    %373 = arith.select %370, %372, %360 : vector<32x128xi1>, vector<32x128xf32>
    %c26_i32 = arith.constant 26 : i32
    %374 = vector.broadcast %c26_i32 : i32 to vector<1x128xi32>
    %375 = arith.cmpi eq, %34, %374 : vector<1x128xi32>
    %cst_77 = arith.constant -3.40282347E+38 : f32
    %376 = vector.shape_cast %375 : vector<1x128xi1> to vector<1x128xi1>
    %377 = vector.broadcast %376 : vector<1x128xi1> to vector<32x128xi1>
    %378 = vector.broadcast %cst_77 : f32 to vector<32x128xf32>
    %379 = arith.select %377, %33, %378 : vector<32x128xi1>, vector<32x128xf32>
    %cst_78 = arith.constant dense<0xFF800000> : vector<32xf32>
    %380 = vector.multi_reduction <maximumf>, %379, %cst_78 [1] : vector<32x128xf32> to vector<32xf32>
    %381 = vector.shape_cast %380 : vector<32xf32> to vector<32x1xf32>
    %382 = vector.shape_cast %375 : vector<1x128xi1> to vector<1x128xi1>
    %383 = vector.broadcast %382 : vector<1x128xi1> to vector<32x128xi1>
    %384 = vector.shape_cast %381 : vector<32x1xf32> to vector<32x1xf32>
    %385 = vector.broadcast %384 : vector<32x1xf32> to vector<32x128xf32>
    %386 = arith.select %383, %385, %373 : vector<32x128xi1>, vector<32x128xf32>
    %c27_i32 = arith.constant 27 : i32
    %387 = vector.broadcast %c27_i32 : i32 to vector<1x128xi32>
    %388 = arith.cmpi eq, %34, %387 : vector<1x128xi32>
    %cst_79 = arith.constant -3.40282347E+38 : f32
    %389 = vector.shape_cast %388 : vector<1x128xi1> to vector<1x128xi1>
    %390 = vector.broadcast %389 : vector<1x128xi1> to vector<32x128xi1>
    %391 = vector.broadcast %cst_79 : f32 to vector<32x128xf32>
    %392 = arith.select %390, %33, %391 : vector<32x128xi1>, vector<32x128xf32>
    %cst_80 = arith.constant dense<0xFF800000> : vector<32xf32>
    %393 = vector.multi_reduction <maximumf>, %392, %cst_80 [1] : vector<32x128xf32> to vector<32xf32>
    %394 = vector.shape_cast %393 : vector<32xf32> to vector<32x1xf32>
    %395 = vector.shape_cast %388 : vector<1x128xi1> to vector<1x128xi1>
    %396 = vector.broadcast %395 : vector<1x128xi1> to vector<32x128xi1>
    %397 = vector.shape_cast %394 : vector<32x1xf32> to vector<32x1xf32>
    %398 = vector.broadcast %397 : vector<32x1xf32> to vector<32x128xf32>
    %399 = arith.select %396, %398, %386 : vector<32x128xi1>, vector<32x128xf32>
    %c28_i32 = arith.constant 28 : i32
    %400 = vector.broadcast %c28_i32 : i32 to vector<1x128xi32>
    %401 = arith.cmpi eq, %34, %400 : vector<1x128xi32>
    %cst_81 = arith.constant -3.40282347E+38 : f32
    %402 = vector.shape_cast %401 : vector<1x128xi1> to vector<1x128xi1>
    %403 = vector.broadcast %402 : vector<1x128xi1> to vector<32x128xi1>
    %404 = vector.broadcast %cst_81 : f32 to vector<32x128xf32>
    %405 = arith.select %403, %33, %404 : vector<32x128xi1>, vector<32x128xf32>
    %cst_82 = arith.constant dense<0xFF800000> : vector<32xf32>
    %406 = vector.multi_reduction <maximumf>, %405, %cst_82 [1] : vector<32x128xf32> to vector<32xf32>
    %407 = vector.shape_cast %406 : vector<32xf32> to vector<32x1xf32>
    %408 = vector.shape_cast %401 : vector<1x128xi1> to vector<1x128xi1>
    %409 = vector.broadcast %408 : vector<1x128xi1> to vector<32x128xi1>
    %410 = vector.shape_cast %407 : vector<32x1xf32> to vector<32x1xf32>
    %411 = vector.broadcast %410 : vector<32x1xf32> to vector<32x128xf32>
    %412 = arith.select %409, %411, %399 : vector<32x128xi1>, vector<32x128xf32>
    %c29_i32 = arith.constant 29 : i32
    %413 = vector.broadcast %c29_i32 : i32 to vector<1x128xi32>
    %414 = arith.cmpi eq, %34, %413 : vector<1x128xi32>
    %cst_83 = arith.constant -3.40282347E+38 : f32
    %415 = vector.shape_cast %414 : vector<1x128xi1> to vector<1x128xi1>
    %416 = vector.broadcast %415 : vector<1x128xi1> to vector<32x128xi1>
    %417 = vector.broadcast %cst_83 : f32 to vector<32x128xf32>
    %418 = arith.select %416, %33, %417 : vector<32x128xi1>, vector<32x128xf32>
    %cst_84 = arith.constant dense<0xFF800000> : vector<32xf32>
    %419 = vector.multi_reduction <maximumf>, %418, %cst_84 [1] : vector<32x128xf32> to vector<32xf32>
    %420 = vector.shape_cast %419 : vector<32xf32> to vector<32x1xf32>
    %421 = vector.shape_cast %414 : vector<1x128xi1> to vector<1x128xi1>
    %422 = vector.broadcast %421 : vector<1x128xi1> to vector<32x128xi1>
    %423 = vector.shape_cast %420 : vector<32x1xf32> to vector<32x1xf32>
    %424 = vector.broadcast %423 : vector<32x1xf32> to vector<32x128xf32>
    %425 = arith.select %422, %424, %412 : vector<32x128xi1>, vector<32x128xf32>
    %c30_i32 = arith.constant 30 : i32
    %426 = vector.broadcast %c30_i32 : i32 to vector<1x128xi32>
    %427 = arith.cmpi eq, %34, %426 : vector<1x128xi32>
    %cst_85 = arith.constant -3.40282347E+38 : f32
    %428 = vector.shape_cast %427 : vector<1x128xi1> to vector<1x128xi1>
    %429 = vector.broadcast %428 : vector<1x128xi1> to vector<32x128xi1>
    %430 = vector.broadcast %cst_85 : f32 to vector<32x128xf32>
    %431 = arith.select %429, %33, %430 : vector<32x128xi1>, vector<32x128xf32>
    %cst_86 = arith.constant dense<0xFF800000> : vector<32xf32>
    %432 = vector.multi_reduction <maximumf>, %431, %cst_86 [1] : vector<32x128xf32> to vector<32xf32>
    %433 = vector.shape_cast %432 : vector<32xf32> to vector<32x1xf32>
    %434 = vector.shape_cast %427 : vector<1x128xi1> to vector<1x128xi1>
    %435 = vector.broadcast %434 : vector<1x128xi1> to vector<32x128xi1>
    %436 = vector.shape_cast %433 : vector<32x1xf32> to vector<32x1xf32>
    %437 = vector.broadcast %436 : vector<32x1xf32> to vector<32x128xf32>
    %438 = arith.select %435, %437, %425 : vector<32x128xi1>, vector<32x128xf32>
    %c31_i32 = arith.constant 31 : i32
    %439 = vector.broadcast %c31_i32 : i32 to vector<1x128xi32>
    %440 = arith.cmpi eq, %34, %439 : vector<1x128xi32>
    %cst_87 = arith.constant -3.40282347E+38 : f32
    %441 = vector.shape_cast %440 : vector<1x128xi1> to vector<1x128xi1>
    %442 = vector.broadcast %441 : vector<1x128xi1> to vector<32x128xi1>
    %443 = vector.broadcast %cst_87 : f32 to vector<32x128xf32>
    %444 = arith.select %442, %33, %443 : vector<32x128xi1>, vector<32x128xf32>
    %cst_88 = arith.constant dense<0xFF800000> : vector<32xf32>
    %445 = vector.multi_reduction <maximumf>, %444, %cst_88 [1] : vector<32x128xf32> to vector<32xf32>
    %446 = vector.shape_cast %445 : vector<32xf32> to vector<32x1xf32>
    %447 = vector.shape_cast %440 : vector<1x128xi1> to vector<1x128xi1>
    %448 = vector.broadcast %447 : vector<1x128xi1> to vector<32x128xi1>
    %449 = vector.shape_cast %446 : vector<32x1xf32> to vector<32x1xf32>
    %450 = vector.broadcast %449 : vector<32x1xf32> to vector<32x128xf32>
    %451 = arith.select %448, %450, %438 : vector<32x128xi1>, vector<32x128xf32>
    %c32 = arith.constant 32 : index
    %c0_89 = arith.constant 0 : index
    %452 = vector.load %arg4[%c32, %c0_89] : memref<304x32xf32, #tpu.memory_space<vmem>>, vector<32x32xf32>
    %cst_90 = arith.constant 0.000000e+00 : f32
    %453 = vector.broadcast %cst_90 : f32 to vector<32x128xf32>
    %454 = arith.maximumf %33, %453 : vector<32x128xf32>
    %cst_91 = arith.constant dense<0.000000e+00> : vector<32x128xf32>
    %455 = tpu.matmul %452, %454, %cst_91 {dimension_numbers = #tpu.dot_dimension_numbers<[1], [0], [0], [1], [0, 0, 1, 1], [], []>} : vector<32x32xf32>, vector<32x128xf32>, vector<32x128xf32> -> vector<32x128xf32>
    %c64_92 = arith.constant 64 : index
    %c0_93 = arith.constant 0 : index
    %456 = vector.load %arg4[%c64_92, %c0_93] : memref<304x32xf32, #tpu.memory_space<vmem>>, vector<32x32xf32>
    %cst_94 = arith.constant 0.000000e+00 : f32
    %457 = vector.broadcast %cst_94 : f32 to vector<32x128xf32>
    %458 = arith.maximumf %451, %457 : vector<32x128xf32>
    %cst_95 = arith.constant dense<0.000000e+00> : vector<32x128xf32>
    %459 = tpu.matmul %456, %458, %cst_95 {dimension_numbers = #tpu.dot_dimension_numbers<[1], [0], [0], [1], [0, 0, 1, 1], [], []>} : vector<32x32xf32>, vector<32x128xf32>, vector<32x128xf32> -> vector<32x128xf32>
    %460 = arith.addf %455, %459 : vector<32x128xf32>
    %c0_96 = arith.constant 0 : index
    %c3 = arith.constant 3 : index
    %461 = vector.load %arg5[%c0_96, %c3] : memref<64x8xf32, #tpu.memory_space<vmem>>, vector<32x1xf32>
    %462 = vector.broadcast %461 : vector<32x1xf32> to vector<32x128xf32>
    %463 = arith.addf %460, %462 : vector<32x128xf32>
    %c128 = arith.constant 128 : index
    %c0_97 = arith.constant 0 : index
    %464 = vector.load %arg4[%c128, %c0_97] : memref<304x32xf32, #tpu.memory_space<vmem>>, vector<32x32xf32>
    %cst_98 = arith.constant dense<0.000000e+00> : vector<32x128xf32>
    %465 = tpu.matmul %464, %33, %cst_98 {dimension_numbers = #tpu.dot_dimension_numbers<[1], [0], [0], [1], [0, 0, 1, 1], [], []>} : vector<32x32xf32>, vector<32x128xf32>, vector<32x128xf32> -> vector<32x128xf32>
    %c160 = arith.constant 160 : index
    %c0_99 = arith.constant 0 : index
    %466 = vector.load %arg4[%c160, %c0_99] : memref<304x32xf32, #tpu.memory_space<vmem>>, vector<32x32xf32>
    %cst_100 = arith.constant dense<0.000000e+00> : vector<32x128xf32>
    %467 = tpu.matmul %466, %451, %cst_100 {dimension_numbers = #tpu.dot_dimension_numbers<[1], [0], [0], [1], [0, 0, 1, 1], [], []>} : vector<32x32xf32>, vector<32x128xf32>, vector<32x128xf32> -> vector<32x128xf32>
    %468 = arith.addf %465, %467 : vector<32x128xf32>
    %c96_101 = arith.constant 96 : index
    %c0_102 = arith.constant 0 : index
    %469 = vector.load %arg4[%c96_101, %c0_102] : memref<304x32xf32, #tpu.memory_space<vmem>>, vector<32x32xf32>
    %cst_103 = arith.constant 0.000000e+00 : f32
    %470 = vector.broadcast %cst_103 : f32 to vector<32x128xf32>
    %471 = arith.maximumf %463, %470 : vector<32x128xf32>
    %cst_104 = arith.constant dense<0.000000e+00> : vector<32x128xf32>
    %472 = tpu.matmul %469, %471, %cst_104 {dimension_numbers = #tpu.dot_dimension_numbers<[1], [0], [0], [1], [0, 0, 1, 1], [], []>} : vector<32x32xf32>, vector<32x128xf32>, vector<32x128xf32> -> vector<32x128xf32>
    %473 = arith.addf %468, %472 : vector<32x128xf32>
    %c0_105 = arith.constant 0 : index
    %c4 = arith.constant 4 : index
    %474 = vector.load %arg5[%c0_105, %c4] : memref<64x8xf32, #tpu.memory_space<vmem>>, vector<32x1xf32>
    %475 = vector.broadcast %474 : vector<32x1xf32> to vector<32x128xf32>
    %476 = arith.addf %473, %475 : vector<32x128xf32>
    %cst_106 = arith.constant 0.000000e+00 : f32
    %477 = vector.broadcast %cst_106 : f32 to vector<32x128xf32>
    %c0_i32_107 = arith.constant 0 : i32
    %478 = vector.broadcast %c0_i32_107 : i32 to vector<1x128xi32>
    %479 = arith.cmpi eq, %34, %478 : vector<1x128xi32>
    %cst_108 = arith.constant -3.40282347E+38 : f32
    %480 = vector.shape_cast %479 : vector<1x128xi1> to vector<1x128xi1>
    %481 = vector.broadcast %480 : vector<1x128xi1> to vector<32x128xi1>
    %482 = vector.broadcast %cst_108 : f32 to vector<32x128xf32>
    %483 = arith.select %481, %476, %482 : vector<32x128xi1>, vector<32x128xf32>
    %cst_109 = arith.constant dense<0xFF800000> : vector<32xf32>
    %484 = vector.multi_reduction <maximumf>, %483, %cst_109 [1] : vector<32x128xf32> to vector<32xf32>
    %485 = vector.shape_cast %484 : vector<32xf32> to vector<32x1xf32>
    %486 = vector.shape_cast %479 : vector<1x128xi1> to vector<1x128xi1>
    %487 = vector.broadcast %486 : vector<1x128xi1> to vector<32x128xi1>
    %488 = vector.shape_cast %485 : vector<32x1xf32> to vector<32x1xf32>
    %489 = vector.broadcast %488 : vector<32x1xf32> to vector<32x128xf32>
    %490 = arith.select %487, %489, %477 : vector<32x128xi1>, vector<32x128xf32>
    %c1_i32_110 = arith.constant 1 : i32
    %491 = vector.broadcast %c1_i32_110 : i32 to vector<1x128xi32>
    %492 = arith.cmpi eq, %34, %491 : vector<1x128xi32>
    %cst_111 = arith.constant -3.40282347E+38 : f32
    %493 = vector.shape_cast %492 : vector<1x128xi1> to vector<1x128xi1>
    %494 = vector.broadcast %493 : vector<1x128xi1> to vector<32x128xi1>
    %495 = vector.broadcast %cst_111 : f32 to vector<32x128xf32>
    %496 = arith.select %494, %476, %495 : vector<32x128xi1>, vector<32x128xf32>
    %cst_112 = arith.constant dense<0xFF800000> : vector<32xf32>
    %497 = vector.multi_reduction <maximumf>, %496, %cst_112 [1] : vector<32x128xf32> to vector<32xf32>
    %498 = vector.shape_cast %497 : vector<32xf32> to vector<32x1xf32>
    %499 = vector.shape_cast %492 : vector<1x128xi1> to vector<1x128xi1>
    %500 = vector.broadcast %499 : vector<1x128xi1> to vector<32x128xi1>
    %501 = vector.shape_cast %498 : vector<32x1xf32> to vector<32x1xf32>
    %502 = vector.broadcast %501 : vector<32x1xf32> to vector<32x128xf32>
    %503 = arith.select %500, %502, %490 : vector<32x128xi1>, vector<32x128xf32>
    %c2_i32_113 = arith.constant 2 : i32
    %504 = vector.broadcast %c2_i32_113 : i32 to vector<1x128xi32>
    %505 = arith.cmpi eq, %34, %504 : vector<1x128xi32>
    %cst_114 = arith.constant -3.40282347E+38 : f32
    %506 = vector.shape_cast %505 : vector<1x128xi1> to vector<1x128xi1>
    %507 = vector.broadcast %506 : vector<1x128xi1> to vector<32x128xi1>
    %508 = vector.broadcast %cst_114 : f32 to vector<32x128xf32>
    %509 = arith.select %507, %476, %508 : vector<32x128xi1>, vector<32x128xf32>
    %cst_115 = arith.constant dense<0xFF800000> : vector<32xf32>
    %510 = vector.multi_reduction <maximumf>, %509, %cst_115 [1] : vector<32x128xf32> to vector<32xf32>
    %511 = vector.shape_cast %510 : vector<32xf32> to vector<32x1xf32>
    %512 = vector.shape_cast %505 : vector<1x128xi1> to vector<1x128xi1>
    %513 = vector.broadcast %512 : vector<1x128xi1> to vector<32x128xi1>
    %514 = vector.shape_cast %511 : vector<32x1xf32> to vector<32x1xf32>
    %515 = vector.broadcast %514 : vector<32x1xf32> to vector<32x128xf32>
    %516 = arith.select %513, %515, %503 : vector<32x128xi1>, vector<32x128xf32>
    %c3_i32_116 = arith.constant 3 : i32
    %517 = vector.broadcast %c3_i32_116 : i32 to vector<1x128xi32>
    %518 = arith.cmpi eq, %34, %517 : vector<1x128xi32>
    %cst_117 = arith.constant -3.40282347E+38 : f32
    %519 = vector.shape_cast %518 : vector<1x128xi1> to vector<1x128xi1>
    %520 = vector.broadcast %519 : vector<1x128xi1> to vector<32x128xi1>
    %521 = vector.broadcast %cst_117 : f32 to vector<32x128xf32>
    %522 = arith.select %520, %476, %521 : vector<32x128xi1>, vector<32x128xf32>
    %cst_118 = arith.constant dense<0xFF800000> : vector<32xf32>
    %523 = vector.multi_reduction <maximumf>, %522, %cst_118 [1] : vector<32x128xf32> to vector<32xf32>
    %524 = vector.shape_cast %523 : vector<32xf32> to vector<32x1xf32>
    %525 = vector.shape_cast %518 : vector<1x128xi1> to vector<1x128xi1>
    %526 = vector.broadcast %525 : vector<1x128xi1> to vector<32x128xi1>
    %527 = vector.shape_cast %524 : vector<32x1xf32> to vector<32x1xf32>
    %528 = vector.broadcast %527 : vector<32x1xf32> to vector<32x128xf32>
    %529 = arith.select %526, %528, %516 : vector<32x128xi1>, vector<32x128xf32>
    %c4_i32_119 = arith.constant 4 : i32
    %530 = vector.broadcast %c4_i32_119 : i32 to vector<1x128xi32>
    %531 = arith.cmpi eq, %34, %530 : vector<1x128xi32>
    %cst_120 = arith.constant -3.40282347E+38 : f32
    %532 = vector.shape_cast %531 : vector<1x128xi1> to vector<1x128xi1>
    %533 = vector.broadcast %532 : vector<1x128xi1> to vector<32x128xi1>
    %534 = vector.broadcast %cst_120 : f32 to vector<32x128xf32>
    %535 = arith.select %533, %476, %534 : vector<32x128xi1>, vector<32x128xf32>
    %cst_121 = arith.constant dense<0xFF800000> : vector<32xf32>
    %536 = vector.multi_reduction <maximumf>, %535, %cst_121 [1] : vector<32x128xf32> to vector<32xf32>
    %537 = vector.shape_cast %536 : vector<32xf32> to vector<32x1xf32>
    %538 = vector.shape_cast %531 : vector<1x128xi1> to vector<1x128xi1>
    %539 = vector.broadcast %538 : vector<1x128xi1> to vector<32x128xi1>
    %540 = vector.shape_cast %537 : vector<32x1xf32> to vector<32x1xf32>
    %541 = vector.broadcast %540 : vector<32x1xf32> to vector<32x128xf32>
    %542 = arith.select %539, %541, %529 : vector<32x128xi1>, vector<32x128xf32>
    %c5_i32_122 = arith.constant 5 : i32
    %543 = vector.broadcast %c5_i32_122 : i32 to vector<1x128xi32>
    %544 = arith.cmpi eq, %34, %543 : vector<1x128xi32>
    %cst_123 = arith.constant -3.40282347E+38 : f32
    %545 = vector.shape_cast %544 : vector<1x128xi1> to vector<1x128xi1>
    %546 = vector.broadcast %545 : vector<1x128xi1> to vector<32x128xi1>
    %547 = vector.broadcast %cst_123 : f32 to vector<32x128xf32>
    %548 = arith.select %546, %476, %547 : vector<32x128xi1>, vector<32x128xf32>
    %cst_124 = arith.constant dense<0xFF800000> : vector<32xf32>
    %549 = vector.multi_reduction <maximumf>, %548, %cst_124 [1] : vector<32x128xf32> to vector<32xf32>
    %550 = vector.shape_cast %549 : vector<32xf32> to vector<32x1xf32>
    %551 = vector.shape_cast %544 : vector<1x128xi1> to vector<1x128xi1>
    %552 = vector.broadcast %551 : vector<1x128xi1> to vector<32x128xi1>
    %553 = vector.shape_cast %550 : vector<32x1xf32> to vector<32x1xf32>
    %554 = vector.broadcast %553 : vector<32x1xf32> to vector<32x128xf32>
    %555 = arith.select %552, %554, %542 : vector<32x128xi1>, vector<32x128xf32>
    %c6_i32_125 = arith.constant 6 : i32
    %556 = vector.broadcast %c6_i32_125 : i32 to vector<1x128xi32>
    %557 = arith.cmpi eq, %34, %556 : vector<1x128xi32>
    %cst_126 = arith.constant -3.40282347E+38 : f32
    %558 = vector.shape_cast %557 : vector<1x128xi1> to vector<1x128xi1>
    %559 = vector.broadcast %558 : vector<1x128xi1> to vector<32x128xi1>
    %560 = vector.broadcast %cst_126 : f32 to vector<32x128xf32>
    %561 = arith.select %559, %476, %560 : vector<32x128xi1>, vector<32x128xf32>
    %cst_127 = arith.constant dense<0xFF800000> : vector<32xf32>
    %562 = vector.multi_reduction <maximumf>, %561, %cst_127 [1] : vector<32x128xf32> to vector<32xf32>
    %563 = vector.shape_cast %562 : vector<32xf32> to vector<32x1xf32>
    %564 = vector.shape_cast %557 : vector<1x128xi1> to vector<1x128xi1>
    %565 = vector.broadcast %564 : vector<1x128xi1> to vector<32x128xi1>
    %566 = vector.shape_cast %563 : vector<32x1xf32> to vector<32x1xf32>
    %567 = vector.broadcast %566 : vector<32x1xf32> to vector<32x128xf32>
    %568 = arith.select %565, %567, %555 : vector<32x128xi1>, vector<32x128xf32>
    %c7_i32_128 = arith.constant 7 : i32
    %569 = vector.broadcast %c7_i32_128 : i32 to vector<1x128xi32>
    %570 = arith.cmpi eq, %34, %569 : vector<1x128xi32>
    %cst_129 = arith.constant -3.40282347E+38 : f32
    %571 = vector.shape_cast %570 : vector<1x128xi1> to vector<1x128xi1>
    %572 = vector.broadcast %571 : vector<1x128xi1> to vector<32x128xi1>
    %573 = vector.broadcast %cst_129 : f32 to vector<32x128xf32>
    %574 = arith.select %572, %476, %573 : vector<32x128xi1>, vector<32x128xf32>
    %cst_130 = arith.constant dense<0xFF800000> : vector<32xf32>
    %575 = vector.multi_reduction <maximumf>, %574, %cst_130 [1] : vector<32x128xf32> to vector<32xf32>
    %576 = vector.shape_cast %575 : vector<32xf32> to vector<32x1xf32>
    %577 = vector.shape_cast %570 : vector<1x128xi1> to vector<1x128xi1>
    %578 = vector.broadcast %577 : vector<1x128xi1> to vector<32x128xi1>
    %579 = vector.shape_cast %576 : vector<32x1xf32> to vector<32x1xf32>
    %580 = vector.broadcast %579 : vector<32x1xf32> to vector<32x128xf32>
    %581 = arith.select %578, %580, %568 : vector<32x128xi1>, vector<32x128xf32>
    %c8_i32_131 = arith.constant 8 : i32
    %582 = vector.broadcast %c8_i32_131 : i32 to vector<1x128xi32>
    %583 = arith.cmpi eq, %34, %582 : vector<1x128xi32>
    %cst_132 = arith.constant -3.40282347E+38 : f32
    %584 = vector.shape_cast %583 : vector<1x128xi1> to vector<1x128xi1>
    %585 = vector.broadcast %584 : vector<1x128xi1> to vector<32x128xi1>
    %586 = vector.broadcast %cst_132 : f32 to vector<32x128xf32>
    %587 = arith.select %585, %476, %586 : vector<32x128xi1>, vector<32x128xf32>
    %cst_133 = arith.constant dense<0xFF800000> : vector<32xf32>
    %588 = vector.multi_reduction <maximumf>, %587, %cst_133 [1] : vector<32x128xf32> to vector<32xf32>
    %589 = vector.shape_cast %588 : vector<32xf32> to vector<32x1xf32>
    %590 = vector.shape_cast %583 : vector<1x128xi1> to vector<1x128xi1>
    %591 = vector.broadcast %590 : vector<1x128xi1> to vector<32x128xi1>
    %592 = vector.shape_cast %589 : vector<32x1xf32> to vector<32x1xf32>
    %593 = vector.broadcast %592 : vector<32x1xf32> to vector<32x128xf32>
    %594 = arith.select %591, %593, %581 : vector<32x128xi1>, vector<32x128xf32>
    %c9_i32_134 = arith.constant 9 : i32
    %595 = vector.broadcast %c9_i32_134 : i32 to vector<1x128xi32>
    %596 = arith.cmpi eq, %34, %595 : vector<1x128xi32>
    %cst_135 = arith.constant -3.40282347E+38 : f32
    %597 = vector.shape_cast %596 : vector<1x128xi1> to vector<1x128xi1>
    %598 = vector.broadcast %597 : vector<1x128xi1> to vector<32x128xi1>
    %599 = vector.broadcast %cst_135 : f32 to vector<32x128xf32>
    %600 = arith.select %598, %476, %599 : vector<32x128xi1>, vector<32x128xf32>
    %cst_136 = arith.constant dense<0xFF800000> : vector<32xf32>
    %601 = vector.multi_reduction <maximumf>, %600, %cst_136 [1] : vector<32x128xf32> to vector<32xf32>
    %602 = vector.shape_cast %601 : vector<32xf32> to vector<32x1xf32>
    %603 = vector.shape_cast %596 : vector<1x128xi1> to vector<1x128xi1>
    %604 = vector.broadcast %603 : vector<1x128xi1> to vector<32x128xi1>
    %605 = vector.shape_cast %602 : vector<32x1xf32> to vector<32x1xf32>
    %606 = vector.broadcast %605 : vector<32x1xf32> to vector<32x128xf32>
    %607 = arith.select %604, %606, %594 : vector<32x128xi1>, vector<32x128xf32>
    %c10_i32_137 = arith.constant 10 : i32
    %608 = vector.broadcast %c10_i32_137 : i32 to vector<1x128xi32>
    %609 = arith.cmpi eq, %34, %608 : vector<1x128xi32>
    %cst_138 = arith.constant -3.40282347E+38 : f32
    %610 = vector.shape_cast %609 : vector<1x128xi1> to vector<1x128xi1>
    %611 = vector.broadcast %610 : vector<1x128xi1> to vector<32x128xi1>
    %612 = vector.broadcast %cst_138 : f32 to vector<32x128xf32>
    %613 = arith.select %611, %476, %612 : vector<32x128xi1>, vector<32x128xf32>
    %cst_139 = arith.constant dense<0xFF800000> : vector<32xf32>
    %614 = vector.multi_reduction <maximumf>, %613, %cst_139 [1] : vector<32x128xf32> to vector<32xf32>
    %615 = vector.shape_cast %614 : vector<32xf32> to vector<32x1xf32>
    %616 = vector.shape_cast %609 : vector<1x128xi1> to vector<1x128xi1>
    %617 = vector.broadcast %616 : vector<1x128xi1> to vector<32x128xi1>
    %618 = vector.shape_cast %615 : vector<32x1xf32> to vector<32x1xf32>
    %619 = vector.broadcast %618 : vector<32x1xf32> to vector<32x128xf32>
    %620 = arith.select %617, %619, %607 : vector<32x128xi1>, vector<32x128xf32>
    %c11_i32_140 = arith.constant 11 : i32
    %621 = vector.broadcast %c11_i32_140 : i32 to vector<1x128xi32>
    %622 = arith.cmpi eq, %34, %621 : vector<1x128xi32>
    %cst_141 = arith.constant -3.40282347E+38 : f32
    %623 = vector.shape_cast %622 : vector<1x128xi1> to vector<1x128xi1>
    %624 = vector.broadcast %623 : vector<1x128xi1> to vector<32x128xi1>
    %625 = vector.broadcast %cst_141 : f32 to vector<32x128xf32>
    %626 = arith.select %624, %476, %625 : vector<32x128xi1>, vector<32x128xf32>
    %cst_142 = arith.constant dense<0xFF800000> : vector<32xf32>
    %627 = vector.multi_reduction <maximumf>, %626, %cst_142 [1] : vector<32x128xf32> to vector<32xf32>
    %628 = vector.shape_cast %627 : vector<32xf32> to vector<32x1xf32>
    %629 = vector.shape_cast %622 : vector<1x128xi1> to vector<1x128xi1>
    %630 = vector.broadcast %629 : vector<1x128xi1> to vector<32x128xi1>
    %631 = vector.shape_cast %628 : vector<32x1xf32> to vector<32x1xf32>
    %632 = vector.broadcast %631 : vector<32x1xf32> to vector<32x128xf32>
    %633 = arith.select %630, %632, %620 : vector<32x128xi1>, vector<32x128xf32>
    %c12_i32_143 = arith.constant 12 : i32
    %634 = vector.broadcast %c12_i32_143 : i32 to vector<1x128xi32>
    %635 = arith.cmpi eq, %34, %634 : vector<1x128xi32>
    %cst_144 = arith.constant -3.40282347E+38 : f32
    %636 = vector.shape_cast %635 : vector<1x128xi1> to vector<1x128xi1>
    %637 = vector.broadcast %636 : vector<1x128xi1> to vector<32x128xi1>
    %638 = vector.broadcast %cst_144 : f32 to vector<32x128xf32>
    %639 = arith.select %637, %476, %638 : vector<32x128xi1>, vector<32x128xf32>
    %cst_145 = arith.constant dense<0xFF800000> : vector<32xf32>
    %640 = vector.multi_reduction <maximumf>, %639, %cst_145 [1] : vector<32x128xf32> to vector<32xf32>
    %641 = vector.shape_cast %640 : vector<32xf32> to vector<32x1xf32>
    %642 = vector.shape_cast %635 : vector<1x128xi1> to vector<1x128xi1>
    %643 = vector.broadcast %642 : vector<1x128xi1> to vector<32x128xi1>
    %644 = vector.shape_cast %641 : vector<32x1xf32> to vector<32x1xf32>
    %645 = vector.broadcast %644 : vector<32x1xf32> to vector<32x128xf32>
    %646 = arith.select %643, %645, %633 : vector<32x128xi1>, vector<32x128xf32>
    %c13_i32_146 = arith.constant 13 : i32
    %647 = vector.broadcast %c13_i32_146 : i32 to vector<1x128xi32>
    %648 = arith.cmpi eq, %34, %647 : vector<1x128xi32>
    %cst_147 = arith.constant -3.40282347E+38 : f32
    %649 = vector.shape_cast %648 : vector<1x128xi1> to vector<1x128xi1>
    %650 = vector.broadcast %649 : vector<1x128xi1> to vector<32x128xi1>
    %651 = vector.broadcast %cst_147 : f32 to vector<32x128xf32>
    %652 = arith.select %650, %476, %651 : vector<32x128xi1>, vector<32x128xf32>
    %cst_148 = arith.constant dense<0xFF800000> : vector<32xf32>
    %653 = vector.multi_reduction <maximumf>, %652, %cst_148 [1] : vector<32x128xf32> to vector<32xf32>
    %654 = vector.shape_cast %653 : vector<32xf32> to vector<32x1xf32>
    %655 = vector.shape_cast %648 : vector<1x128xi1> to vector<1x128xi1>
    %656 = vector.broadcast %655 : vector<1x128xi1> to vector<32x128xi1>
    %657 = vector.shape_cast %654 : vector<32x1xf32> to vector<32x1xf32>
    %658 = vector.broadcast %657 : vector<32x1xf32> to vector<32x128xf32>
    %659 = arith.select %656, %658, %646 : vector<32x128xi1>, vector<32x128xf32>
    %c14_i32_149 = arith.constant 14 : i32
    %660 = vector.broadcast %c14_i32_149 : i32 to vector<1x128xi32>
    %661 = arith.cmpi eq, %34, %660 : vector<1x128xi32>
    %cst_150 = arith.constant -3.40282347E+38 : f32
    %662 = vector.shape_cast %661 : vector<1x128xi1> to vector<1x128xi1>
    %663 = vector.broadcast %662 : vector<1x128xi1> to vector<32x128xi1>
    %664 = vector.broadcast %cst_150 : f32 to vector<32x128xf32>
    %665 = arith.select %663, %476, %664 : vector<32x128xi1>, vector<32x128xf32>
    %cst_151 = arith.constant dense<0xFF800000> : vector<32xf32>
    %666 = vector.multi_reduction <maximumf>, %665, %cst_151 [1] : vector<32x128xf32> to vector<32xf32>
    %667 = vector.shape_cast %666 : vector<32xf32> to vector<32x1xf32>
    %668 = vector.shape_cast %661 : vector<1x128xi1> to vector<1x128xi1>
    %669 = vector.broadcast %668 : vector<1x128xi1> to vector<32x128xi1>
    %670 = vector.shape_cast %667 : vector<32x1xf32> to vector<32x1xf32>
    %671 = vector.broadcast %670 : vector<32x1xf32> to vector<32x128xf32>
    %672 = arith.select %669, %671, %659 : vector<32x128xi1>, vector<32x128xf32>
    %c15_i32_152 = arith.constant 15 : i32
    %673 = vector.broadcast %c15_i32_152 : i32 to vector<1x128xi32>
    %674 = arith.cmpi eq, %34, %673 : vector<1x128xi32>
    %cst_153 = arith.constant -3.40282347E+38 : f32
    %675 = vector.shape_cast %674 : vector<1x128xi1> to vector<1x128xi1>
    %676 = vector.broadcast %675 : vector<1x128xi1> to vector<32x128xi1>
    %677 = vector.broadcast %cst_153 : f32 to vector<32x128xf32>
    %678 = arith.select %676, %476, %677 : vector<32x128xi1>, vector<32x128xf32>
    %cst_154 = arith.constant dense<0xFF800000> : vector<32xf32>
    %679 = vector.multi_reduction <maximumf>, %678, %cst_154 [1] : vector<32x128xf32> to vector<32xf32>
    %680 = vector.shape_cast %679 : vector<32xf32> to vector<32x1xf32>
    %681 = vector.shape_cast %674 : vector<1x128xi1> to vector<1x128xi1>
    %682 = vector.broadcast %681 : vector<1x128xi1> to vector<32x128xi1>
    %683 = vector.shape_cast %680 : vector<32x1xf32> to vector<32x1xf32>
    %684 = vector.broadcast %683 : vector<32x1xf32> to vector<32x128xf32>
    %685 = arith.select %682, %684, %672 : vector<32x128xi1>, vector<32x128xf32>
    %c16_i32_155 = arith.constant 16 : i32
    %686 = vector.broadcast %c16_i32_155 : i32 to vector<1x128xi32>
    %687 = arith.cmpi eq, %34, %686 : vector<1x128xi32>
    %cst_156 = arith.constant -3.40282347E+38 : f32
    %688 = vector.shape_cast %687 : vector<1x128xi1> to vector<1x128xi1>
    %689 = vector.broadcast %688 : vector<1x128xi1> to vector<32x128xi1>
    %690 = vector.broadcast %cst_156 : f32 to vector<32x128xf32>
    %691 = arith.select %689, %476, %690 : vector<32x128xi1>, vector<32x128xf32>
    %cst_157 = arith.constant dense<0xFF800000> : vector<32xf32>
    %692 = vector.multi_reduction <maximumf>, %691, %cst_157 [1] : vector<32x128xf32> to vector<32xf32>
    %693 = vector.shape_cast %692 : vector<32xf32> to vector<32x1xf32>
    %694 = vector.shape_cast %687 : vector<1x128xi1> to vector<1x128xi1>
    %695 = vector.broadcast %694 : vector<1x128xi1> to vector<32x128xi1>
    %696 = vector.shape_cast %693 : vector<32x1xf32> to vector<32x1xf32>
    %697 = vector.broadcast %696 : vector<32x1xf32> to vector<32x128xf32>
    %698 = arith.select %695, %697, %685 : vector<32x128xi1>, vector<32x128xf32>
    %c17_i32_158 = arith.constant 17 : i32
    %699 = vector.broadcast %c17_i32_158 : i32 to vector<1x128xi32>
    %700 = arith.cmpi eq, %34, %699 : vector<1x128xi32>
    %cst_159 = arith.constant -3.40282347E+38 : f32
    %701 = vector.shape_cast %700 : vector<1x128xi1> to vector<1x128xi1>
    %702 = vector.broadcast %701 : vector<1x128xi1> to vector<32x128xi1>
    %703 = vector.broadcast %cst_159 : f32 to vector<32x128xf32>
    %704 = arith.select %702, %476, %703 : vector<32x128xi1>, vector<32x128xf32>
    %cst_160 = arith.constant dense<0xFF800000> : vector<32xf32>
    %705 = vector.multi_reduction <maximumf>, %704, %cst_160 [1] : vector<32x128xf32> to vector<32xf32>
    %706 = vector.shape_cast %705 : vector<32xf32> to vector<32x1xf32>
    %707 = vector.shape_cast %700 : vector<1x128xi1> to vector<1x128xi1>
    %708 = vector.broadcast %707 : vector<1x128xi1> to vector<32x128xi1>
    %709 = vector.shape_cast %706 : vector<32x1xf32> to vector<32x1xf32>
    %710 = vector.broadcast %709 : vector<32x1xf32> to vector<32x128xf32>
    %711 = arith.select %708, %710, %698 : vector<32x128xi1>, vector<32x128xf32>
    %c18_i32_161 = arith.constant 18 : i32
    %712 = vector.broadcast %c18_i32_161 : i32 to vector<1x128xi32>
    %713 = arith.cmpi eq, %34, %712 : vector<1x128xi32>
    %cst_162 = arith.constant -3.40282347E+38 : f32
    %714 = vector.shape_cast %713 : vector<1x128xi1> to vector<1x128xi1>
    %715 = vector.broadcast %714 : vector<1x128xi1> to vector<32x128xi1>
    %716 = vector.broadcast %cst_162 : f32 to vector<32x128xf32>
    %717 = arith.select %715, %476, %716 : vector<32x128xi1>, vector<32x128xf32>
    %cst_163 = arith.constant dense<0xFF800000> : vector<32xf32>
    %718 = vector.multi_reduction <maximumf>, %717, %cst_163 [1] : vector<32x128xf32> to vector<32xf32>
    %719 = vector.shape_cast %718 : vector<32xf32> to vector<32x1xf32>
    %720 = vector.shape_cast %713 : vector<1x128xi1> to vector<1x128xi1>
    %721 = vector.broadcast %720 : vector<1x128xi1> to vector<32x128xi1>
    %722 = vector.shape_cast %719 : vector<32x1xf32> to vector<32x1xf32>
    %723 = vector.broadcast %722 : vector<32x1xf32> to vector<32x128xf32>
    %724 = arith.select %721, %723, %711 : vector<32x128xi1>, vector<32x128xf32>
    %c19_i32_164 = arith.constant 19 : i32
    %725 = vector.broadcast %c19_i32_164 : i32 to vector<1x128xi32>
    %726 = arith.cmpi eq, %34, %725 : vector<1x128xi32>
    %cst_165 = arith.constant -3.40282347E+38 : f32
    %727 = vector.shape_cast %726 : vector<1x128xi1> to vector<1x128xi1>
    %728 = vector.broadcast %727 : vector<1x128xi1> to vector<32x128xi1>
    %729 = vector.broadcast %cst_165 : f32 to vector<32x128xf32>
    %730 = arith.select %728, %476, %729 : vector<32x128xi1>, vector<32x128xf32>
    %cst_166 = arith.constant dense<0xFF800000> : vector<32xf32>
    %731 = vector.multi_reduction <maximumf>, %730, %cst_166 [1] : vector<32x128xf32> to vector<32xf32>
    %732 = vector.shape_cast %731 : vector<32xf32> to vector<32x1xf32>
    %733 = vector.shape_cast %726 : vector<1x128xi1> to vector<1x128xi1>
    %734 = vector.broadcast %733 : vector<1x128xi1> to vector<32x128xi1>
    %735 = vector.shape_cast %732 : vector<32x1xf32> to vector<32x1xf32>
    %736 = vector.broadcast %735 : vector<32x1xf32> to vector<32x128xf32>
    %737 = arith.select %734, %736, %724 : vector<32x128xi1>, vector<32x128xf32>
    %c20_i32_167 = arith.constant 20 : i32
    %738 = vector.broadcast %c20_i32_167 : i32 to vector<1x128xi32>
    %739 = arith.cmpi eq, %34, %738 : vector<1x128xi32>
    %cst_168 = arith.constant -3.40282347E+38 : f32
    %740 = vector.shape_cast %739 : vector<1x128xi1> to vector<1x128xi1>
    %741 = vector.broadcast %740 : vector<1x128xi1> to vector<32x128xi1>
    %742 = vector.broadcast %cst_168 : f32 to vector<32x128xf32>
    %743 = arith.select %741, %476, %742 : vector<32x128xi1>, vector<32x128xf32>
    %cst_169 = arith.constant dense<0xFF800000> : vector<32xf32>
    %744 = vector.multi_reduction <maximumf>, %743, %cst_169 [1] : vector<32x128xf32> to vector<32xf32>
    %745 = vector.shape_cast %744 : vector<32xf32> to vector<32x1xf32>
    %746 = vector.shape_cast %739 : vector<1x128xi1> to vector<1x128xi1>
    %747 = vector.broadcast %746 : vector<1x128xi1> to vector<32x128xi1>
    %748 = vector.shape_cast %745 : vector<32x1xf32> to vector<32x1xf32>
    %749 = vector.broadcast %748 : vector<32x1xf32> to vector<32x128xf32>
    %750 = arith.select %747, %749, %737 : vector<32x128xi1>, vector<32x128xf32>
    %c21_i32_170 = arith.constant 21 : i32
    %751 = vector.broadcast %c21_i32_170 : i32 to vector<1x128xi32>
    %752 = arith.cmpi eq, %34, %751 : vector<1x128xi32>
    %cst_171 = arith.constant -3.40282347E+38 : f32
    %753 = vector.shape_cast %752 : vector<1x128xi1> to vector<1x128xi1>
    %754 = vector.broadcast %753 : vector<1x128xi1> to vector<32x128xi1>
    %755 = vector.broadcast %cst_171 : f32 to vector<32x128xf32>
    %756 = arith.select %754, %476, %755 : vector<32x128xi1>, vector<32x128xf32>
    %cst_172 = arith.constant dense<0xFF800000> : vector<32xf32>
    %757 = vector.multi_reduction <maximumf>, %756, %cst_172 [1] : vector<32x128xf32> to vector<32xf32>
    %758 = vector.shape_cast %757 : vector<32xf32> to vector<32x1xf32>
    %759 = vector.shape_cast %752 : vector<1x128xi1> to vector<1x128xi1>
    %760 = vector.broadcast %759 : vector<1x128xi1> to vector<32x128xi1>
    %761 = vector.shape_cast %758 : vector<32x1xf32> to vector<32x1xf32>
    %762 = vector.broadcast %761 : vector<32x1xf32> to vector<32x128xf32>
    %763 = arith.select %760, %762, %750 : vector<32x128xi1>, vector<32x128xf32>
    %c22_i32_173 = arith.constant 22 : i32
    %764 = vector.broadcast %c22_i32_173 : i32 to vector<1x128xi32>
    %765 = arith.cmpi eq, %34, %764 : vector<1x128xi32>
    %cst_174 = arith.constant -3.40282347E+38 : f32
    %766 = vector.shape_cast %765 : vector<1x128xi1> to vector<1x128xi1>
    %767 = vector.broadcast %766 : vector<1x128xi1> to vector<32x128xi1>
    %768 = vector.broadcast %cst_174 : f32 to vector<32x128xf32>
    %769 = arith.select %767, %476, %768 : vector<32x128xi1>, vector<32x128xf32>
    %cst_175 = arith.constant dense<0xFF800000> : vector<32xf32>
    %770 = vector.multi_reduction <maximumf>, %769, %cst_175 [1] : vector<32x128xf32> to vector<32xf32>
    %771 = vector.shape_cast %770 : vector<32xf32> to vector<32x1xf32>
    %772 = vector.shape_cast %765 : vector<1x128xi1> to vector<1x128xi1>
    %773 = vector.broadcast %772 : vector<1x128xi1> to vector<32x128xi1>
    %774 = vector.shape_cast %771 : vector<32x1xf32> to vector<32x1xf32>
    %775 = vector.broadcast %774 : vector<32x1xf32> to vector<32x128xf32>
    %776 = arith.select %773, %775, %763 : vector<32x128xi1>, vector<32x128xf32>
    %c23_i32_176 = arith.constant 23 : i32
    %777 = vector.broadcast %c23_i32_176 : i32 to vector<1x128xi32>
    %778 = arith.cmpi eq, %34, %777 : vector<1x128xi32>
    %cst_177 = arith.constant -3.40282347E+38 : f32
    %779 = vector.shape_cast %778 : vector<1x128xi1> to vector<1x128xi1>
    %780 = vector.broadcast %779 : vector<1x128xi1> to vector<32x128xi1>
    %781 = vector.broadcast %cst_177 : f32 to vector<32x128xf32>
    %782 = arith.select %780, %476, %781 : vector<32x128xi1>, vector<32x128xf32>
    %cst_178 = arith.constant dense<0xFF800000> : vector<32xf32>
    %783 = vector.multi_reduction <maximumf>, %782, %cst_178 [1] : vector<32x128xf32> to vector<32xf32>
    %784 = vector.shape_cast %783 : vector<32xf32> to vector<32x1xf32>
    %785 = vector.shape_cast %778 : vector<1x128xi1> to vector<1x128xi1>
    %786 = vector.broadcast %785 : vector<1x128xi1> to vector<32x128xi1>
    %787 = vector.shape_cast %784 : vector<32x1xf32> to vector<32x1xf32>
    %788 = vector.broadcast %787 : vector<32x1xf32> to vector<32x128xf32>
    %789 = arith.select %786, %788, %776 : vector<32x128xi1>, vector<32x128xf32>
    %c24_i32_179 = arith.constant 24 : i32
    %790 = vector.broadcast %c24_i32_179 : i32 to vector<1x128xi32>
    %791 = arith.cmpi eq, %34, %790 : vector<1x128xi32>
    %cst_180 = arith.constant -3.40282347E+38 : f32
    %792 = vector.shape_cast %791 : vector<1x128xi1> to vector<1x128xi1>
    %793 = vector.broadcast %792 : vector<1x128xi1> to vector<32x128xi1>
    %794 = vector.broadcast %cst_180 : f32 to vector<32x128xf32>
    %795 = arith.select %793, %476, %794 : vector<32x128xi1>, vector<32x128xf32>
    %cst_181 = arith.constant dense<0xFF800000> : vector<32xf32>
    %796 = vector.multi_reduction <maximumf>, %795, %cst_181 [1] : vector<32x128xf32> to vector<32xf32>
    %797 = vector.shape_cast %796 : vector<32xf32> to vector<32x1xf32>
    %798 = vector.shape_cast %791 : vector<1x128xi1> to vector<1x128xi1>
    %799 = vector.broadcast %798 : vector<1x128xi1> to vector<32x128xi1>
    %800 = vector.shape_cast %797 : vector<32x1xf32> to vector<32x1xf32>
    %801 = vector.broadcast %800 : vector<32x1xf32> to vector<32x128xf32>
    %802 = arith.select %799, %801, %789 : vector<32x128xi1>, vector<32x128xf32>
    %c25_i32_182 = arith.constant 25 : i32
    %803 = vector.broadcast %c25_i32_182 : i32 to vector<1x128xi32>
    %804 = arith.cmpi eq, %34, %803 : vector<1x128xi32>
    %cst_183 = arith.constant -3.40282347E+38 : f32
    %805 = vector.shape_cast %804 : vector<1x128xi1> to vector<1x128xi1>
    %806 = vector.broadcast %805 : vector<1x128xi1> to vector<32x128xi1>
    %807 = vector.broadcast %cst_183 : f32 to vector<32x128xf32>
    %808 = arith.select %806, %476, %807 : vector<32x128xi1>, vector<32x128xf32>
    %cst_184 = arith.constant dense<0xFF800000> : vector<32xf32>
    %809 = vector.multi_reduction <maximumf>, %808, %cst_184 [1] : vector<32x128xf32> to vector<32xf32>
    %810 = vector.shape_cast %809 : vector<32xf32> to vector<32x1xf32>
    %811 = vector.shape_cast %804 : vector<1x128xi1> to vector<1x128xi1>
    %812 = vector.broadcast %811 : vector<1x128xi1> to vector<32x128xi1>
    %813 = vector.shape_cast %810 : vector<32x1xf32> to vector<32x1xf32>
    %814 = vector.broadcast %813 : vector<32x1xf32> to vector<32x128xf32>
    %815 = arith.select %812, %814, %802 : vector<32x128xi1>, vector<32x128xf32>
    %c26_i32_185 = arith.constant 26 : i32
    %816 = vector.broadcast %c26_i32_185 : i32 to vector<1x128xi32>
    %817 = arith.cmpi eq, %34, %816 : vector<1x128xi32>
    %cst_186 = arith.constant -3.40282347E+38 : f32
    %818 = vector.shape_cast %817 : vector<1x128xi1> to vector<1x128xi1>
    %819 = vector.broadcast %818 : vector<1x128xi1> to vector<32x128xi1>
    %820 = vector.broadcast %cst_186 : f32 to vector<32x128xf32>
    %821 = arith.select %819, %476, %820 : vector<32x128xi1>, vector<32x128xf32>
    %cst_187 = arith.constant dense<0xFF800000> : vector<32xf32>
    %822 = vector.multi_reduction <maximumf>, %821, %cst_187 [1] : vector<32x128xf32> to vector<32xf32>
    %823 = vector.shape_cast %822 : vector<32xf32> to vector<32x1xf32>
    %824 = vector.shape_cast %817 : vector<1x128xi1> to vector<1x128xi1>
    %825 = vector.broadcast %824 : vector<1x128xi1> to vector<32x128xi1>
    %826 = vector.shape_cast %823 : vector<32x1xf32> to vector<32x1xf32>
    %827 = vector.broadcast %826 : vector<32x1xf32> to vector<32x128xf32>
    %828 = arith.select %825, %827, %815 : vector<32x128xi1>, vector<32x128xf32>
    %c27_i32_188 = arith.constant 27 : i32
    %829 = vector.broadcast %c27_i32_188 : i32 to vector<1x128xi32>
    %830 = arith.cmpi eq, %34, %829 : vector<1x128xi32>
    %cst_189 = arith.constant -3.40282347E+38 : f32
    %831 = vector.shape_cast %830 : vector<1x128xi1> to vector<1x128xi1>
    %832 = vector.broadcast %831 : vector<1x128xi1> to vector<32x128xi1>
    %833 = vector.broadcast %cst_189 : f32 to vector<32x128xf32>
    %834 = arith.select %832, %476, %833 : vector<32x128xi1>, vector<32x128xf32>
    %cst_190 = arith.constant dense<0xFF800000> : vector<32xf32>
    %835 = vector.multi_reduction <maximumf>, %834, %cst_190 [1] : vector<32x128xf32> to vector<32xf32>
    %836 = vector.shape_cast %835 : vector<32xf32> to vector<32x1xf32>
    %837 = vector.shape_cast %830 : vector<1x128xi1> to vector<1x128xi1>
    %838 = vector.broadcast %837 : vector<1x128xi1> to vector<32x128xi1>
    %839 = vector.shape_cast %836 : vector<32x1xf32> to vector<32x1xf32>
    %840 = vector.broadcast %839 : vector<32x1xf32> to vector<32x128xf32>
    %841 = arith.select %838, %840, %828 : vector<32x128xi1>, vector<32x128xf32>
    %c28_i32_191 = arith.constant 28 : i32
    %842 = vector.broadcast %c28_i32_191 : i32 to vector<1x128xi32>
    %843 = arith.cmpi eq, %34, %842 : vector<1x128xi32>
    %cst_192 = arith.constant -3.40282347E+38 : f32
    %844 = vector.shape_cast %843 : vector<1x128xi1> to vector<1x128xi1>
    %845 = vector.broadcast %844 : vector<1x128xi1> to vector<32x128xi1>
    %846 = vector.broadcast %cst_192 : f32 to vector<32x128xf32>
    %847 = arith.select %845, %476, %846 : vector<32x128xi1>, vector<32x128xf32>
    %cst_193 = arith.constant dense<0xFF800000> : vector<32xf32>
    %848 = vector.multi_reduction <maximumf>, %847, %cst_193 [1] : vector<32x128xf32> to vector<32xf32>
    %849 = vector.shape_cast %848 : vector<32xf32> to vector<32x1xf32>
    %850 = vector.shape_cast %843 : vector<1x128xi1> to vector<1x128xi1>
    %851 = vector.broadcast %850 : vector<1x128xi1> to vector<32x128xi1>
    %852 = vector.shape_cast %849 : vector<32x1xf32> to vector<32x1xf32>
    %853 = vector.broadcast %852 : vector<32x1xf32> to vector<32x128xf32>
    %854 = arith.select %851, %853, %841 : vector<32x128xi1>, vector<32x128xf32>
    %c29_i32_194 = arith.constant 29 : i32
    %855 = vector.broadcast %c29_i32_194 : i32 to vector<1x128xi32>
    %856 = arith.cmpi eq, %34, %855 : vector<1x128xi32>
    %cst_195 = arith.constant -3.40282347E+38 : f32
    %857 = vector.shape_cast %856 : vector<1x128xi1> to vector<1x128xi1>
    %858 = vector.broadcast %857 : vector<1x128xi1> to vector<32x128xi1>
    %859 = vector.broadcast %cst_195 : f32 to vector<32x128xf32>
    %860 = arith.select %858, %476, %859 : vector<32x128xi1>, vector<32x128xf32>
    %cst_196 = arith.constant dense<0xFF800000> : vector<32xf32>
    %861 = vector.multi_reduction <maximumf>, %860, %cst_196 [1] : vector<32x128xf32> to vector<32xf32>
    %862 = vector.shape_cast %861 : vector<32xf32> to vector<32x1xf32>
    %863 = vector.shape_cast %856 : vector<1x128xi1> to vector<1x128xi1>
    %864 = vector.broadcast %863 : vector<1x128xi1> to vector<32x128xi1>
    %865 = vector.shape_cast %862 : vector<32x1xf32> to vector<32x1xf32>
    %866 = vector.broadcast %865 : vector<32x1xf32> to vector<32x128xf32>
    %867 = arith.select %864, %866, %854 : vector<32x128xi1>, vector<32x128xf32>
    %c30_i32_197 = arith.constant 30 : i32
    %868 = vector.broadcast %c30_i32_197 : i32 to vector<1x128xi32>
    %869 = arith.cmpi eq, %34, %868 : vector<1x128xi32>
    %cst_198 = arith.constant -3.40282347E+38 : f32
    %870 = vector.shape_cast %869 : vector<1x128xi1> to vector<1x128xi1>
    %871 = vector.broadcast %870 : vector<1x128xi1> to vector<32x128xi1>
    %872 = vector.broadcast %cst_198 : f32 to vector<32x128xf32>
    %873 = arith.select %871, %476, %872 : vector<32x128xi1>, vector<32x128xf32>
    %cst_199 = arith.constant dense<0xFF800000> : vector<32xf32>
    %874 = vector.multi_reduction <maximumf>, %873, %cst_199 [1] : vector<32x128xf32> to vector<32xf32>
    %875 = vector.shape_cast %874 : vector<32xf32> to vector<32x1xf32>
    %876 = vector.shape_cast %869 : vector<1x128xi1> to vector<1x128xi1>
    %877 = vector.broadcast %876 : vector<1x128xi1> to vector<32x128xi1>
    %878 = vector.shape_cast %875 : vector<32x1xf32> to vector<32x1xf32>
    %879 = vector.broadcast %878 : vector<32x1xf32> to vector<32x128xf32>
    %880 = arith.select %877, %879, %867 : vector<32x128xi1>, vector<32x128xf32>
    %c31_i32_200 = arith.constant 31 : i32
    %881 = vector.broadcast %c31_i32_200 : i32 to vector<1x128xi32>
    %882 = arith.cmpi eq, %34, %881 : vector<1x128xi32>
    %cst_201 = arith.constant -3.40282347E+38 : f32
    %883 = vector.shape_cast %882 : vector<1x128xi1> to vector<1x128xi1>
    %884 = vector.broadcast %883 : vector<1x128xi1> to vector<32x128xi1>
    %885 = vector.broadcast %cst_201 : f32 to vector<32x128xf32>
    %886 = arith.select %884, %476, %885 : vector<32x128xi1>, vector<32x128xf32>
    %cst_202 = arith.constant dense<0xFF800000> : vector<32xf32>
    %887 = vector.multi_reduction <maximumf>, %886, %cst_202 [1] : vector<32x128xf32> to vector<32xf32>
    %888 = vector.shape_cast %887 : vector<32xf32> to vector<32x1xf32>
    %889 = vector.shape_cast %882 : vector<1x128xi1> to vector<1x128xi1>
    %890 = vector.broadcast %889 : vector<1x128xi1> to vector<32x128xi1>
    %891 = vector.shape_cast %888 : vector<32x1xf32> to vector<32x1xf32>
    %892 = vector.broadcast %891 : vector<32x1xf32> to vector<32x128xf32>
    %893 = arith.select %890, %892, %880 : vector<32x128xi1>, vector<32x128xf32>
    %c192 = arith.constant 192 : index
    %c0_203 = arith.constant 0 : index
    %894 = vector.load %arg4[%c192, %c0_203] : memref<304x32xf32, #tpu.memory_space<vmem>>, vector<32x32xf32>
    %cst_204 = arith.constant 0.000000e+00 : f32
    %895 = vector.broadcast %cst_204 : f32 to vector<32x128xf32>
    %896 = arith.maximumf %476, %895 : vector<32x128xf32>
    %cst_205 = arith.constant dense<0.000000e+00> : vector<32x128xf32>
    %897 = tpu.matmul %894, %896, %cst_205 {dimension_numbers = #tpu.dot_dimension_numbers<[1], [0], [0], [1], [0, 0, 1, 1], [], []>} : vector<32x32xf32>, vector<32x128xf32>, vector<32x128xf32> -> vector<32x128xf32>
    %c224 = arith.constant 224 : index
    %c0_206 = arith.constant 0 : index
    %898 = vector.load %arg4[%c224, %c0_206] : memref<304x32xf32, #tpu.memory_space<vmem>>, vector<32x32xf32>
    %cst_207 = arith.constant 0.000000e+00 : f32
    %899 = vector.broadcast %cst_207 : f32 to vector<32x128xf32>
    %900 = arith.maximumf %893, %899 : vector<32x128xf32>
    %cst_208 = arith.constant dense<0.000000e+00> : vector<32x128xf32>
    %901 = tpu.matmul %898, %900, %cst_208 {dimension_numbers = #tpu.dot_dimension_numbers<[1], [0], [0], [1], [0, 0, 1, 1], [], []>} : vector<32x32xf32>, vector<32x128xf32>, vector<32x128xf32> -> vector<32x128xf32>
    %902 = arith.addf %897, %901 : vector<32x128xf32>
    %c0_209 = arith.constant 0 : index
    %c5 = arith.constant 5 : index
    %903 = vector.load %arg5[%c0_209, %c5] : memref<64x8xf32, #tpu.memory_space<vmem>>, vector<32x1xf32>
    %904 = vector.broadcast %903 : vector<32x1xf32> to vector<32x128xf32>
    %905 = arith.addf %902, %904 : vector<32x128xf32>
    %c272 = arith.constant 272 : index
    %c0_210 = arith.constant 0 : index
    %906 = vector.load %arg4[%c272, %c0_210] : memref<304x32xf32, #tpu.memory_space<vmem>>, vector<16x32xf32>
    %cst_211 = arith.constant dense<0.000000e+00> : vector<16x128xf32>
    %907 = tpu.matmul %906, %476, %cst_211 {dimension_numbers = #tpu.dot_dimension_numbers<[1], [0], [0], [1], [0, 0, 1, 1], [], []>} : vector<16x32xf32>, vector<32x128xf32>, vector<16x128xf32> -> vector<16x128xf32>
    %c288 = arith.constant 288 : index
    %c0_212 = arith.constant 0 : index
    %908 = vector.load %arg4[%c288, %c0_212] : memref<304x32xf32, #tpu.memory_space<vmem>>, vector<16x32xf32>
    %cst_213 = arith.constant dense<0.000000e+00> : vector<16x128xf32>
    %909 = tpu.matmul %908, %893, %cst_213 {dimension_numbers = #tpu.dot_dimension_numbers<[1], [0], [0], [1], [0, 0, 1, 1], [], []>} : vector<16x32xf32>, vector<32x128xf32>, vector<16x128xf32> -> vector<16x128xf32>
    %910 = arith.addf %907, %909 : vector<16x128xf32>
    %c256 = arith.constant 256 : index
    %c0_214 = arith.constant 0 : index
    %911 = vector.load %arg4[%c256, %c0_214] : memref<304x32xf32, #tpu.memory_space<vmem>>, vector<16x32xf32>
    %cst_215 = arith.constant 0.000000e+00 : f32
    %912 = vector.broadcast %cst_215 : f32 to vector<32x128xf32>
    %913 = arith.maximumf %905, %912 : vector<32x128xf32>
    %cst_216 = arith.constant dense<0.000000e+00> : vector<16x128xf32>
    %914 = tpu.matmul %911, %913, %cst_216 {dimension_numbers = #tpu.dot_dimension_numbers<[1], [0], [0], [1], [0, 0, 1, 1], [], []>} : vector<16x32xf32>, vector<32x128xf32>, vector<16x128xf32> -> vector<16x128xf32>
    %915 = arith.addf %910, %914 : vector<16x128xf32>
    %c0_217 = arith.constant 0 : index
    %c6 = arith.constant 6 : index
    %916 = vector.load %arg5[%c0_217, %c6] : memref<64x8xf32, #tpu.memory_space<vmem>>, vector<16x1xf32>
    %917 = vector.broadcast %916 : vector<16x1xf32> to vector<16x128xf32>
    %918 = arith.addf %915, %917 : vector<16x128xf32>
    %919 = tpu.iota {dimensions = array<i32: 0>} : vector<32x128xi32>
    %920 = vector.broadcast %34 : vector<1x128xi32> to vector<32x128xi32>
    %921 = arith.cmpi eq, %919, %920 : vector<32x128xi32>
    %922 = arith.extui %921 : vector<32x128xi1> to vector<32x128xi32>
    %923 = arith.sitofp %922 : vector<32x128xi32> to vector<32x128xf32>
    %cst_218 = arith.constant dense<0.000000e+00> : vector<16x32xf32>
    %924 = tpu.matmul %918, %923, %cst_218 {dimension_numbers = #tpu.dot_dimension_numbers<[1], [1], [0], [0], [0, 0, 1, 0], [], []>} : vector<16x128xf32>, vector<32x128xf32>, vector<16x32xf32> -> vector<16x32xf32>
    %c1_219 = arith.constant 1 : index
    %c0_220 = arith.constant 0 : index
    %925 = vector.load %arg1[%c1_219, %c0_220] : memref<2x128xi32, #tpu.memory_space<vmem>>, vector<1x32xi32>
    %926 = arith.sitofp %925 : vector<1x32xi32> to vector<1x32xf32>
    %cst_221 = arith.constant 1.000000e+00 : f32
    %927 = vector.broadcast %cst_221 : f32 to vector<1x32xf32>
    %928 = arith.maximumf %926, %927 : vector<1x32xf32>
    %929 = vector.broadcast %928 : vector<1x32xf32> to vector<16x32xf32>
    %930 = arith.divf %924, %929 : vector<16x32xf32>
    %931 = vector.extract_strided_slice %930 {offsets = [0, 0], sizes = [16, 16], strides = [1, 1]} : vector<16x32xf32> to vector<16x16xf32>
    %c0_222 = arith.constant 0 : index
    %c0_223 = arith.constant 0 : index
    %c0_224 = arith.constant 0 : index
    %932 = vector.load %arg6[%c0_222, %c0_223, %c0_224] : memref<2x16x16xf32, #tpu.memory_space<vmem>>, vector<1x16x16xf32>
    %933 = vector.shape_cast %932 : vector<1x16x16xf32> to vector<16x16xf32>
    %934 = vector.shape_cast %931 : vector<16x16xf32> to vector<1x16x16xf32>
    tpu.vector_store %arg6[%c0_222, %c0_223, %c0_224], %934 {strides = array<i32>} : memref<2x16x16xf32, #tpu.memory_space<vmem>>, vector<1x16x16xf32>,
    %935 = vector.extract_strided_slice %930 {offsets = [0, 16], sizes = [16, 16], strides = [1, 1]} : vector<16x32xf32> to vector<16x16xf32>
    %c1_225 = arith.constant 1 : index
    %c0_226 = arith.constant 0 : index
    %c0_227 = arith.constant 0 : index
    %936 = vector.load %arg6[%c1_225, %c0_226, %c0_227] : memref<2x16x16xf32, #tpu.memory_space<vmem>>, vector<1x16x16xf32>
    %937 = vector.shape_cast %936 : vector<1x16x16xf32> to vector<16x16xf32>
    %938 = vector.shape_cast %935 : vector<16x16xf32> to vector<1x16x16xf32>
    tpu.vector_store %arg6[%c1_225, %c0_226, %c0_227], %938 {strides = array<i32>} : memref<2x16x16xf32, #tpu.memory_space<vmem>>, vector<1x16x16xf32>,
    return
  }
}

</mosaic_0001>

<bundles_post_ra>
// kernel: patch_local_pool_pointnet_forward.1
= control target key start
LH: loop header
LB: loop body
LE: loop exit
PB: predicated region body
PF: predicated region fallthrough
CT: control target
= control target key end

     0   :  { %vm37_vm0 = vcmask 64512   ;;  %v4734_v48 = vmov 683565275   ;;  %v4735_v53 = vmov 2475754826   ;;  %s7697_s0 = inlined_call_operand.vmem [shape: f32[8,128], index: 0, kind: input, shape index: {}]   ;;  %s7698_s2 = inlined_call_operand.vmem [shape: f32[64,8], index: 2, kind: input, shape index: {}]   ;;  %s7699_s3 = inlined_call_operand.vmem [shape: f32[128,64], index: 3, kind: input, shape index: {}]   ;;  %s7700_s5 = inlined_call_operand.vmem [shape: f32[64,8], index: 5, kind: input, shape index: {}]   ;;  %s7701_s4 = inlined_call_operand.vmem [shape: f32[304,32], index: 4, kind: input, shape index: {}]   ;;  %s7702_s1 = inlined_call_operand.vmem [shape: s32[2,128], index: 1, kind: input, shape index: {}]   ;;  %s7703_s6 = inlined_call_operand.vmem [shape: f32[2,16,16], index: 6, kind: output, shape index: {}]  }
   0x1   :  { %v23_v0 = vld [vmem:[%s7697_s0] sm:$0xff]  ;;  %v30_v7 = vld [vmem:[%s7698_s2 + $0x8] sm:$0xff]  ;;  %v31_v8 = vld [vmem:[%s7698_s2 + $0x10] sm:$0xff]  ;;  %v4736_v55 = vmov 2131351028  }
   0x2   :  { %v29_v1 = vld [vmem:[%s7698_s2] sm:$0xff]  ;;  %v24_v2 = vmul.f32 10.0, %v23_v0  ;;  %v32_v9 = vld [vmem:[%s7698_s2 + $0x18] sm:$0xff]  ;;  %v34_v11 = vld [vmem:[%s7698_s2 + $0x28] sm:$0xff]  ;;  %v4737_v57 = vmov 2102212464  }
   0x3   :  { %4222 = vmatprep.mubr.msk.f32.mxu0 %vm37_vm0, %v29_v1  ;;  %v33_v10 = vld [vmem:[%s7698_s2 + $0x20] sm:$0xff]  ;;  %v35_v12 = vld [vmem:[%s7698_s2 + $0x30] sm:$0xff]  ;;  %v36_v13 = vld [vmem:[%s7698_s2 + $0x38] sm:$0xff]  ;;  %v4738_v59 = vmov 920167782  }
   0x4   :  { %v25_v3 = vfloor.f32 %v24_v2 }
   0x6   :  { %v26_v4 = vsub.f32 %v24_v2, %v25_v3  ;;  %v4739_v2 = vmov 1326507024  }
   0x8   :  { %v27_v5 = vmul.f32 2.0, %v26_v4 }
   0xa   :  { %v3978_v6 = vadd.f32 -1.0, %v27_v5 }
   0xc   :  { %4220 = vmatprep.subr.mxu0 %v3978_v6 }
   0xd   :  { %4221 = vmatpush3.msra.mxu0 %v3978_v6 }
   0xe   :  { %4223 = vmatmul.mubr.msk.f32.vlgmr.msra.gmra.mrb[0].mxu0 %vm37_vm0, %v30_v7 }
   0xf   :  { %4225 = vmatprep.mubr.msk.f32.mxu0 %vm37_vm0, %v31_v8 }
  0x12   :  { %4226 = vmatmul.mubr.msk.f32.gmra.mrb[2].mxu0 %vm37_vm0, %v32_v9 }
  0x13   :  { %4228 = vmatprep.mubr.msk.f32.mxu0 %vm37_vm0, %v33_v10 }
  0x16   :  { %4229 = vmatmul.mubr.msk.f32.gmra.mrb[4].mxu0 %vm37_vm0, %v34_v11 }
  0x17   :  { %4231 = vmatprep.mubr.msk.f32.mxu0 %vm37_vm0, %v35_v12 }
  0x1a   :  { %4232 = vmatmul.mubr.msk.f32.gmra.mrb[6].mxu0 %vm37_vm0, %v36_v13 }
  0xe1   :  { %v4819_v14 = vpop.f32.mrb[0].mxu0 }
  0xe2   :  { %v271_v15 = vand.u32 2147483647, %v4819_v14  ;;  %v274_v16 = vand.u32 2139095040, %v4819_v14  ;;  %v4823_v17 = vpop.f32.mrb[1].mxu0 }
  0xe3   :  { %v167_v18 = vand.u32 2147483647, %v4823_v17  ;;  %v170_v19 = vand.u32 2139095040, %v4823_v17 }
  0xe4   :  { %v275_v20 = vshrl.u32 %v274_v16, 23  ;;  %v278_v21 = vand.u32 8388607, %v271_v15 }
  0xe5   :  { %v171_v22 = vshrl.u32 %v170_v19, 23  ;;  %v174_v23 = vand.u32 8388607, %v167_v18  ;;  %v4831_v24 = vpop.f32.mrb[2].mxu0 }
  0xe6   :  { %v3991_v25 = vadd.s32 4294967169, %v275_v20  ;;  %v4833_v26 = vpop.f32.mrb[3].mxu0  ;;  %v482_v28 = vand.u32 2139095040, %v4831_v24  ;;  %v279_v29 = vor.u32 8388608, %v278_v21  ;;  %v479_v33 = vand.u32 2147483647, %v4831_v24 }
  0xe7   :  { %v3987_v27 = vadd.s32 4294967169, %v171_v22  ;;  %v175_v31 = vor.u32 8388608, %v174_v23 }
  0xe8   :  { %v281_v30 = vadd.s32 1, %v3991_v25  ;;  %v483_v34 = vshrl.u32 %v482_v28, 23  ;;  %v4841_v42 = vshll.u32 %v279_v29, 8  ;;  %v4849_v45 = vand.u32 8388607, %v479_v33 }
  0xe9   :  { %v177_v32 = vadd.s32 1, %v3987_v27  ;;  %v4837_v35 = vpop.f32.mrb[4].mxu0  ;;  %v4845_v44 = vshll.u32 %v175_v31, 8 }
  0xea   :  { %vm282_vm1 = vcmp.gt.s32.totalorder %v281_v30, 0  ;;  %v4839_v36 = vpop.f32.mrb[5].mxu0  ;;  %v3999_v38 = vadd.s32 4294967169, %v483_v34 }
  0xeb   :  { %v283_v37 = vsel %vm282_vm1, %v281_v30, 0  ;;  %vm178_vm2 = vcmp.gt.s32.totalorder %v177_v32, 0 }
  0xec   :  { %v284_v39 = vshrl.u32 %v283_v37, 5  ;;  %v285_v40 = vand.u32 31, %v283_v37  ;;  %v179_v41 = vsel %vm178_vm2, %v177_v32, 0  ;;  %v4854_v51 = vadd.s32 1, %v3999_v38 }
  0xed   :  { %v4843_v43 = vshrl.u32 %v179_v41, 5  ;;  %v4851_v46 = vpop.f32.mrb[6].mxu0  ;;  %v181_v50 = vand.u32 31, %v179_v41 }
  0xee   :  { %v286_v47 = vsub.s32 32, %v285_v40  ;;  %v288_v49 = vshll.u32 %v4734_v48, %v285_v40  ;;  %v4856_v52 = vpop.f32.mrb[7].mxu0  ;;  %v291_v54 = vshll.u32 %v4735_v53, %v285_v40  ;;  %v294_v56 = vshll.u32 %v4736_v55, %v285_v40 }
  0xef   :  { %v297_v58 = vshll.u32 %v4737_v57, %v285_v40  ;;  %v300_v60 = vshll.u32 %v4738_v59, %v285_v40  ;;  %vm303_vm3 = vcmp.lt.s32.totalorder %v284_v39, 1  ;;  %vm304_vm4 = vcmp.lt.s32.totalorder %v284_v39, 2 }
  0xf0   :  { %v289_v61 = vshrl.u32 %v4735_v53, %v286_v47  ;;  %v292_v62 = vshrl.u32 %v4736_v55, %v286_v47  ;;  %v295_v63 = vshrl.u32 %v4737_v57, %v286_v47  ;;  %v287_v0 = vshrl.u32 %v4734_v48, %v286_v47 }
  0xf1   :  { %v298_v1 = vshrl.u32 %v4738_v59, %v286_v47  ;;  %v301_v3 = vshrl.u32 %v4739_v2, %v286_v47  ;;  %v182_v7 = vsub.s32 32, %v181_v50  ;;  %vm305_vm5 = vcmp.lt.s32.totalorder %v284_v39, 3 }
  0xf2   :  { %v290_v4 = vor.u32 %v289_v61, %v288_v49  ;;  %v293_v5 = vor.u32 %v292_v62, %v291_v54  ;;  %v296_v6 = vor.u32 %v295_v63, %v294_v56  ;;  %vm306_vm6 = vcmp.lt.s32.totalorder %v284_v39, 4 }
  0xf3   :  { %v299_v8 = vor.u32 %v298_v1, %v297_v58  ;;  %v302_v9 = vor.u32 %v301_v3, %v300_v60  ;;  %v184_v21 = vshll.u32 %v4734_v48, %v181_v50  ;;  %v185_v25 = vshrl.u32 %v4735_v53, %v182_v7 }
  0xf4   :  { %v307_v10 = vsel %vm303_vm3, %v287_v0, %v290_v4  ;;  %v308_v11 = vsel %vm306_vm6, %v296_v6, 2102212464  ;;  %v311_v12 = vsel %vm303_vm3, %v290_v4, %v293_v5  ;;  %v315_v13 = vsel %vm303_vm3, %v293_v5, %v296_v6 }
  0xf5   :  { %v309_v16 = vsel %vm305_vm5, %v293_v5, %v308_v11  ;;  %v312_v19 = vsel %vm306_vm6, %v299_v8, 920167782  ;;  %v316_v20 = vsel %vm306_vm6, %v302_v9, 1326507024  ;;  %v187_v27 = vshll.u32 %v4735_v53, %v181_v50 }
  0xf6   :  { %v313_v22 = vsel %vm305_vm5, %v296_v6, %v312_v19  ;;  %v317_v23 = vsel %vm305_vm5, %v299_v8, %v316_v20  ;;  %v310_v28 = vsel %vm304_vm4, %v307_v10, %v309_v16  ;;  %v188_v31 = vshrl.u32 %v4736_v55, %v182_v7 }
  0xf7   :  { %v314_v29 = vsel %vm304_vm4, %v311_v12, %v313_v22  ;;  %v318_v30 = vsel %vm304_vm4, %v315_v13, %v317_v23  ;;  %v186_v40 = vor.u32 %v185_v25, %v184_v21  ;;  %v190_v47 = vshll.u32 %v4736_v55, %v181_v50 }
  0xf8   :  { %v4879_v32 = vmul.u32.u64.low %v4841_v42, %v318_v30  ;;  %v4880_v34 = vmul.u32.u64.high %v4841_v42, %v318_v30, %v4879_v32  ;;  %v4883_v37 = vmul.u32.u64.low %v4841_v42, %v314_v29  ;;  %v4884_v38 = vmul.u32.u64.high %v4841_v42, %v314_v29, %v4883_v37 }
  0xf9   :  { %v189_v41 = vor.u32 %v188_v31, %v187_v27  ;;  %v191_v49 = vshrl.u32 %v4737_v57, %v182_v7  ;;  %v183_v39 = vshrl.u32 %v4734_v48, %v182_v7  ;;  %v193_v54 = vshll.u32 %v4737_v57, %v181_v50 }
  0xfa   :  { %v194_v56 = vshrl.u32 %v4738_v59, %v182_v7  ;;  %v197_v58 = vshrl.u32 %v4739_v2, %v182_v7  ;;  %v326_v60 = vmul.u32 %v4841_v42, %v310_v28  ;;  %v196_v62 = vshll.u32 %v4738_v59, %v181_v50 }
  0xfb   :  { %v192_v61 = vor.u32 %v191_v49, %v190_v47  ;;  %vm199_vm7 = vcmp.lt.s32.totalorder %v4843_v43, 1  ;;  %vm328_vm8 = vc.u32 %v4880_v34, %v4883_v37  ;;  %v329_v63 = vadd.s32 1, %v4884_v38 }
  0xfc   :  { %v195_v0 = vor.u32 %v194_v56, %v193_v54  ;;  %vm200_vm9 = vcmp.lt.s32.totalorder %v4843_v43, 2  ;;  %v198_v1 = vor.u32 %v197_v58, %v196_v62  ;;  %vm201_vm10 = vcmp.lt.s32.totalorder %v4843_v43, 3 }
  0xfd   :  { %vm202_vm11 = vcmp.lt.s32.totalorder %v4843_v43, 4  ;;  %v207_v3 = vsel %vm199_vm7, %v186_v40, %v189_v41  ;;  %v330_v42 = vsel %vm328_vm8, %v329_v63, %v4884_v38  ;;  %v211_v5 = vsel %vm199_vm7, %v189_v41, %v192_v61 }
  0xfe   :  { %v204_v4 = vsel %vm202_vm11, %v192_v61, 2102212464  ;;  %v208_v50 = vsel %vm202_vm11, %v195_v0, 920167782  ;;  %v331_v6 = vadd.s32 %v330_v42, %v326_v60  ;;  %v203_v7 = vsel %vm199_vm7, %v183_v39, %v186_v40 }
  0xff   :  { %v209_v8 = vsel %vm201_vm10, %v192_v61, %v208_v50  ;;  %v212_v9 = vsel %vm202_vm11, %v198_v1, 1326507024  ;;  %v205_v10 = vsel %vm201_vm10, %v189_v41, %v204_v4  ;;  %vm490_vm12 = vcmp.gt.s32.totalorder %v4854_v51, 0 }
 0x100   :  { %v210_v11 = vsel %vm200_vm9, %v207_v3, %v209_v8  ;;  %v213_v12 = vsel %vm201_vm10, %v195_v0, %v212_v9  ;;  %v332_v13 = vadd.s32 536870912, %v331_v6  ;;  %v491_v23 = vsel %vm490_vm12, %v4854_v51, 0 }
 0x101   :  { %v214_v16 = vsel %vm200_vm9, %v211_v5, %v213_v12  ;;  %v4909_v19 = vmul.u32.u64.low %v4845_v44, %v210_v11  ;;  %v4910_v20 = vmul.u32.u64.high %v4845_v44, %v210_v11, %v4909_v19  ;;  %v378_v25 = vand.u32 2139095040, %v4833_v26 }
 0x102   :  { %v4914_v21 = vmul.u32.u64.low %v4845_v44, %v214_v16  ;;  %v4915_v22 = vmul.u32.u64.high %v4845_v44, %v214_v16, %v4914_v21  ;;  %v4919_v27 = vshrl.u32 %v332_v13, 30  ;;  %v206_v28 = vsel %vm200_vm9, %v203_v7, %v205_v10 }
 0x103   :  { %v493_v29 = vand.u32 31, %v491_v23  ;;  %v225_v31 = vadd.s32 1, %v4910_v20  ;;  %v222_v38 = vmul.u32 %v4845_v44, %v206_v28  ;;  %v487_v51 = vor.u32 8388608, %v4849_v45 }
 0x104   :  { %v334_v30 = vshll.u32 %v4919_v27, 30  ;;  %vm224_vm13 = vc.u32 %v4915_v22, %v4909_v19  ;;  %v379_v40 = vshrl.u32 %v378_v25, 23  ;;  %v4932_v43 = vshrl.u32 %v491_v23, 5 }
 0x105   :  { %v494_v32 = vsub.s32 32, %v493_v29  ;;  %v226_v47 = vsel %vm224_vm13, %v225_v31, %v4910_v20  ;;  %v496_v49 = vshll.u32 %v4734_v48, %v493_v29  ;;  %v499_v56 = vshll.u32 %v4735_v53, %v493_v29 }
 0x106   :  { %v4929_v41 = vsub.s32 %v331_v6, %v334_v30  ;;  %v227_v39 = vadd.s32 %v226_v47, %v222_v38  ;;  %v505_v60 = vshll.u32 %v4737_v57, %v493_v29  ;;  %v502_v1 = vshll.u32 %v4736_v55, %v493_v29 }
 0x107   :  { %v497_v54 = vshrl.u32 %v4735_v53, %v494_v32  ;;  %v500_v44 = vshrl.u32 %v4736_v55, %v494_v32  ;;  %v503_v45 = vshrl.u32 %v4737_v57, %v494_v32  ;;  %v506_v61 = vshrl.u32 %v4738_v59, %v494_v32 }
 0x108   :  { %v337_v58 = vsub.s32 0, %v4929_v41  ;;  %v228_v62 = vadd.s32 536870912, %v227_v39  ;;  %v508_v4 = vshll.u32 %v4738_v59, %v493_v29  ;;  %v509_v50 = vshrl.u32 %v4739_v2, %v494_v32 }
 0x109   :  { %v498_v63 = vor.u32 %v497_v54, %v496_v49  ;;  %v501_v0 = vor.u32 %v500_v44, %v499_v56  ;;  %v507_v42 = vor.u32 %v506_v61, %v505_v60  ;;  %v504_v6 = vor.u32 %v503_v45, %v502_v1 }
 0x10a   :  { %v3992_v3 = vmin.u32 %v337_v58, %v4929_v41  ;;  %v4946_v5 = vshrl.u32 %v228_v62, 30  ;;  %v527_v7 = vshll.u32 %v487_v51, 8  ;;  %v375_v8 = vand.u32 2147483647, %v4833_v26 }
 0x10b   :  { %v510_v10 = vor.u32 %v509_v50, %v508_v4  ;;  %vm511_vm14 = vcmp.lt.s32.totalorder %v4932_v43, 1  ;;  %v3995_v11 = vadd.s32 4294967169, %v379_v40  ;;  %v495_v13 = vshrl.u32 %v4734_v48, %v494_v32 }
 0x10c   :  { %v339_v9 = vclz %v3992_v3  ;;  %v230_v12 = vshll.u32 %v4946_v5, 30  ;;  %vm514_vm15 = vcmp.lt.s32.totalorder %v4932_v43, 4  ;;  %v519_v16 = vsel %vm511_vm14, %v498_v63, %v501_v0 }
 0x10d   :  { %vm512_vm0 = vcmp.lt.s32.totalorder %v4932_v43, 2  ;;  %vm513_vm1 = vcmp.lt.s32.totalorder %v4932_v43, 3  ;;  %v520_v21 = vsel %vm514_vm15, %v507_v42, 920167782  ;;  %v516_v25 = vsel %vm514_vm15, %v504_v6, 2102212464 }
 0x10e   :  { %v3993_v20 = vadd.s32 4294967294, %v339_v9  ;;  %v4955_v23 = vsub.s32 %v227_v39, %v230_v12  ;;  %v521_v28 = vsel %vm513_vm1, %v504_v6, %v520_v21  ;;  %v523_v29 = vsel %vm511_vm14, %v501_v0, %v504_v6 }
 0x10f   :  { %v515_v30 = vsel %vm511_vm14, %v495_v13, %v498_v63  ;;  %v522_v31 = vsel %vm512_vm0, %v519_v16, %v521_v28  ;;  %v524_v32 = vsel %vm514_vm15, %v510_v10, 1326507024  ;;  %v385_v47 = vadd.s32 1, %v3995_v11 }
 0x110   :  { %vm3994_vm2 = vcmp.lt.s32.totalorder %v3993_v20, 0  ;;  %v233_v51 = vsub.s32 0, %v4955_v23  ;;  %v525_v40 = vsel %vm513_vm1, %v507_v42, %v524_v32  ;;  %v517_v54 = vsel %vm513_vm1, %v501_v0, %v516_v25 }
 0x111   :  { %v342_v38 = vsel %vm3994_vm2, 0, %v3993_v20  ;;  %v526_v56 = vsel %vm512_vm0, %v523_v29, %v525_v40  ;;  %vm386_vm3 = vcmp.gt.s32.totalorder %v385_v47, 0  ;;  %v327_v60 = vadd.s32 %v4883_v37, %v4880_v34 }
 0x112   :  { %v343_v49 = vsub.s32 32, %v342_v38  ;;  %v347_v39 = vsub.s32 4294967266, %v342_v38  ;;  %v3988_v44 = vmin.u32 %v233_v51, %v4955_v23  ;;  %v382_v0 = vand.u32 8388607, %v375_v8 }
 0x113   :  { %v4969_v58 = vmul.u32.u64.low %v527_v7, %v526_v56  ;;  %v4970_v45 = vmul.u32.u64.high %v527_v7, %v526_v56, %v4969_v58  ;;  %v4974_v62 = vmul.u32.u64.low %v527_v7, %v522_v31  ;;  %v4975_v63 = vmul.u32.u64.high %v527_v7, %v522_v31, %v4974_v62 }
 0x114   :  { %v348_v61 = vadd.s32 127, %v347_v39  ;;  %v235_v1 = vclz %v3988_v44  ;;  %v387_v3 = vsel %vm386_vm3, %v385_v47, 0  ;;  %v345_v42 = vshrl.u32 %v327_v60, %v343_v49 }
 0x115   :  { %v518_v50 = vsel %vm512_vm0, %v515_v30, %v517_v54  ;;  %v389_v6 = vand.u32 31, %v387_v3  ;;  %vm536_vm4 = vc.u32 %v4970_v45, %v4974_v62  ;;  %v344_v34 = vshll.u32 %v4929_v41, %v342_v38 }
 0x116   :  { %v349_v4 = vshll.u32 %v348_v61, 23  ;;  %v3989_v9 = vadd.s32 4294967294, %v235_v1  ;;  %v537_v10 = vadd.s32 1, %v4975_v63  ;;  %v534_v11 = vmul.u32 %v527_v7, %v518_v50 }
 0x117   :  { %v383_v12 = vor.u32 8388608, %v382_v0  ;;  %v346_v13 = vor.u32 %v345_v42, %v344_v34  ;;  %v390_v21 = vsub.s32 32, %v389_v6  ;;  %v223_v29 = vadd.s32 %v4909_v19, %v4915_v22 }
 0x118   :  { %v350_v37 = vor.u32 4788187, %v349_v4  ;;  %vm3990_vm5 = vcmp.lt.s32.totalorder %v3989_v9, 0  ;;  %v538_v20 = vsel %vm536_vm4, %v537_v10, %v4975_v63  ;;  %v690_v30 = vand.u32 2139095040, %v4837_v35 }
 0x119   :  { %v238_v16 = vsel %vm3990_vm5, 0, %v3989_v9  ;;  %v539_v25 = vadd.s32 %v538_v20, %v534_v11  ;;  %v4990_v38 = vshll.u32 %v383_v12, 8  ;;  %v353_v7 = vcvt.s32.f32 %v346_v13 }
 0x11a   :  { %v243_v43 = vsub.s32 4294967266, %v238_v16  ;;  %v351_v28 = vand.u32 2147483647, %v350_v37  ;;  %v239_v41 = vsub.s32 32, %v238_v16  ;;  %v392_v51 = vshll.u32 %v4734_v48, %v389_v6 }
 0x11b   :  { %v540_v32 = vadd.s32 536870912, %v539_v25  ;;  %v393_v40 = vshrl.u32 %v4735_v53, %v390_v21  ;;  %v396_v47 = vshrl.u32 %v4736_v55, %v390_v21  ;;  %v395_v39 = vshll.u32 %v4735_v53, %v389_v6 }
 0x11c   :  { %v244_v31 = vadd.s32 127, %v243_v43  ;;  %v399_v54 = vshrl.u32 %v4737_v57, %v390_v21  ;;  %v402_v19 = vshrl.u32 %v4738_v59, %v390_v21  ;;  %v354_v22 = vmul.f32 %v353_v7, %v351_v28 }
 0x11d   :  { %v541_v49 = vshrl.u32 %v540_v32, 30  ;;  %v401_v44 = vshll.u32 %v4737_v57, %v389_v6  ;;  %v405_v58 = vshrl.u32 %v4739_v2, %v390_v21  ;;  %v241_v60 = vshrl.u32 %v223_v29, %v239_v41 }
 0x11e   :  { %v245_v56 = vshll.u32 %v244_v31, 23  ;;  %v388_v63 = vshrl.u32 %v387_v3, 5  ;;  %v398_v1 = vshll.u32 %v4736_v55, %v389_v6  ;;  %v394_v0 = vor.u32 %v393_v40, %v392_v51 }
 0x11f   :  { %v542_v61 = vshll.u32 %v541_v49, 30  ;;  %v397_v42 = vor.u32 %v396_v47, %v395_v39  ;;  %v403_v4 = vor.u32 %v402_v19, %v401_v44  ;;  %v404_v50 = vshll.u32 %v4738_v59, %v389_v6 }
 0x120   :  { %vm273_vm6 = vcmp.lt.s32.totalorder %v4819_v14, 0  ;;  %v240_v9 = vshll.u32 %v4955_v23, %v238_v16  ;;  %vm481_vm7 = vcmp.lt.s32.totalorder %v4831_v24, 0  ;;  %v400_v37 = vor.u32 %v399_v54, %v398_v1 }
 0x121   :  { %v5005_v34 = vsub.s32 %v539_v25, %v542_v61  ;;  %v691_v10 = vshrl.u32 %v690_v30, 23  ;;  %v355_v11 = vxor.u32 2147483648, %v354_v22  ;;  %v246_v12 = vor.u32 4788187, %v245_v56 }
 0x122   :  { %v391_v3 = vshrl.u32 %v4734_v48, %v390_v21  ;;  %v406_v13 = vor.u32 %v405_v58, %v404_v50  ;;  %v242_v20 = vor.u32 %v241_v60, %v240_v9  ;;  %vm407_vm8 = vcmp.lt.s32.totalorder %v388_v63, 1 }
 0x123   :  { %v545_v43 = vsub.s32 0, %v5005_v34  ;;  %vm410_vm9 = vcmp.lt.s32.totalorder %v388_v63, 4  ;;  %vm5011_vm10 = vcmp.le.f32.partialorder %v271_v15, 0.7853982  ;;  %vm5017_vm11 = vcmp.le.f32.partialorder %v479_v33, 0.7853982 }
 0x124   :  { %v565_v16 = vsub.s32 4, %v541_v49  ;;  %vm409_vm12 = vcmp.lt.s32.totalorder %v388_v63, 3  ;;  %v415_v21 = vsel %vm407_vm8, %v394_v0, %v397_v42  ;;  %v416_v25 = vsel %vm410_vm9, %v403_v4, 920167782 }
 0x125   :  { %v4000_v28 = vmin.u32 %v545_v43, %v5005_v34  ;;  %vm408_vm13 = vcmp.lt.s32.totalorder %v388_v63, 2  ;;  %v412_v29 = vsel %vm410_vm9, %v400_v37, 2102212464  ;;  %v417_v15 = vsel %vm409_vm12, %v400_v37, %v416_v25 }
 0x126   :  { %v247_v30 = vand.u32 2147483647, %v246_v12  ;;  %v418_v41 = vsel %vm408_vm13, %v415_v21, %v417_v15  ;;  %v419_v31 = vsel %vm407_vm8, %v397_v42, %v400_v37  ;;  %v420_v33 = vsel %vm410_vm9, %v406_v13, 1326507024 }
 0x127   :  { %v249_v32 = vcvt.s32.f32 %v242_v20  ;;  %v547_v7 = vclz %v4000_v28  ;;  %v411_v51 = vsel %vm407_vm8, %v391_v3, %v394_v0  ;;  %v421_v40 = vsel %vm409_vm12, %v403_v4, %v420_v33 }
 0x128   :  { %vm169_vm14 = vcmp.lt.s32.totalorder %v4823_v17, 0  ;;  %v413_v47 = vsel %vm409_vm12, %v397_v42, %v412_v29  ;;  %v422_v39 = vsel %vm408_vm13, %v419_v31, %v421_v40  ;;  %v687_v60 = vand.u32 2147483647, %v4837_v35 }
 0x129   :  { %v5032_v54 = vmul.u32.u64.low %v4990_v38, %v418_v41  ;;  %v5033_v19 = vmul.u32.u64.high %v4990_v38, %v418_v41, %v5032_v54  ;;  %v4001_v56 = vadd.s32 4294967294, %v547_v7  ;;  %v356_v61 = vsel %vm273_vm6, %v355_v11, %v354_v22 }
 0x12a   :  { %v5037_v44 = vmul.u32.u64.low %v4990_v38, %v422_v39  ;;  %v5038_v58 = vmul.u32.u64.high %v4990_v38, %v422_v39, %v5037_v44  ;;  %v250_v1 = vmul.f32 %v249_v32, %v247_v30  ;;  %v566_v0 = vsel %vm481_vm7, %v565_v16, %v541_v49 }
 0x12b   :  { %v4007_v42 = vadd.s32 4294967169, %v691_v10  ;;  %v357_v4 = vsub.s32 4, %v4919_v27  ;;  %v253_v50 = vsub.s32 4, %v4946_v5  ;;  %vm4002_vm15 = vcmp.lt.s32.totalorder %v4001_v56, 0 }
 0x12c   :  { %v414_v9 = vsel %vm408_vm13, %v411_v51, %v413_v47  ;;  %v535_v37 = vadd.s32 %v4974_v62, %v4970_v45  ;;  %v550_v12 = vsel %vm4002_vm15, 0, %v4001_v56  ;;  %v433_v3 = vadd.s32 1, %v5033_v19 }
 0x12d   :  { %v697_v13 = vadd.s32 1, %v4007_v42  ;;  %v359_v22 = vsel %vm5011_vm10, %v4819_v14, %v356_v61  ;;  %v551_v49 = vsub.s32 32, %v550_v12  ;;  %v555_v10 = vsub.s32 4294967266, %v550_v12 }
 0x12e   :  { %v568_v11 = vsel %vm5017_vm11, 0, %v566_v0  ;;  %v251_v20 = vxor.u32 2147483648, %v250_v1  ;;  %v430_v63 = vmul.u32 %v4990_v38, %v414_v9  ;;  %vm432_vm0 = vc.u32 %v5038_v58, %v5032_v54 }
 0x12f   :  { %vm698_vm1 = vcmp.gt.s32.totalorder %v697_v13, 0  ;;  %v553_v45 = vshrl.u32 %v535_v37, %v551_v49  ;;  %v556_v62 = vadd.s32 127, %v555_v10  ;;  %v434_v43 = vsel %vm432_vm0, %v433_v3, %v5033_v19 }
 0x130   :  { %v699_v16 = vsel %vm698_vm1, %v697_v13, 0  ;;  %v5063_v21 = vsel %vm273_vm6, %v357_v4, %v4919_v27  ;;  %vm5067_vm2 = vcmp.le.f32.partialorder %v167_v18, 0.7853982  ;;  %v435_v38 = vadd.s32 %v434_v43, %v430_v63 }
 0x131   :  { %v701_v28 = vand.u32 31, %v699_v16  ;;  %4690 = vcosq.f32 %v359_v22  ;;  %v5074_v29 = vsel %vm169_vm14, %v253_v50, %v4946_v5  ;;  %v552_v15 = vshll.u32 %v5005_v34, %v550_v12 }
 0x132   :  { %v557_v30 = vshll.u32 %v556_v62, 23  ;;  %4692 = vsinq.f32 %v359_v22  ;;  %v5077_v27 = vadd.s32 3, %v568_v11  ;;  %v436_v41 = vadd.s32 536870912, %v435_v38 }
 0x133   :  { %v702_v31 = vsub.s32 32, %v701_v28  ;;  %v252_v18 = vsel %vm169_vm14, %v251_v20, %v250_v1  ;;  %v554_v33 = vor.u32 %v553_v45, %v552_v15  ;;  %v694_v32 = vand.u32 8388607, %v687_v60 }
 0x134   :  { %v704_v7 = vshll.u32 %v4734_v48, %v701_v28  ;;  %v558_v51 = vor.u32 4788187, %v557_v30  ;;  %v5084_v5 = vshrl.u32 %v436_v41, 30  ;;  %v707_v47 = vshll.u32 %v4735_v53, %v701_v28 }
 0x135   :  { %v705_v34 = vshrl.u32 %v4735_v53, %v702_v31  ;;  %v708_v40 = vshrl.u32 %v4736_v55, %v702_v31  ;;  %v711_v39 = vshrl.u32 %v4737_v57, %v702_v31  ;;  %v713_v19 = vshll.u32 %v4737_v57, %v701_v28 }
 0x136   :  { %v714_v56 = vshrl.u32 %v4738_v59, %v702_v31  ;;  %v438_v44 = vshll.u32 %v5084_v5, 30  ;;  %v700_v61 = vshrl.u32 %v699_v16, 5  ;;  %v710_v1 = vshll.u32 %v4736_v55, %v701_v28 }
 0x137   :  { %v586_v0 = vand.u32 2139095040, %v4839_v36  ;;  %v706_v42 = vor.u32 %v705_v34, %v704_v7  ;;  %v709_v4 = vor.u32 %v708_v40, %v707_v47  ;;  %v717_v9 = vshrl.u32 %v4739_v2, %v702_v31 }
 0x138   :  { %v715_v50 = vor.u32 %v714_v56, %v713_v19  ;;  %v559_v37 = vand.u32 2147483647, %v558_v51  ;;  %v5096_v12 = vsub.s32 %v435_v38, %v438_v44  ;;  %v712_v3 = vor.u32 %v711_v39, %v710_v1 }
 0x139   :  { %v716_v13 = vshll.u32 %v4738_v59, %v701_v28  ;;  %v255_v22 = vsel %vm5067_vm2, %v4823_v17, %v252_v18  ;;  %v561_v49 = vcvt.s32.f32 %v554_v33  ;;  %v695_v10 = vor.u32 8388608, %v694_v32 }
 0x13a   :  { %v583_v11 = vand.u32 2147483647, %v4839_v36  ;;  %v441_v20 = vsub.s32 0, %v5096_v12  ;;  %vm719_vm3 = vcmp.lt.s32.totalorder %v700_v61, 1  ;;  %vm722_vm4 = vcmp.lt.s32.totalorder %v700_v61, 4 }
 0x13b   :  { %v718_v63 = vor.u32 %v717_v9, %v716_v13  ;;  %v5104_v45 = vpop.eup %4690  ;;  %v703_v62 = vshrl.u32 %v4734_v48, %v702_v31  ;;  %v727_v43 = vsel %vm719_vm3, %v706_v42, %v709_v4  ;;  %v728_v16 = vsel %vm722_vm4, %v715_v50, 920167782 }
 0x13c   :  { %v587_v38 = vshrl.u32 %v586_v0, 23  ;;  %v5109_v28 = vpop.eup %4692  ;;  %v562_v15 = vmul.f32 %v561_v49, %v559_v37  ;;  %v3996_v30 = vmin.u32 %v441_v20, %v5096_v12  ;;  %vm721_vm5 = vcmp.lt.s32.totalorder %v700_v61, 3 }
 0x13d   :  { %v724_v41 = vsel %vm722_vm4, %v712_v3, 2102212464  ;;  %vm720_vm6 = vcmp.lt.s32.totalorder %v700_v61, 2  ;;  %v729_v18 = vsel %vm721_vm5, %v712_v3, %v728_v16  ;;  %v731_v33 = vsel %vm719_vm3, %v709_v4, %v712_v3 }
 0x13e   :  { %v735_v32 = vshll.u32 %v695_v10, 8  ;;  %v443_v7 = vclz %v3996_v30  ;;  %v723_v31 = vsel %vm719_vm3, %v703_v62, %v706_v42  ;;  %v730_v51 = vsel %vm720_vm6, %v727_v43, %v729_v18 }
 0x13f   :  { %v732_v34 = vsel %vm722_vm4, %v718_v63, 1326507024  ;;  %vm377_vm8 = vcmp.lt.s32.totalorder %v4833_v26, 0  ;;  %v725_v40 = vsel %vm721_vm5, %v709_v4, %v724_v41  ;;  %v563_v56 = vxor.u32 2147483648, %v562_v15 }
 0x140   :  { %v733_v47 = vsel %vm721_vm5, %v715_v50, %v732_v34  ;;  %v5118_v39 = vmul.u32.u64.low %v735_v32, %v730_v51  ;;  %v5119_v19 = vmul.u32.u64.high %v735_v32, %v730_v51, %v5118_v39  ;;  %v3997_v44 = vadd.s32 4294967294, %v443_v7 }
 0x141   :  { %v734_v1 = vsel %vm720_vm6, %v731_v33, %v733_v47  ;;  %v4003_v0 = vadd.s32 4294967169, %v587_v38  ;;  %4694 = vcosq.f32 %v255_v22  ;;  %v898_v37 = vand.u32 2139095040, %v4851_v46 }
 0x142   :  { %v5123_v9 = vmul.u32.u64.low %v735_v32, %v734_v1  ;;  %v5124_v42 = vmul.u32.u64.high %v735_v32, %v734_v1, %v5123_v9  ;;  %v431_v3 = vadd.s32 %v5032_v54, %v5038_v58  ;;  %vm3998_vm9 = vcmp.lt.s32.totalorder %v3997_v44, 0 }
 0x143   :  { %v726_v4 = vsel %vm720_vm6, %v723_v31, %v725_v40  ;;  %v593_v50 = vadd.s32 1, %v4003_v0  ;;  %v446_v13 = vsel %vm3998_vm9, 0, %v3997_v44  ;;  %v461_v49 = vsub.s32 4, %v5084_v5 }
 0x144   :  { %v745_v10 = vadd.s32 1, %v5119_v19  ;;  %v590_v20 = vand.u32 8388607, %v583_v11  ;;  %v564_v63 = vsel %vm481_vm7, %v563_v56, %v562_v15  ;;  %v447_v62 = vsub.s32 32, %v446_v13 }
 0x145   :  { %v451_v43 = vsub.s32 4294967266, %v446_v13  ;;  %vm594_vm12 = vcmp.gt.s32.totalorder %v593_v50, 0  ;;  %v742_v16 = vmul.u32 %v735_v32, %v726_v4  ;;  %vm744_vm13 = vc.u32 %v5124_v42, %v5118_v39 }
 0x146   :  { %v595_v54 = vsel %vm594_vm12, %v593_v50, 0  ;;  %v899_v58 = vshrl.u32 %v898_v37, 23  ;;  %4696 = vsinq.f32 %v255_v22  ;;  %vm5140_vm14 = vcmp.le.f32.partialorder %v375_v8, 0.7853982 }
 0x147   :  { %v449_v38 = vshrl.u32 %v431_v3, %v447_v62  ;;  %v452_v30 = vadd.s32 127, %v451_v43  ;;  %v746_v15 = vsel %vm744_vm13, %v745_v10, %v5119_v19  ;;  %v448_v41 = vshll.u32 %v5096_v12, %v446_v13 }
 0x148   :  { %v747_v18 = vadd.s32 %v746_v15, %v742_v16  ;;  %v597_v33 = vand.u32 31, %v595_v54  ;;  %v895_v32 = vand.u32 2147483647, %v4851_v46  ;;  %v5150_v22 = vsel %vm5017_vm11, %v4831_v24, %v564_v63 }
 0x149   :  { %v453_v7 = vshll.u32 %v452_v30, 23  ;;  %v5155_v8 = vsel %vm377_vm8, %v461_v49, %v5084_v5  ;;  %v591_v31 = vor.u32 8388608, %v590_v20  ;;  %v450_v51 = vor.u32 %v449_v38, %v448_v41 }
 0x14a   :  { %v748_v34 = vadd.s32 536870912, %v747_v18  ;;  %v598_v40 = vsub.s32 32, %v597_v33  ;;  %v4015_v12 = vadd.s32 4294967169, %v899_v58  ;;  %v596_v19 = vshrl.u32 %v595_v54, 5 }
 0x14b   :  { %v454_v47 = vor.u32 4788187, %v453_v7  ;;  %v600_v56 = vshll.u32 %v4734_v48, %v597_v33  ;;  %v603_v44 = vshll.u32 %v4735_v53, %v597_v33  ;;  %v5159_v6 = vpop.eup %4694  ;;  %v606_v9 = vshll.u32 %v4736_v55, %v597_v33 }
 0x14c   :  { %v5161_v1 = vshrl.u32 %v748_v34, 30  ;;  %v601_v0 = vshrl.u32 %v4735_v53, %v598_v40  ;;  %v604_v5 = vshrl.u32 %v4736_v55, %v598_v40  ;;  %v607_v3 = vshrl.u32 %v4737_v57, %v598_v40 }
 0x14d   :  { %v455_v37 = vand.u32 2147483647, %v454_v47  ;;  %v609_v4 = vshll.u32 %v4737_v57, %v597_v33  ;;  %v610_v50 = vshrl.u32 %v4738_v59, %v598_v40  ;;  %v457_v13 = vcvt.s32.f32 %v450_v51 }
 0x14e   :  { %v750_v49 = vshll.u32 %v5161_v1, 30  ;;  %v602_v10 = vor.u32 %v601_v0, %v600_v56  ;;  %v612_v20 = vshll.u32 %v4738_v59, %v597_v33  ;;  %v605_v63 = vor.u32 %v604_v5, %v603_v44 }
 0x14f   :  { %v608_v62 = vor.u32 %v607_v3, %v606_v9  ;;  %v611_v43 = vor.u32 %v610_v50, %v609_v4  ;;  %v613_v16 = vshrl.u32 %v4739_v2, %v598_v40  ;;  %4698 = vcosq.f32 %v5150_v22 }
 0x150   :  { %v5174_v54 = vand.u32 3, %v5077_v27  ;;  %v464_v58 = vsel %vm5140_vm14, 0, %v5155_v8  ;;  %v5179_v38 = vsub.s32 %v747_v18, %v750_v49  ;;  %v5181_v30 = vpop.eup %4696  ;;  %v458_v15 = vmul.f32 %v457_v13, %v455_v37 }
 0x151   :  { %v614_v41 = vor.u32 %v613_v16, %v612_v20  ;;  %v631_v33 = vshll.u32 %v591_v31, 8  ;;  %v5185_v7 = vand.u32 8388607, %v895_v32  ;;  %vm615_vm7 = vcmp.lt.s32.totalorder %v596_v19, 1 }
 0x152   :  { %v753_v51 = vsub.s32 0, %v5179_v38  ;;  %vm618_vm11 = vcmp.lt.s32.totalorder %v596_v19, 4  ;;  %v905_v27 = vadd.s32 1, %v4015_v12  ;;  %v599_v34 = vshrl.u32 %v4734_v48, %v598_v40 }
 0x153   :  { %v620_v47 = vsel %vm618_vm11, %v608_v62, 2102212464  ;;  %v623_v8 = vsel %vm615_vm7, %v602_v10, %v605_v63  ;;  %v624_v18 = vsel %vm618_vm11, %v611_v43, 920167782  ;;  %vm616_vm15 = vcmp.lt.s32.totalorder %v596_v19, 2 }
 0x154   :  { %v4008_v56 = vmin.u32 %v753_v51, %v5179_v38  ;;  %vm617_vm0 = vcmp.lt.s32.totalorder %v596_v19, 3  ;;  %v627_v44 = vsel %vm615_vm7, %v605_v63, %v608_v62  ;;  %v459_v31 = vxor.u32 2147483648, %v458_v15 }
 0x155   :  { %v619_v0 = vsel %vm615_vm7, %v599_v34, %v602_v10  ;;  %v625_v5 = vsel %vm617_vm0, %v608_v62, %v624_v18  ;;  %v628_v9 = vsel %vm618_vm11, %v614_v41, 1326507024  ;;  %v621_v3 = vsel %vm617_vm0, %v605_v63, %v620_v47 }
 0x156   :  { %v755_v37 = vclz %v4008_v56  ;;  %v626_v4 = vsel %vm616_vm15, %v623_v8, %v625_v5  ;;  %v629_v50 = vsel %vm617_vm0, %v611_v43, %v628_v9  ;;  %vm906_vm1 = vcmp.gt.s32.totalorder %v905_v27, 0 }
 0x157   :  { %v630_v12 = vsel %vm616_vm15, %v627_v44, %v629_v50  ;;  %v5192_v40 = vmul.u32.u64.low %v631_v33, %v626_v4  ;;  %v5193_v13 = vmul.u32.u64.high %v631_v33, %v626_v4, %v5192_v40  ;;  %v907_v51 = vsel %vm906_vm1, %v905_v27, 0 }
 0x158   :  { %v4009_v49 = vadd.s32 4294967294, %v755_v37  ;;  %v5196_v20 = vmul.u32.u64.low %v631_v33, %v630_v12  ;;  %v5197_v16 = vmul.u32.u64.high %v631_v33, %v630_v12, %v5196_v20  ;;  %4700 = vsinq.f32 %v5150_v22 }
 0x159   :  { %v5200_v10 = vadd.s32 3, %v464_v58  ;;  %v622_v63 = vsel %vm616_vm15, %v619_v0, %v621_v3  ;;  %v909_v62 = vand.u32 31, %v907_v51  ;;  %v5203_v43 = vpop.eup %4698  ;;  %v743_v41 = vadd.s32 %v5118_v39, %v5124_v42 }
 0x15a   :  { %vm4010_vm3 = vcmp.lt.s32.totalorder %v4009_v49, 0  ;;  %v903_v34 = vor.u32 8388608, %v5185_v7  ;;  %v791_v47 = vand.u32 2147483647, %v4856_v52  ;;  %v773_v27 = vsub.s32 4, %v5161_v1 }
 0x15b   :  { %v758_v8 = vsel %vm4010_vm3, 0, %v4009_v49  ;;  %v641_v22 = vadd.s32 1, %v5193_v13  ;;  %v910_v58 = vsub.s32 32, %v909_v62  ;;  %v460_v19 = vsel %vm377_vm8, %v459_v31, %v458_v15 }
 0x15c   :  { %v759_v18 = vsub.s32 32, %v758_v8  ;;  %v763_v56 = vsub.s32 4294967266, %v758_v8  ;;  %v638_v44 = vmul.u32 %v631_v33, %v622_v63  ;;  %v760_v0 = vshll.u32 %v5179_v38, %v758_v8 }
 0x15d   :  { %vm640_vm4 = vc.u32 %v5197_v16, %v5192_v40  ;;  %v912_v39 = vshll.u32 %v4734_v48, %v909_v62  ;;  %v913_v42 = vshrl.u32 %v4735_v53, %v910_v58  ;;  %v916_v37 = vshrl.u32 %v4736_v55, %v910_v58 }
 0x15e   :  { %v761_v7 = vshrl.u32 %v743_v41, %v759_v18  ;;  %v764_v5 = vadd.s32 127, %v763_v56  ;;  %v642_v9 = vsel %vm640_vm4, %v641_v22, %v5193_v13  ;;  %v5220_v15 = vshrl.u32 %v907_v51, 5 }
 0x15f   :  { %v643_v3 = vadd.s32 %v642_v9, %v638_v44  ;;  %v915_v33 = vshll.u32 %v4735_v53, %v909_v62  ;;  %v919_v38 = vshrl.u32 %v4737_v57, %v910_v58  ;;  %v914_v50 = vor.u32 %v913_v42, %v912_v39 }
 0x160   :  { %v762_v31 = vor.u32 %v761_v7, %v760_v0  ;;  %v765_v4 = vshll.u32 %v764_v5, 23  ;;  %v918_v12 = vshll.u32 %v4736_v55, %v909_v62  ;;  %v921_v63 = vshll.u32 %v4737_v57, %v909_v62 }
 0x161   :  { %v644_v49 = vadd.s32 536870912, %v643_v3  ;;  %v917_v20 = vor.u32 %v916_v37, %v915_v33  ;;  %v922_v13 = vshrl.u32 %v4738_v59, %v910_v58  ;;  %v463_v51 = vsel %vm5140_vm14, %v4833_v26, %v460_v19 }
 0x162   :  { %vm689_vm5 = vcmp.lt.s32.totalorder %v4837_v35, 0  ;;  %v766_v41 = vor.u32 4788187, %v765_v4  ;;  %v924_v8 = vshll.u32 %v4738_v59, %v909_v62  ;;  %v925_v22 = vshrl.u32 %v4739_v2, %v910_v58  ;;  %v5233_v18 = vpop.eup %4700 }
 0x163   :  { %vm585_vm6 = vcmp.lt.s32.totalorder %v4839_v36, 0  ;;  %v645_v56 = vshrl.u32 %v644_v49, 30  ;;  %v920_v44 = vor.u32 %v919_v38, %v918_v12  ;;  %v923_v0 = vor.u32 %v922_v13, %v921_v63 }
 0x164   :  { %v794_v39 = vand.u32 2139095040, %v4856_v52  ;;  %v767_v42 = vand.u32 2147483647, %v766_v41  ;;  %v769_v7 = vcvt.s32.f32 %v762_v31  ;;  %v926_v61 = vor.u32 %v925_v22, %v924_v8 }
 0x165   :  { %vm927_vm8 = vcmp.lt.s32.totalorder %v5220_v15, 1  ;;  %vm5240_vm9 = vcmp.le.f32.partialorder %v687_v60, 0.7853982  ;;  %v646_v19 = vshll.u32 %v645_v56, 30  ;;  %v911_v5 = vshrl.u32 %v4734_v48, %v910_v58 }
 0x166   :  { %vm930_vm12 = vcmp.lt.s32.totalorder %v5220_v15, 4  ;;  %v935_v9 = vsel %vm927_vm8, %v914_v50, %v917_v20  ;;  %v770_v37 = vmul.f32 %v769_v7, %v767_v42  ;;  %vm5250_vm13 = vcmp.le.f32.partialorder %v583_v11, 0.7853982 }
 0x167   :  { %vm928_vm14 = vcmp.lt.s32.totalorder %v5220_v15, 2  ;;  %vm929_vm7 = vcmp.lt.s32.totalorder %v5220_v15, 3  ;;  %v936_v60 = vsel %vm930_vm12, %v923_v0, 920167782  ;;  %v5256_v38 = vsub.s32 %v643_v3, %v646_v19 }
 0x168   :  { %v932_v58 = vsel %vm930_vm12, %v920_v44, 2102212464  ;;  %v937_v31 = vsel %vm929_vm7, %v920_v44, %v936_v60  ;;  %v939_v4 = vsel %vm927_vm8, %v917_v20, %v920_v44  ;;  %v669_v12 = vsub.s32 4, %v645_v56 }
 0x169   :  { %v938_v49 = vsel %vm928_vm14, %v935_v9, %v937_v31  ;;  %v940_v11 = vsel %vm930_vm12, %v926_v61, 1326507024  ;;  %v943_v63 = vshll.u32 %v903_v34, 8  ;;  %v771_v13 = vxor.u32 2147483648, %v770_v37 }
 0x16a   :  { %v649_v41 = vsub.s32 0, %v5256_v38  ;;  %v931_v8 = vsel %vm927_vm8, %v911_v5, %v914_v50  ;;  %v941_v22 = vsel %vm929_vm7, %v923_v0, %v940_v11  ;;  %v933_v3 = vsel %vm929_vm7, %v917_v20, %v932_v58 }
 0x16b   :  { %v942_v42 = vsel %vm928_vm14, %v939_v4, %v941_v22  ;;  %v5267_v7 = vmul.u32.u64.low %v943_v63, %v938_v49  ;;  %v5268_v19 = vmul.u32.u64.high %v943_v63, %v938_v49, %v5267_v7  ;;  %4702 = vcosq.f32 %v463_v51 }
 0x16c   :  { %v5276_v34 = vsel %vm689_vm5, %v773_v27, %v5161_v1  ;;  %v4004_v44 = vmin.u32 %v649_v41, %v5256_v38  ;;  %v795_v50 = vshrl.u32 %v794_v39, 23  ;;  %v670_v20 = vsel %vm585_vm6, %v669_v12, %v645_v56 }
 0x16d   :  { %v5281_v0 = vmul.u32.u64.low %v943_v63, %v942_v42  ;;  %v5282_v61 = vmul.u32.u64.high %v943_v63, %v942_v42, %v5281_v0  ;;  %v798_v5 = vand.u32 8388607, %v791_v47  ;;  %v772_v9 = vsel %vm689_vm5, %v771_v13, %v770_v37 }
 0x16e   :  { %v651_v60 = vclz %v4004_v44  ;;  %v934_v1 = vsel %vm928_vm14, %v931_v8, %v933_v3  ;;  %v4011_v27 = vadd.s32 4294967169, %v795_v50  ;;  %4704 = vsinq.f32 %v463_v51 }
 0x16f   :  { %v5291_v39 = vand.u32 3, %v5200_v10  ;;  %v776_v56 = vsel %vm5240_vm9, 0, %v5276_v34  ;;  %v953_v58 = vadd.s32 1, %v5268_v19  ;;  %v672_v4 = vsel %vm5250_vm13, 0, %v670_v20 }
 0x170   :  { %v4005_v31 = vadd.s32 4294967294, %v651_v60  ;;  %v801_v37 = vadd.s32 1, %v4011_v27  ;;  %v256_v15 = vsel %vm5067_vm2, 0, %v5074_v29  ;;  %v775_v10 = vsel %vm5240_vm9, %v4837_v35, %v772_v9 }
 0x171   :  { %v950_v51 = vmul.u32 %v943_v63, %v934_v1  ;;  %vm952_vm11 = vc.u32 %v5282_v61, %v5267_v7  ;;  %v799_v12 = vor.u32 8388608, %v798_v5  ;;  %v639_v49 = vadd.s32 %v5192_v40, %v5197_v16 }
 0x172   :  { %vm4006_vm15 = vcmp.lt.s32.totalorder %v4005_v31, 0  ;;  %v954_v11 = vsel %vm952_vm11, %v953_v58, %v5268_v19  ;;  %vm802_vm0 = vcmp.gt.s32.totalorder %v801_v37, 0  ;;  %v260_v29 = vadd.s32 3, %v256_v15 }
 0x173   :  { %v654_v13 = vsel %vm4006_vm15, 0, %v4005_v31  ;;  %v955_v41 = vadd.s32 %v954_v11, %v950_v51  ;;  %v803_v25 = vsel %vm802_vm0, %v801_v37, 0  ;;  %4706 = vcosq.f32 %v775_v10 }
 0x174   :  { %v655_v8 = vsub.s32 32, %v654_v13  ;;  %v659_v22 = vsub.s32 4294967266, %v654_v13  ;;  %v5310_v3 = vadd.s32 3, %v672_v4  ;;  %4708 = vsinq.f32 %v775_v10 }
 0x175   :  { %v956_v63 = vadd.s32 536870912, %v955_v41  ;;  %v805_v42 = vand.u32 31, %v803_v25  ;;  %v5312_v44 = vshll.u32 %v799_v12, 8  ;;  %v5314_v50 = vpop.eup %4702  ;;  %v656_v40 = vshll.u32 %v5256_v38, %v654_v13 }
 0x176   :  { %v657_v16 = vshrl.u32 %v639_v49, %v655_v8  ;;  %v660_v19 = vadd.s32 127, %v659_v22  ;;  %v264_v20 = vxor.u32 2147483648, %v5181_v30  ;;  %v5320_v9 = vand.u32 3, %v260_v29 }
 0x177   :  { %v5318_v0 = vshrl.u32 %v956_v63, 30  ;;  %v806_v5 = vsub.s32 32, %v805_v42  ;;  %v267_v60 = vxor.u32 2147483648, %v5159_v6  ;;  %v804_v58 = vshrl.u32 %v803_v25, 5 }
 0x178   :  { %v658_v1 = vor.u32 %v657_v16, %v656_v40  ;;  %v661_v27 = vshll.u32 %v660_v19, 23  ;;  %v360_v31 = vsel %vm5011_vm10, 0, %v5063_v21  ;;  %v5326_v4 = vpop.eup %4704  ;;  %v808_v37 = vshll.u32 %v4734_v48, %v805_v42 }
 0x179   :  { %v958_v38 = vshll.u32 %v5318_v0, 30  ;;  %v809_v15 = vshrl.u32 %v4735_v53, %v806_v5  ;;  %v811_v10 = vshll.u32 %v4735_v53, %v805_v42  ;;  %v812_v12 = vshrl.u32 %v4736_v55, %v806_v5 }
 0x17a   :  { %v662_v51 = vor.u32 4788187, %v661_v27  ;;  %v814_v49 = vshll.u32 %v4736_v55, %v805_v42  ;;  %v815_v11 = vshrl.u32 %v4737_v57, %v806_v5  ;;  %v665_v13 = vcvt.s32.f32 %v658_v1 }
 0x17b   :  { %v5335_v23 = vsub.s32 %v955_v41, %v958_v38  ;;  %v817_v21 = vshll.u32 %v4737_v57, %v805_v42  ;;  %v818_v25 = vshrl.u32 %v4738_v59, %v806_v5  ;;  %v810_v8 = vor.u32 %v809_v15, %v808_v37 }
 0x17c   :  { %v663_v29 = vand.u32 2147483647, %v662_v51  ;;  %v813_v22 = vor.u32 %v812_v12, %v811_v10  ;;  %v816_v63 = vor.u32 %v815_v11, %v814_v49  ;;  %v807_v40 = vshrl.u32 %v4734_v48, %v806_v5 }
 0x17d   :  { %v961_v53 = vsub.s32 0, %v5335_v23  ;;  %v819_v16 = vor.u32 %v818_v25, %v817_v21  ;;  %vm263_vm10 = vcmp.eq.s32.totalorder %v5320_v9, 0  ;;  %v5342_v55 = vpop.eup %4706  ;;  %v820_v41 = vshll.u32 %v4738_v59, %v805_v42 }
 0x17e   :  { %v666_v19 = vmul.f32 %v665_v13, %v663_v29  ;;  %v821_v57 = vshrl.u32 %v4739_v2, %v806_v5  ;;  %vm826_vm2 = vcmp.lt.s32.totalorder %v804_v58, 4  ;;  %v5346_v1 = vpop.eup %4708  ;;  %vm823_vm1 = vcmp.lt.s32.totalorder %v804_v58, 1 }
 0x17f   :  { %v4016_v27 = vmin.u32 %v961_v53, %v5335_v23  ;;  %vm825_vm3 = vcmp.lt.s32.totalorder %v804_v58, 3  ;;  %v828_v38 = vsel %vm826_vm2, %v816_v63, 2102212464  ;;  %v827_v15 = vsel %vm823_vm1, %v807_v40, %v810_v8 }
 0x180   :  { %v667_v48 = vxor.u32 2147483648, %v666_v19  ;;  %v822_v37 = vor.u32 %v821_v57, %v820_v41  ;;  %v831_v10 = vsel %vm823_vm1, %v810_v8, %v813_v22  ;;  %v829_v12 = vsel %vm825_vm3, %v813_v22, %v828_v38 }
 0x181   :  { %v963_v51 = vclz %v4016_v27  ;;  %v832_v59 = vsel %vm826_vm2, %v819_v16, 920167782  ;;  %v835_v42 = vsel %vm823_vm1, %v813_v22, %v816_v63  ;;  %vm824_vm4 = vcmp.lt.s32.totalorder %v804_v58, 2 }
 0x182   :  { %v668_v2 = vsel %vm585_vm6, %v667_v48, %v666_v19  ;;  %v833_v5 = vsel %vm825_vm3, %v816_v63, %v832_v59  ;;  %v836_v49 = vsel %vm826_vm2, %v822_v37, 1326507024  ;;  %vm259_vm5 = vweird.f32 %v4823_v17 }
 0x183   :  { %v4017_v11 = vadd.s32 4294967294, %v963_v51  ;;  %v834_v13 = vsel %vm824_vm4, %v831_v10, %v833_v5  ;;  %v837_v21 = vsel %vm825_vm3, %v819_v16, %v836_v49  ;;  %vm266_vm8 = vcmp.eq.s32.totalorder %v5320_v9, 2 }
 0x184   :  { %v830_v25 = vsel %vm824_vm4, %v827_v15, %v829_v12  ;;  %v838_v29 = vsel %vm824_vm4, %v835_v42, %v837_v21  ;;  %v5360_v8 = vmul.u32.u64.low %v5312_v44, %v834_v13  ;;  %v5361_v22 = vmul.u32.u64.high %v5312_v44, %v834_v13, %v5360_v8 }
 0x185   :  { %v671_v63 = vsel %vm5250_vm13, %v4839_v36, %v668_v2  ;;  %vm4018_vm6 = vcmp.lt.s32.totalorder %v4017_v11, 0  ;;  %v5368_v53 = vmul.u32.u64.low %v5312_v44, %v838_v29  ;;  %v5369_v58 = vmul.u32.u64.high %v5312_v44, %v838_v29, %v5368_v53 }
 0x186   :  { %v966_v40 = vsel %vm4018_vm6, 0, %v4017_v11  ;;  %v265_v16 = vsel %vm263_vm10, %v5159_v6, %v264_v20  ;;  %v268_v19 = vsel %vm266_vm8, %v267_v60, %v5181_v30  ;;  %v364_v41 = vadd.s32 3, %v360_v31 }
 0x187   :  { %v951_v33 = vadd.s32 %v5267_v7, %v5282_v61  ;;  %v967_v57 = vsub.s32 32, %v966_v40  ;;  %v971_v27 = vsub.s32 4294967266, %v966_v40  ;;  %vm262_vm12 = vcmp.lt.s32.totalorder %v5320_v9, 2 }
 0x188   :  { %v846_v38 = vmul.u32 %v5312_v44, %v830_v25  ;;  %v849_v48 = vadd.s32 1, %v5361_v22  ;;  %v365_v37 = vand.u32 3, %v364_v41  ;;  %v368_v15 = vxor.u32 2147483648, %v5109_v28 }
 0x189   :  { %4710 = vcosq.f32 %v671_v63  ;;  %v972_v20 = vadd.s32 127, %v971_v27  ;;  %vm848_vm13 = vc.u32 %v5369_v58, %v5360_v8  ;;  %v269_v6 = vsel %vm262_vm12, %v265_v16, %v268_v19 }
 0x18a   :  { %4712 = vsinq.f32 %v671_v63  ;;  %v969_v30 = vshrl.u32 %v951_v33, %v967_v57  ;;  %v850_v7 = vsel %vm848_vm13, %v849_v48, %v5361_v22  ;;  %vm363_vm14 = vweird.f32 %v4819_v14 }
 0x18b   :  { %v968_v61 = vshll.u32 %v5335_v23, %v966_v40  ;;  %v973_v44 = vshll.u32 %v972_v20, 23  ;;  %v851_v9 = vadd.s32 %v850_v7, %v846_v38  ;;  %vm367_vm7 = vcmp.eq.s32.totalorder %v365_v37, 0 }
 0x18c   :  { %v270_v60 = vsel %vm259_vm5, nan, %v269_v6  ;;  %vm366_vm11 = vcmp.lt.s32.totalorder %v365_v37, 2  ;;  %v369_v31 = vsel %vm367_vm7, %v5104_v45, %v368_v15  ;;  %v371_v10 = vxor.u32 2147483648, %v5104_v45 }
 0x18d   :  { %v974_v51 = vor.u32 4788187, %v973_v44  ;;  %v852_v12 = vadd.s32 536870912, %v851_v9  ;;  %vm370_vm15 = vcmp.eq.s32.totalorder %v365_v37, 2  ;;  %v472_v59 = vxor.u32 2147483648, %v5326_v4 }
 0x18e   :  { %v970_v42 = vor.u32 %v969_v30, %v968_v61  ;;  %v372_v2 = vsel %vm370_vm15, %v371_v10, %v5109_v28  ;;  %vm471_vm0 = vcmp.eq.s32.totalorder %v5291_v39, 0  ;;  %v475_v23 = vxor.u32 2147483648, %v5314_v50 }
 0x18f   :  { %v5398_v5 = vshrl.u32 %v852_v12, 30  ;;  %v373_v17 = vsel %vm366_vm11, %v369_v31, %v372_v2  ;;  %v473_v49 = vsel %vm471_vm0, %v5314_v50, %v472_v59  ;;  %vm474_vm10 = vcmp.eq.s32.totalorder %v5291_v39, 2  ;;  %v5456_v59 = vld [vmem:[%s7700_s5 + $0x10] sm:$0xff] }
 0x190   :  { %v780_v45 = vadd.s32 3, %v776_v56  ;;  %v677_v11 = vand.u32 3, %v5310_v3  ;;  %v374_v28 = vsel %vm363_vm14, nan, %v373_v17  ;;  %v476_v13 = vsel %vm474_vm10, %v475_v23, %v5326_v4  ;;  %v5466_v23 = vld [vmem:[%s7700_s5 + $0x8] sm:$0xff] }
 0x191   :  { %v975_v21 = vand.u32 2147483647, %v974_v51  ;;  %v854_v25 = vshll.u32 %v5398_v5, 30  ;;  %v4462_v29 = vpack.c.bf16 %v374_v28, %v270_v60  ;;  %vm470_vm2 = vcmp.lt.s32.totalorder %v5291_v39, 2 }
 0x192   :  { %vm467_vm1 = vweird.f32 %v4833_v26  ;;  %v477_v50 = vsel %vm470_vm2, %v473_v49, %v476_v13  ;;  %v576_v62 = vxor.u32 2147483648, %v5233_v18  ;;  %v579_v34 = vxor.u32 2147483648, %v5203_v43  ;;  %v1011_v13 = vld [vmem:[%s7700_s5 + $0x20] sm:$0xff] }
 0x193   :  { %v4711_v56 = vpop.eup %4710  ;;  %v977_v3 = vcvt.s32.f32 %v970_v42  ;;  %v5415_v22 = vsub.s32 %v851_v9, %v854_v25  ;;  %4463 = vmatprep.subr.bf16.mxu1 %v4462_v29  ;;  %vm575_vm9 = vcmp.eq.s32.totalorder %v5174_v54, 0  ;;  %vm578_vm3 = vcmp.eq.s32.totalorder %v5174_v54, 2  ;;  %v999_v9 = vld [vmem:[%s7699_s3] sm:$0xff] }
 0x194   :  { %v4713_v14 = vpop.eup %4712  ;;  %4465 = vmatpush3.bf16.msra.mxu1 %v4462_v29  ;;  %v478_v4 = vsel %vm467_vm1, nan, %v477_v50  ;;  %vm574_vm4 = vcmp.lt.s32.totalorder %v5174_v54, 2  ;;  %v577_v26 = vsel %vm575_vm9, %v5203_v43, %v576_v62  ;;  %v580_v39 = vsel %vm578_vm3, %v579_v34, %v5233_v18  ;;  %v1012_v50 = vld [vmem:[%s7700_s5 + $0x28] sm:$0xff] }
 0x195   :  { %v978_v63 = vmul.f32 %v977_v3, %v975_v21  ;;  %v857_v53 = vsub.s32 0, %v5415_v22  ;;  %vm571_vm5 = vweird.f32 %v4831_v24  ;;  %v581_v40 = vsel %vm574_vm4, %v577_v26, %v580_v39 }
 0x196   :  { %v582_v16 = vsel %vm571_vm5, nan, %v581_v40  ;;  %v781_v19 = vand.u32 3, %v780_v45  ;;  %v680_v57 = vxor.u32 2147483648, %v4713_v14  ;;  %v683_v27 = vxor.u32 2147483648, %v4711_v56  ;;  %v5473_v45 = vld [vmem:[%s7700_s5 + $0x18] sm:$0xff] }
 0x197   :  { %v4012_v41 = vmin.u32 %v857_v53, %v5415_v22  ;;  %v4466_v33 = vpack.c.bf16 %v582_v16, %v478_v4  ;;  %v979_v38 = vxor.u32 2147483648, %v978_v63  ;;  %vm679_vm8 = vcmp.eq.s32.totalorder %v677_v11, 0 }
 0x198   :  { %vm682_vm6 = vcmp.eq.s32.totalorder %v677_v11, 2  ;;  %vm678_vm12 = vcmp.lt.s32.totalorder %v677_v11, 2  ;;  %v681_v54 = vsel %vm679_vm8, %v4711_v56, %v680_v57  ;;  %v784_v18 = vxor.u32 2147483648, %v5346_v1  ;;  %v1013_v56 = vld [vmem:[%s7700_s5 + $0x30] sm:$0xff] }
 0x199   :  { %v859_v48 = vclz %v4012_v41  ;;  %4467 = vmatprep.subr.bf16.mxu1 %v4466_v33  ;;  %v684_v43 = vsel %vm682_vm6, %v683_v27, %v4713_v14  ;;  %vm783_vm13 = vcmp.eq.s32.totalorder %v781_v19, 0  ;;  %v787_v15 = vxor.u32 2147483648, %v5342_v55 }
 0x19a   :  { %4469 = vmatpush3.bf16.msra.mxu1 %v4466_v33  ;;  %v685_v37 = vsel %vm678_vm12, %v681_v54, %v684_v43  ;;  %vm897_vm14 = vcmp.lt.s32.totalorder %v4851_v46, 0  ;;  %vm675_vm7 = vweird.f32 %v4839_v36  ;;  %v785_v20 = vsel %vm783_vm13, %v5342_v55, %v784_v18 }
 0x19b   :  { %v4013_v24 = vadd.s32 4294967294, %v859_v48  ;;  %vm786_vm11 = vcmp.eq.s32.totalorder %v781_v19, 2  ;;  %v686_v6 = vsel %vm675_vm7, nan, %v685_v37  ;;  %vm782_vm0 = vcmp.lt.s32.totalorder %v781_v19, 2 }
 0x19c   :  { %v788_v30 = vsel %vm786_vm11, %v787_v15, %v5346_v1  ;;  %v847_v7 = vadd.s32 %v5360_v8, %v5369_v58  ;;  %vm779_vm10 = vweird.f32 %v4837_v35  ;;  %v980_v36 = vsel %vm897_vm14, %v979_v38, %v978_v63  ;;  %v5442_v1 = vld [vmem:[%s7700_s5] sm:$0xff] }
 0x19d   :  { %vm4014_vm15 = vcmp.lt.s32.totalorder %v4013_v24, 0  ;;  %v789_v44 = vsel %vm782_vm0, %v785_v20, %v788_v30  ;;  %vm1055_vm2 = vcmask 523264   ;;  %vm5446_vm1 = vcmp.le.f32.partialorder %v895_v32, 0.7853982  ;;  %v1000_v20 = vld [vmem:[%s7699_s3 + $0x8] sm:$0xff] }
 0x19e   :  { %v862_v61 = vsel %vm4014_vm15, 0, %v4013_v24  ;;  %v790_v31 = vsel %vm779_vm10, nan, %v789_v44  ;;  %4250 = vmatprep.mubr.msk.f32.mxu1 %vm1055_vm2, %v999_v9  ;;  %v4740_v12 = vmov 0   ;;  %v983_v32 = vsel %vm5446_vm1, %v4851_v46, %v980_v36  ;;  %v1004_v30 = vld [vmem:[%s7699_s3 + $0x28] sm:$0xff]  ;;  %v1185_v44 = vld [vmem:[%s7699_s3 + $0x40] sm:$0xff] }
 0x19f   :  { %v863_v55 = vsub.s32 32, %v862_v61  ;;  %v867_v60 = vsub.s32 4294967266, %v862_v61  ;;  %v4470_v8 = vpack.c.bf16 %v790_v31, %v686_v6  ;;  %v864_v58 = vshll.u32 %v5415_v22, %v862_v61  ;;  %4677 = vset.pattern.permute.xlu0 %v4740_v12  ;;  %4678 = vset.pattern.permute.xlu1 %v4740_v12  ;;  %v1014_v22 = vld [vmem:[%s7700_s5 + $0x38] sm:$0xff]  ;;  %v1001_v6 = vld [vmem:[%s7699_s3 + $0x10] sm:$0xff] }
 0x1a0   :  { %1017 = vperm.xlu0 %4677, %v5442_v1   ;;  %v981_v17 = vsub.s32 4, %v5318_v0  ;;  %1027 = vperm.xlu1 %4678, %v5456_v59   ;;  %4714 = vcosq.f32 %v983_v32  ;;  %v877_v29 = vsub.s32 4, %v5398_v5  ;;  %vm793_vm9 = vcmp.lt.s32.totalorder %v4856_v52, 0  ;;  %v1006_v61 = vld [vmem:[%s7699_s3 + $0x38] sm:$0xff] }
 0x1a1   :  { %v865_v10 = vshrl.u32 %v847_v7, %v863_v55  ;;  %v868_v51 = vadd.s32 127, %v867_v60  ;;  %4471 = vmatprep.subr.bf16.mxu1 %v4470_v8  ;;  %4716 = vsinq.f32 %v983_v32  ;;  %vm792_vm3 = vcmp.le.f32.partialorder %v791_v47, 0.7853982  ;;  %v1005_v7 = vld [vmem:[%s7699_s3 + $0x30] sm:$0xff]  ;;  %4278 = vmatprep.mubr.msk.f32.mxu0 %vm1055_vm2, %v1185_v44 }
 0x1a2   :  { %4473 = vmatpush3.bf16.msra.mxu1 %v4470_v8  ;;  %v982_v21 = vsel %vm897_vm14, %v981_v17, %v5318_v0  ;;  %v878_v3 = vsel %vm793_vm9, %v877_v29, %v5398_v5  ;;  %vm987_vm13 = vweird.f32 %v4851_v46  ;;  %vm883_vm7 = vweird.f32 %v4856_v52  ;;  %v1002_v46 = vld [vmem:[%s7699_s3 + $0x18] sm:$0xff] }
 0x1a3   :  { %v866_v42 = vor.u32 %v865_v10, %v864_v58  ;;  %v869_v2 = vshll.u32 %v868_v51, 23  ;;  %v984_v62 = vsel %vm5446_vm1, 0, %v982_v21  ;;  %v880_v63 = vsel %vm792_vm3, 0, %v878_v3 }
 0x1a4   :  { %1022 = vperm.xlu0 %4677, %v5466_v23   ;;  %1032 = vperm.xlu1 %4678, %v5473_v45   ;;  %v988_v14 = vadd.s32 3, %v984_v62  ;;  %v884_v40 = vadd.s32 3, %v880_v63  ;;  %v4741_v9 = vmov 1   ;;  %vm7704_vm11 = vcmask 261120  }
 0x1a5   :  { %v870_v49 = vor.u32 4788187, %v869_v2  ;;  %v873_v28 = vcvt.s32.f32 %v866_v42 }
 0x1a6   :  { %v989_v53 = vand.u32 3, %v988_v14  ;;  %v885_v5 = vand.u32 3, %v884_v40 }
 0x1a7   :  { %v871_v11 = vand.u32 2147483647, %v870_v49 }
 0x1a8   :  { %1037 = vperm.xlu0 %4677, %v1011_v13   ;;  %1042 = vperm.xlu1 %4678, %v1012_v50   ;;  %vm991_vm4 = vcmp.eq.s32.totalorder %v989_v53, 0  ;;  %vm994_vm5 = vcmp.eq.s32.totalorder %v989_v53, 2  ;;  %vm990_vm8 = vcmp.lt.s32.totalorder %v989_v53, 2  ;;  %vm890_vm6 = vcmp.eq.s32.totalorder %v885_v5, 2 }
 0x1a9   :  { %v874_v25 = vmul.f32 %v873_v28, %v871_v11  ;;  %vm887_vm12 = vcmp.eq.s32.totalorder %v885_v5, 0  ;;  %vm886_vm14 = vcmp.lt.s32.totalorder %v885_v5, 2 }
 0x1aa   :  { %v4715_v26 = vpop.eup %4714 }
 0x1ab   :  { %v875_v34 = vxor.u32 2147483648, %v874_v25  ;;  %v4717_v39 = vpop.eup %4716  ;;  %v995_v16 = vxor.u32 2147483648, %v4715_v26 }
 0x1ac   :  { %1047 = vperm.xlu0 %4677, %v1013_v56   ;;  %1052 = vperm.xlu1 %4678, %v1014_v22   ;;  %v992_v47 = vxor.u32 2147483648, %v4717_v39 }
 0x1ad   :  { %v876_v0 = vsel %vm793_vm9, %v875_v34, %v874_v25  ;;  %v996_v41 = vsel %vm994_vm5, %v995_v16, %v4717_v39 }
 0x1ae   :  { %v879_v4 = vsel %vm792_vm3, %v4856_v52, %v876_v0  ;;  %v993_v19 = vsel %vm991_vm4, %v4715_v26, %v992_v47  ;;  %v1003_v52 = vld [vmem:[%s7699_s3 + $0x20] sm:$0xff] }
 0x1af   :  { %4718 = vcosq.f32 %v879_v4  ;;  %v997_v38 = vsel %vm990_vm8, %v993_v19, %v996_v41 }
 0x1b0   :  { %4720 = vsinq.f32 %v879_v4  ;;  %v998_v18 = vsel %vm987_vm13, nan, %v997_v38  ;;  %4680 = vset.pattern.permute.xlu1 %v4741_v9  ;;  %4679 = vset.pattern.permute.xlu0 %v4741_v9  ;;  %v1188_v38 = vld [vmem:[%s7699_s3 + $0x58] sm:$0xff] }
 0x1b1   :  { %1208 = vperm.xlu1 %4680, %v5466_v23   ;;  %1203 = vperm.xlu0 %4679, %v5442_v1  }
 0x1b5   :  { %1213 = vperm.xlu1 %4680, %v5456_v59   ;;  %1218 = vperm.xlu0 %4679, %v5473_v45  }
 0x1b9   :  { %v4719_v33 = vpop.eup %4718 }
 0x1ba   :  { %v4721_v57 = vpop.eup %4720  ;;  %v891_v27 = vxor.u32 2147483648, %v4719_v33 }
 0x1bb   :  { %v888_v48 = vxor.u32 2147483648, %v4721_v57 }
 0x1bc   :  { %v892_v54 = vsel %vm890_vm6, %v891_v27, %v4721_v57  ;;  %v1186_v57 = vld [vmem:[%s7699_s3 + $0x48] sm:$0xff]  ;;  %v1187_v27 = vld [vmem:[%s7699_s3 + $0x50] sm:$0xff] }
 0x1bd   :  { %v889_v43 = vsel %vm887_vm12, %v4719_v33, %v888_v48  ;;  %v1322_v48 = vld [vmem:[%s7701_s4] sm:$0xff] }
 0x1be   :  { %v893_v24 = vsel %vm886_vm14, %v889_v43, %v892_v54  ;;  %v4742_v54 = vmov 2  }
 0x1bf   :  { %v894_v37 = vsel %vm883_vm7, nan, %v893_v24  ;;  %4681 = vset.pattern.permute.xlu1 %v4742_v54  ;;  %4682 = vset.pattern.permute.xlu0 %v4742_v54 }
 0x1c0   :  { %v4474_v15 = vpack.c.bf16 %v998_v18, %v894_v37  ;;  %1526 = vperm.xlu1 %4681, %v5442_v1   ;;  %1530 = vperm.xlu0 %4682, %v5466_v23  }
 0x1c2   :  { %4475 = vmatprep.subr.bf16.mxu1 %v4474_v15 }
 0x1c3   :  { %4477 = vmatpush3.bf16.msra.mxu1 %v4474_v15 }
 0x1c4   :  { %1534 = vperm.xlu1 %4681, %v5456_v59  }
 0x1c6   :  { %4251 = vmatmul.mubr.msk.f32.vlgmr.msra.gmra.mrb[0].mxu1 %vm1055_vm2, %v1000_v20 }
 0x1c7   :  { %4253 = vmatprep.mubr.msk.f32.mxu1 %vm1055_vm2, %v1001_v6 }
 0x1c8   :  { %1538 = vperm.xlu1 %4681, %v5473_v45   ;;  %v1323_v45 = vld [vmem:[%s7701_s4 + $0x8] sm:$0xff] }
 0x1ca   :  { %4254 = vmatmul.mubr.msk.f32.gmra.mrb[2].mxu1 %vm1055_vm2, %v1002_v46 }
 0x1cb   :  { %4256 = vmatprep.mubr.msk.f32.mxu1 %vm1055_vm2, %v1003_v52 }
 0x1ce   :  { %4257 = vmatmul.mubr.msk.f32.gmra.mrb[4].mxu1 %vm1055_vm2, %v1004_v30 }
 0x1cf   :  { %4259 = vmatprep.mubr.msk.f32.mxu1 %vm1055_vm2, %v1005_v7 }
 0x1d2   :  { %4260 = vmatmul.mubr.msk.f32.gmra.mrb[6].mxu1 %vm1055_vm2, %v1006_v61 }
 0x21f   :  { %v1018_v36 = vpop.permute.xlu0 %1017  ;;  %v1028_v55 = vpop.permute.xlu1 %1027 }
 0x223   :  { %v1023_v60 = vpop.permute.xlu0 %1022  ;;  %v1033_v31 = vpop.permute.xlu1 %1032 }
 0x227   :  { %v1043_v11 = vpop.permute.xlu1 %1042  ;;  %v1038_v21 = vpop.permute.xlu0 %1037 }
 0x22b   :  { %v1053_v14 = vpop.permute.xlu1 %1052  ;;  %v1048_v63 = vpop.permute.xlu0 %1047 }
 0x230   :  { %v1204_v43 = vpop.permute.xlu0 %1203  ;;  %v1209_v18 = vpop.permute.xlu1 %1208 }
 0x234   :  { %v1219_v46 = vpop.permute.xlu0 %1218  ;;  %v1214_v7 = vpop.permute.xlu1 %1213 }
 0x299   :  { %v4252_v8 = vpop.f32.mrb[0].mxu1 }
 0x29a   :  { %v1152_v35 = vadd.f32 %v4252_v8, %v1023_v60  ;;  %v1146_v58 = vpop.f32.mrb[1].mxu1  ;;  %v1325_v60 = vld [vmem:[%s7701_s4 + $0x18] sm:$0xff]  ;;  %v1319_v8 = vld [vmem:[%s7699_s3 + $0x68] sm:$0xff] }
 0x29b   :  { %v1147_v10 = vadd.f32 %v1146_v58, %v1018_v36  ;;  %v1321_v58 = vld [vmem:[%s7699_s3 + $0x78] sm:$0xff] }
 0x29c   :  { %v1190_v51 = vmax.f32 %v1152_v35, 0.0 }
 0x29d   :  { %v1189_v32 = vmax.f32 %v1147_v10, 0.0  ;;  %v5538_v42 = vpack.c.bf16 %v1152_v35, %v1147_v10  ;;  %v4255_v2 = vpop.f32.mrb[2].mxu1  ;;  %v1320_v35 = vld [vmem:[%s7699_s3 + $0x70] sm:$0xff]  ;;  %v1548_v10 = vlaneseq }
 0x29e   :  { %v1162_v17 = vadd.f32 %v4255_v2, %v1033_v31  ;;  %v1156_v49 = vpop.f32.mrb[3].mxu1  ;;  %v1318_v31 = vld [vmem:[%s7699_s3 + $0x60] sm:$0xff] }
 0x29f   :  { %v1157_v28 = vadd.f32 %v1156_v49, %v1028_v55  ;;  %v4478_v13 = vpack.c.bf16 %v1190_v51, %v1189_v32  ;;  %v1324_v55 = vld [vmem:[%s7701_s4 + $0x10] sm:$0xff]  ;;  %v5601_v51 = vld [vmem:[%s7702_s1] sm:$0x1]  ;;  %v5603_v32 = vshrl.u32 %v1548_v10, 7 }
 0x2a0   :  { %v1192_v25 = vmax.f32 %v1162_v17, 0.0  ;;  %vm1569_vm15 = vcmp.eq.s32.totalorder %v5601_v51, 1  ;;  %vm1546_vm0 = vcmp.eq.s32.totalorder %v5601_v51, 0  ;;  %vm1592_vm10 = vcmp.eq.s32.totalorder %v5601_v51, 2 }
 0x2a1   :  { %v1191_v29 = vmax.f32 %v1157_v28, 0.0  ;;  %v5540_v50 = vpack.c.bf16 %v1162_v17, %v1157_v28  ;;  %v4258_v62 = vpop.f32.mrb[4].mxu1  ;;  %4479 = vmatprep.subr.bf16.mxu0 %v4478_v13  ;;  %7944 = vst [vmem:[#allocation2_spill] sm:$0xff] %v5603_v32  ;;  %v5608_v2 = vsub.s32 0, %v5603_v32  ;;  %v1570_v17 = vsel %vm1569_vm15, 1, %v4740_v12 }
 0x2a2   :  { %v1172_v34 = vadd.f32 %v4258_v62, %v1043_v11  ;;  %v1166_v56 = vpop.f32.mrb[5].mxu1  ;;  %4481 = vmatpush3.bf16.msra.mxu0 %v4478_v13  ;;  %v1547_v49 = vsel %vm1546_vm0, 1, %v4740_v12  ;;  %v7949_v62 = vmov 0  ;;  %vm1638_vm3 = vcmp.eq.s32.totalorder %v5601_v51, 4 }
 0x2a3   :  { %v1167_v0 = vadd.f32 %v1166_v56, %v1038_v21  ;;  %v4482_v3 = vpack.c.bf16 %v1192_v25, %v1191_v29  ;;  %7945 = vst [vmem:[#allocation3_spill] sm:$0xff] %v5608_v2  ;;  %v1574_v28 = vrot.slane %v1570_v17, %v5608_v2  ;;  %v1551_v13 = vrot.slane %v1547_v49, %v5608_v2  ;;  %v1531_v25 = vpop.permute.xlu0 %1530 }
 0x2a4   :  { %v1194_v22 = vmax.f32 %v1172_v34, 0.0  ;;  %v1593_v21 = vsel %vm1592_vm10, 1, %v4740_v12  ;;  %vm1661_vm5 = vcmp.eq.s32.totalorder %v5601_v51, 5  ;;  %vm1684_vm6 = vcmp.eq.s32.totalorder %v5601_v51, 6 }
 0x2a5   :  { %v1193_v4 = vmax.f32 %v1167_v0, 0.0  ;;  %v5542_v26 = vpack.c.bf16 %v1172_v34, %v1167_v0  ;;  %v4261_v39 = vpop.f32.mrb[6].mxu1  ;;  %4483 = vmatprep.subr.bf16.mxu0 %v4482_v3  ;;  %vm5617_vm1 = vcmp.eq.s32.totalorder %v1574_v28, 1  ;;  %vm5621_vm9 = vcmp.eq.s32.totalorder %v1551_v13, 1 }
 0x2a6   :  { %v1182_v53 = vadd.f32 %v4261_v39, %v1053_v14  ;;  %v1176_v40 = vpop.f32.mrb[7].mxu1  ;;  %4485 = vmatpush3.bf16.msra.mxu0 %v4482_v3  ;;  %v7950_v62 = vsel %vm5621_vm9, 4294967295, %v7949_v62  ;;  %v1597_v34 = vrot.slane %v1593_v21, %v5608_v2  ;;  %vm1707_vm13 = vcmp.eq.s32.totalorder %v5601_v51, 7 }
 0x2a7   :  { %v1177_v47 = vadd.f32 %v1176_v40, %v1048_v63  ;;  %v4486_v16 = vpack.c.bf16 %v1194_v22, %v1193_v4  ;;  %7951 = vst [vmem:[#allocation5_spill] sm:$0xff] %v7950_v62  ;;  %v7952_v63 = vmov 0  ;;  %vm1730_vm7 = vcmp.eq.s32.totalorder %v5601_v51, 8 }
 0x2a8   :  { %v1196_v5 = vmax.f32 %v1182_v53, 0.0  ;;  %vm5638_vm4 = vcmp.eq.s32.totalorder %v1597_v34, 1  ;;  %vm1753_vm0 = vcmp.eq.s32.totalorder %v5601_v51, 9 }
 0x2a9   :  { %v1195_v19 = vmax.f32 %v1177_v47, 0.0  ;;  %v4514_v41 = vpack.c.bf16 %v1182_v53, %v1177_v47  ;;  %4487 = vmatprep.subr.bf16.mxu0 %v4486_v16  ;;  %v7953_v63 = vsel %vm5638_vm4, 4294967295, %v7952_v63 }
 0x2aa   :  { %4489 = vmatpush3.bf16.msra.mxu0 %v4486_v16  ;;  %7954 = vst [vmem:[#allocation6_spill] sm:$0xff] %v7953_v63 }
 0x2ab   :  { %v4490_v33 = vpack.c.bf16 %v1196_v5, %v1195_v19  ;;  %v1639_v19 = vsel %vm1638_vm3, 1, %v4740_v12 }
 0x2ac   :  { %v1643_v54 = vrot.slane %v1639_v19, %v5608_v2 }
 0x2ad   :  { %4491 = vmatprep.subr.bf16.mxu0 %v4490_v33 }
 0x2ae   :  { %4493 = vmatpush3.bf16.msra.mxu0 %v4490_v33  ;;  %vm5680_vm12 = vcmp.eq.s32.totalorder %v1643_v54, 1 }
 0x2b1   :  { %4279 = vmatmul.mubr.msk.f32.vlgmr.msra.gmra.mrb[8].mxu0 %vm1055_vm2, %v1186_v57 }
 0x2b2   :  { %4281 = vmatprep.mubr.msk.f32.mxu0 %vm1055_vm2, %v1187_v27 }
 0x2b5   :  { %4282 = vmatmul.mubr.msk.f32.gmra.mrb[10].mxu0 %vm1055_vm2, %v1188_v38 }
 0x2b6   :  { %4292 = vmatprep.mubr.msk.f32.mxu0 %vm7704_vm11, %v1322_v48  ;;  %v7957_v48 = vmov 0 }
 0x384   :  { %v4280_v24 = vpop.f32.mrb[8].mxu0 }
 0x385   :  { %v1305_v37 = vadd.f32 %v4280_v24, %v1209_v18  ;;  %v1299_v15 = vpop.f32.mrb[9].mxu0  ;;  %v1662_v18 = vsel %vm1661_vm5, 1, %v4740_v12  ;;  %vm1799_vm5 = vcmp.eq.s32.totalorder %v5601_v51, 11 }
 0x386   :  { %v1300_v20 = vadd.f32 %v1299_v15, %v1204_v43  ;;  %v7961_v15 = vmov 0  ;;  %v1800_v13 = vsel %vm1799_vm5, 1, %v4740_v12  ;;  %vm1868_vm5 = vcmp.eq.s32.totalorder %v5601_v51, 14 }
 0x387   :  { %v1327_v6 = vmax.f32 %v1305_v37, 0.0  ;;  %v7962_v15 = vsel %vm5680_vm12, 4294967295, %v7961_v15  ;;  %v1804_v34 = vrot.slane %v1800_v13, %v5608_v2 }
 0x388   :  { %v1326_v52 = vmax.f32 %v1300_v20, 0.0  ;;  %v4283_v30 = vpop.f32.mrb[10].mxu0  ;;  %7963 = vst [vmem:[#allocation11_spill] sm:$0xff] %v7962_v15  ;;  %v1666_v20 = vrot.slane %v1662_v18, %v5608_v2 }
 0x389   :  { %v1315_v61 = vadd.f32 %v4283_v30, %v1219_v46  ;;  %v1309_v44 = vpop.f32.mrb[11].mxu0  ;;  %v7964_v30 = vmov 0 }
 0x38a   :  { %v4494_v1 = vpack.c.bf16 %v1327_v6, %v1326_v52  ;;  %v1310_v9 = vadd.f32 %v1309_v44, %v1214_v7  ;;  %v1685_v6 = vsel %vm1684_vm6, 1, %v4740_v12  ;;  %vm5693_vm14 = vcmp.eq.s32.totalorder %v1666_v20, 1 }
 0x38b   :  { %v1329_v23 = vmax.f32 %v1315_v61, 0.0  ;;  %v7965_v30 = vsel %vm5693_vm14, 4294967295, %v7964_v30  ;;  %v1689_v7 = vrot.slane %v1685_v6, %v5608_v2  ;;  %v1708_v61 = vsel %vm1707_vm13, 1, %v4740_v12 }
 0x38c   :  { %v1328_v36 = vmax.f32 %v1310_v9, 0.0  ;;  %4495 = vmatprep.subr.bf16.mxu0 %v4494_v1  ;;  %7966 = vst [vmem:[#allocation12_spill] sm:$0xff] %v7965_v30  ;;  %v7967_v9 = vmov 0  ;;  %vm1822_vm13 = vcmp.eq.s32.totalorder %v5601_v51, 12 }
 0x38d   :  { %4497 = vmatpush3.bf16.msra.mxu0 %v4494_v1  ;;  %vm5706_vm15 = vcmp.eq.s32.totalorder %v1689_v7, 1  ;;  %v7988_v7 = vmov 0 }
 0x38e   :  { %v4498_v59 = vpack.c.bf16 %v1329_v23, %v1328_v36  ;;  %v7968_v9 = vsel %vm5706_vm15, 4294967295, %v7967_v9  ;;  %v1712_v23 = vrot.slane %v1708_v61, %v5608_v2  ;;  %v1731_v36 = vsel %vm1730_vm7, 1, %v4740_v12 }
 0x38f   :  { %7969 = vst [vmem:[#allocation13_spill] sm:$0xff] %v7968_v9 }
 0x390   :  { %4499 = vmatprep.subr.bf16.mxu0 %v4498_v59  ;;  %vm5719_vm10 = vcmp.eq.s32.totalorder %v1712_v23, 1 }
 0x391   :  { %4501 = vmatpush3.bf16.msra.mxu0 %v4498_v59 }
 0x392   :  { %4503 = vmatprep.subr.bf16.mxu0 %v5538_v42 }
 0x394   :  { %4293 = vmatmul.mubr.msk.f32.vlgmr.msra.gmra.mrb[12].mxu0 %vm7704_vm11, %v1323_v45 }
 0x395   :  { %4505 = vmatpush3.bf16.msra.mxu0 %v5538_v42  ;;  %4295 = vmatprep.mubr.msk.f32.mxu0 %vm7704_vm11, %v1324_v55  ;;  %v1527_v42 = vpop.permute.xlu1 %1526  ;;  %v7970_v55 = vmov 0 }
 0x396   :  { %4507 = vmatprep.subr.bf16.mxu0 %v5540_v50  ;;  %v7971_v55 = vsel %vm5719_vm10, 4294967295, %v7970_v55 }
 0x397   :  { %7972 = vst [vmem:[#allocation14_spill] sm:$0xff] %v7971_v55 }
 0x398   :  { %4296 = vmatmul.mubr.msk.f32.gmra.mrb[14].mxu0 %vm7704_vm11, %v1325_v60  ;;  %v1735_v60 = vrot.slane %v1731_v36, %v5608_v2  ;;  %v7991_v36 = vmov 0 }
 0x399   :  { %4509 = vmatpush3.bf16.msra.mxu0 %v5540_v50  ;;  %4314 = vmatprep.mubr.msk.f32.mxu0 %vm1055_vm2, %v1318_v31  ;;  %v1535_v11 = vpop.permute.xlu1 %1534  ;;  %v7946_v50 = vmov 0  ;;  %v1754_v31 = vsel %vm1753_vm0, 1, %v4740_v12  ;;  %vm1845_vm0 = vcmp.eq.s32.totalorder %v5601_v51, 13 }
 0x39a   :  { %4511 = vmatprep.subr.bf16.mxu0 %v5542_v26  ;;  %v7947_v50 = vsel %vm5617_vm1, 4294967295, %v7946_v50  ;;  %vm5732_vm3 = vcmp.eq.s32.totalorder %v1735_v60, 1  ;;  %v1758_v10 = vrot.slane %v1754_v31, %v5608_v2 }
 0x39b   :  { %7948 = vst [vmem:[#allocation4_spill] sm:$0xff] %v7947_v50 }
 0x39c   :  { %vm5745_vm6 = vcmp.eq.s32.totalorder %v1758_v10, 1 }
 0x39d   :  { %4513 = vmatpush3.bf16.msra.mxu0 %v5542_v26  ;;  %v1539_v14 = vpop.permute.xlu1 %1538 }
 0x39e   :  { %4515 = vmatprep.subr.bf16.mxu0 %v4514_v41 }
 0x3a1   :  { %4517 = vmatpush3.bf16.msra.mxu0 %v4514_v41 }
 0x3a4   :  { %4315 = vmatmul.mubr.msk.f32.vlgmr.msra.gmra.mrb[12].mxu0 %vm1055_vm2, %v1319_v8 }
 0x3a5   :  { %4317 = vmatprep.mubr.msk.f32.mxu0 %vm1055_vm2, %v1320_v35 }
 0x3a8   :  { %4318 = vmatmul.mubr.msk.f32.gmra.mrb[14].mxu0 %vm1055_vm2, %v1321_v58  ;;  %vm1615_vm2 = vcmp.eq.s32.totalorder %v5601_v51, 3  ;;  %v7973_v58 = vmov 0 }
 0x3a9   :  { %v1616_v3 = vsel %vm1615_vm2, 1, %v4740_v12  ;;  %vm1776_vm2 = vcmp.eq.s32.totalorder %v5601_v51, 10  ;;  %v7974_v58 = vsel %vm5732_vm3, 4294967295, %v7973_v58 }
 0x3aa   :  { %v1620_v53 = vrot.slane %v1616_v3, %v5608_v2  ;;  %7975 = vst [vmem:[#allocation15_spill] sm:$0xff] %v7974_v58 }
 0x3ac   :  { %vm5663_vm8 = vcmp.eq.s32.totalorder %v1620_v53, 1 }
 0x3ad   :  { %v7958_v48 = vsel %vm5663_vm8, 4294967295, %v7957_v48 }
 0x3ae   :  { %7959 = vst [vmem:[#allocation9_spill] sm:$0xff] %v7958_v48 }
 0x477   :  { %v4316_v29 = vpop.f32.mrb[12].mxu0 }
 0x478   :  { %v5626_v56 = vadd.f32 %v4316_v29, %v1531_v25  ;;  %v1506_v0 = vpop.f32.mrb[13].mxu0  ;;  %v7979_v29 = vmov 0 }
 0x479   :  { %v5629_v22 = vadd.f32 %v1527_v42, %v1506_v0  ;;  %v1777_v42 = vsel %vm1776_vm2, 1, %v4740_v12  ;;  %v1823_v0 = vsel %vm1822_vm13, 1, %v4740_v12  ;;  %vm5771_vm2 = vcmp.eq.s32.totalorder %v1804_v34, 1 }
 0x47a   :  { %v1577_v4 = vsel %vm5617_vm1, %v5626_v56, -3.4028235e+38  ;;  %v1554_v26 = vsel %vm5621_vm9, %v5626_v56, -3.4028235e+38  ;;  %v2287_v41 = vmax.f32 %v5626_v56, 0.0  ;;  %v1781_v28 = vrot.slane %v1777_v42, %v5608_v2 }
 0x47b   :  { %1582 = vmax.xlane.f32.xlu0 %v1577_v4  ;;  %1559 = vmax.xlane.f32.xlu1 %v1554_v26  ;;  %v4319_v39 = vpop.f32.mrb[14].mxu0  ;;  %v2286_v40 = vmax.f32 %v5629_v22, 0.0  ;;  %v5646_v47 = vpack.c.bf16 %v5626_v56, %v5629_v22  ;;  %v1600_v57 = vsel %vm5638_vm4, %v5626_v56, -3.4028235e+38  ;;  %v1599_v27 = vsel %vm5638_vm4, %v5629_v22, -3.4028235e+38 }
 0x47c   :  { %v5648_v16 = vadd.f32 %v4319_v39, %v1539_v14  ;;  %v1516_v5 = vpop.f32.mrb[15].mxu0  ;;  %v1623_v24 = vsel %vm5663_vm8, %v5626_v56, -3.4028235e+38  ;;  %v1622_v37 = vsel %vm5663_vm8, %v5629_v22, -3.4028235e+38  ;;  %vm5758_vm7 = vcmp.eq.s32.totalorder %v1781_v28, 1 }
 0x47d   :  { %7955 = vst [vmem:[#allocation7_spill] sm:$0xff] %v5646_v47  ;;  %v5652_v33 = vadd.f32 %v1535_v11, %v1516_v5  ;;  %v5661_v38 = vpack.c.bf16 %v2287_v41, %v2286_v40  ;;  %v1646_v46 = vsel %vm5680_vm12, %v5626_v56, -3.4028235e+38  ;;  %v1645_v52 = vsel %vm5680_vm12, %v5629_v22, -3.4028235e+38 }
 0x47e   :  { %v1669_v44 = vsel %vm5693_vm14, %v5626_v56, -3.4028235e+38  ;;  %v1668_v1 = vsel %vm5693_vm14, %v5629_v22, -3.4028235e+38  ;;  %v1692_v59 = vsel %vm5706_vm15, %v5626_v56, -3.4028235e+38  ;;  %v1827_v26 = vrot.slane %v1823_v0, %v5608_v2 }
 0x47f   :  { %7956 = vst [vmem:[#allocation8_spill] sm:$0xff] %v5661_v38  ;;  %1605 = vmax.xlane.f32.xlu0 %v1600_v57  ;;  %1603 = vmax.xlane.f32.xlu1 %v1599_v27  ;;  %v5670_v43 = vpack.c.bf16 %v5648_v16, %v5652_v33  ;;  %v1691_v45 = vsel %vm5706_vm15, %v5629_v22, -3.4028235e+38  ;;  %v1715_v8 = vsel %vm5719_vm10, %v5626_v56, -3.4028235e+38  ;;  %v7976_v11 = vmov 0 }
 0x480   :  { %v1714_v35 = vsel %vm5719_vm10, %v5629_v22, -3.4028235e+38  ;;  %v1738_v17 = vsel %vm5732_vm3, %v5626_v56, -3.4028235e+38  ;;  %v1737_v49 = vsel %vm5732_vm3, %v5629_v22, -3.4028235e+38 }
 0x481   :  { %7960 = vst [vmem:[#allocation10_spill] sm:$0xff] %v5670_v43  ;;  %v7977_v11 = vsel %vm5745_vm6, 4294967295, %v7976_v11  ;;  %v1761_v21 = vsel %vm5745_vm6, %v5626_v56, -3.4028235e+38  ;;  %v1760_v25 = vsel %vm5745_vm6, %v5629_v22, -3.4028235e+38 }
 0x482   :  { %7978 = vst [vmem:[#allocation16_spill] sm:$0xff] %v7977_v11  ;;  %v7980_v29 = vsel %vm5758_vm7, 4294967295, %v7979_v29  ;;  %v1784_v3 = vsel %vm5758_vm7, %v5626_v56, -3.4028235e+38  ;;  %v1783_v14 = vsel %vm5758_vm7, %v5629_v22, -3.4028235e+38 }
 0x483   :  { %1628 = vmax.xlane.f32.xlu0 %v1623_v24  ;;  %1626 = vmax.xlane.f32.xlu1 %v1622_v37  ;;  %v7981_v4 = vmov 0  ;;  %v1846_v39 = vsel %vm1845_vm0, 1, %v4740_v12  ;;  %v1807_v53 = vsel %vm5771_vm2, %v5626_v56, -3.4028235e+38  ;;  %v1806_v40 = vsel %vm5771_vm2, %v5629_v22, -3.4028235e+38 }
 0x484   :  { %v7982_v4 = vsel %vm5771_vm2, 4294967295, %v7981_v4  ;;  %vm5784_vm13 = vcmp.eq.s32.totalorder %v1827_v26, 1  ;;  %v7983_v5 = vmov 0  ;;  %v1850_v19 = vrot.slane %v1846_v39, %v5608_v2 }
 0x485   :  { %v7984_v5 = vsel %vm5784_vm13, 4294967295, %v7983_v5  ;;  %v1869_v41 = vsel %vm1868_vm5, 1, %v4740_v12  ;;  %vm1891_vm0 = vcmp.eq.s32.totalorder %v5601_v51, 15  ;;  %v2288_v57 = vmax.f32 %v5652_v33, 0.0 }
 0x486   :  { %v2289_v27 = vmax.f32 %v5648_v16, 0.0  ;;  %v1830_v54 = vsel %vm5784_vm13, %v5626_v56, -3.4028235e+38  ;;  %v1829_v18 = vsel %vm5784_vm13, %v5629_v22, -3.4028235e+38  ;;  %vm5799_vm11 = vcmp.eq.s32.totalorder %v1850_v19, 1 }
 0x487   :  { %1651 = vmax.xlane.f32.xlu0 %v1646_v46  ;;  %1649 = vmax.xlane.f32.xlu1 %v1645_v52  ;;  %v7985_v24 = vmov 0  ;;  %v1873_v37 = vrot.slane %v1869_v41, %v5608_v2  ;;  %v1892_v6 = vsel %vm1891_vm0, 1, %v4740_v12  ;;  %vm1914_vm5 = vcmp.eq.s32.totalorder %v5601_v51, 16 }
 0x488   :  { %v7986_v24 = vsel %vm5799_vm11, 4294967295, %v7985_v24  ;;  %v5804_v20 = vpack.c.bf16 %v2289_v27, %v2288_v57  ;;  %v1853_v46 = vsel %vm5799_vm11, %v5626_v56, -3.4028235e+38  ;;  %v1852_v52 = vsel %vm5799_vm11, %v5629_v22, -3.4028235e+38 }
 0x489   :  { %vm5814_vm13 = vcmp.eq.s32.totalorder %v1873_v37, 1  ;;  %v1896_v61 = vrot.slane %v1892_v6, %v5608_v2  ;;  %vm1937_vm0 = vcmp.eq.s32.totalorder %v5601_v51, 17  ;;  %v8000_v34 = vmov 0 }
 0x48a   :  { %7987 = vst [vmem:[#allocation17_spill] sm:$0xff] %v5804_v20  ;;  %v7989_v7 = vsel %vm5814_vm13, 4294967295, %v7988_v7  ;;  %v1875_v23 = vsel %vm5814_vm13, %v5629_v22, -3.4028235e+38  ;;  %v8003_v39 = vmov 0  ;;  %v8006_v57 = vmov 0 }
 0x48b   :  { %1674 = vmax.xlane.f32.xlu0 %v1669_v44  ;;  %1672 = vmax.xlane.f32.xlu1 %v1668_v1  ;;  %7990 = vst [vmem:[#allocation18_spill] sm:$0xff] %v7989_v7  ;;  %v1915_v44 = vsel %vm1914_vm5, 1, %v4740_v12  ;;  %v1876_v1 = vsel %vm5814_vm13, %v5626_v56, -3.4028235e+38  ;;  %vm5827_vm11 = vcmp.eq.s32.totalorder %v1896_v61, 1  ;;  %vm1960_vm5 = vcmp.eq.s32.totalorder %v5601_v51, 18 }
 0x48c   :  { %v7992_v36 = vsel %vm5827_vm11, 4294967295, %v7991_v36  ;;  %v1899_v60 = vsel %vm5827_vm11, %v5626_v56, -3.4028235e+38  ;;  %v1898_v31 = vsel %vm5827_vm11, %v5629_v22, -3.4028235e+38  ;;  %v1961_v10 = vsel %vm1960_vm5, 1, %v4740_v12 }
 0x48d   :  { %7993 = vst [vmem:[#allocation19_spill] sm:$0xff] %v7992_v36  ;;  %v1965_v28 = vrot.slane %v1961_v10, %v5608_v2  ;;  %vm2006_vm5 = vcmp.eq.s32.totalorder %v5601_v51, 20  ;;  %v8009_v6 = vmov 0 }
 0x48f   :  { %1697 = vmax.xlane.f32.xlu0 %v1692_v59  ;;  %1695 = vmax.xlane.f32.xlu1 %v1691_v45  ;;  %v1919_v59 = vrot.slane %v1915_v44, %v5608_v2  ;;  %v1938_v45 = vsel %vm1937_vm0, 1, %v4740_v12  ;;  %vm1983_vm0 = vcmp.eq.s32.totalorder %v5601_v51, 19 }
 0x490   :  { %v1984_v13 = vsel %vm1983_vm0, 1, %v4740_v12  ;;  %vm2029_vm0 = vcmp.eq.s32.totalorder %v5601_v51, 21 }
 0x491   :  { %vm5840_vm13 = vcmp.eq.s32.totalorder %v1919_v59, 1  ;;  %v1988_v0 = vrot.slane %v1984_v13, %v5608_v2 }
 0x492   :  { %v1922_v42 = vsel %vm5840_vm13, %v5626_v56, -3.4028235e+38 }
 0x493   :  { %1720 = vmax.xlane.f32.xlu0 %v1715_v8  ;;  %1718 = vmax.xlane.f32.xlu1 %v1714_v35  ;;  %v7994_v8 = vmov 0  ;;  %v1942_v35 = vrot.slane %v1938_v45, %v5608_v2 }
 0x494   :  { %v7995_v8 = vsel %vm5840_vm13, 4294967295, %v7994_v8 }
 0x495   :  { %7996 = vst [vmem:[#allocation20_spill] sm:$0xff] %v7995_v8  ;;  %vm5853_vm11 = vcmp.eq.s32.totalorder %v1942_v35, 1 }
 0x497   :  { %1743 = vmax.xlane.f32.xlu0 %v1738_v17  ;;  %1741 = vmax.xlane.f32.xlu1 %v1737_v49  ;;  %v1921_v17 = vsel %vm5840_vm13, %v5629_v22, -3.4028235e+38  ;;  %v7997_v49 = vmov 0  ;;  %vm5866_vm13 = vcmp.eq.s32.totalorder %v1965_v28, 1  ;;  %v8018_v28 = vmov 0 }
 0x498   :  { %v7998_v49 = vsel %vm5853_vm11, 4294967295, %v7997_v49  ;;  %v8001_v34 = vsel %vm5866_vm13, 4294967295, %v8000_v34  ;;  %v1967_v26 = vsel %vm5866_vm13, %v5629_v22, -3.4028235e+38 }
 0x499   :  { %7999 = vst [vmem:[#allocation21_spill] sm:$0xff] %v7998_v49  ;;  %8002 = vst [vmem:[#allocation22_spill] sm:$0xff] %v8001_v34 }
 0x49b   :  { %1766 = vmax.xlane.f32.xlu0 %v1761_v21  ;;  %1764 = vmax.xlane.f32.xlu1 %v1760_v25  ;;  %v1945_v21 = vsel %vm5853_vm11, %v5626_v56, -3.4028235e+38  ;;  %v1944_v25 = vsel %vm5853_vm11, %v5629_v22, -3.4028235e+38  ;;  %vm5879_vm11 = vcmp.eq.s32.totalorder %v1988_v0, 1 }
 0x49c   :  { %v8004_v39 = vsel %vm5879_vm11, 4294967295, %v8003_v39  ;;  %v1991_v19 = vsel %vm5879_vm11, %v5626_v56, -3.4028235e+38  ;;  %v1990_v41 = vsel %vm5879_vm11, %v5629_v22, -3.4028235e+38 }
 0x49d   :  { %8005 = vst [vmem:[#allocation23_spill] sm:$0xff] %v8004_v39 }
 0x49f   :  { %1789 = vmax.xlane.f32.xlu0 %v1784_v3  ;;  %1787 = vmax.xlane.f32.xlu1 %v1783_v14  ;;  %v2007_v3 = vsel %vm2006_vm5, 1, %v4740_v12  ;;  %v1968_v14 = vsel %vm5866_vm13, %v5626_v56, -3.4028235e+38  ;;  %vm2052_vm5 = vcmp.eq.s32.totalorder %v5601_v51, 22 }
 0x4a3   :  { %1812 = vmax.xlane.f32.xlu0 %v1807_v53  ;;  %1810 = vmax.xlane.f32.xlu1 %v1806_v40  ;;  %v2011_v53 = vrot.slane %v2007_v3, %v5608_v2  ;;  %v2030_v40 = vsel %vm2029_vm0, 1, %v4740_v12  ;;  %vm2075_vm0 = vcmp.eq.s32.totalorder %v5601_v51, 23  ;;  %v8021_v3 = vmov 0 }
 0x4a4   :  { %v2034_v27 = vrot.slane %v2030_v40, %v5608_v2 }
 0x4a5   :  { %vm5892_vm13 = vcmp.eq.s32.totalorder %v2011_v53, 1 }
 0x4a6   :  { %v8007_v57 = vsel %vm5892_vm13, 4294967295, %v8006_v57  ;;  %v2013_v37 = vsel %vm5892_vm13, %v5629_v22, -3.4028235e+38  ;;  %vm5905_vm11 = vcmp.eq.s32.totalorder %v2034_v27, 1 }
 0x4a7   :  { %1835 = vmax.xlane.f32.xlu0 %v1830_v54  ;;  %1833 = vmax.xlane.f32.xlu1 %v1829_v18  ;;  %8008 = vst [vmem:[#allocation24_spill] sm:$0xff] %v8007_v57  ;;  %v2053_v54 = vsel %vm2052_vm5, 1, %v4740_v12  ;;  %v2014_v18 = vsel %vm5892_vm13, %v5626_v56, -3.4028235e+38  ;;  %v8010_v6 = vsel %vm5905_vm11, 4294967295, %v8009_v6  ;;  %vm2098_vm5 = vcmp.eq.s32.totalorder %v5601_v51, 24 }
 0x4a8   :  { %8011 = vst [vmem:[#allocation25_spill] sm:$0xff] %v8010_v6  ;;  %v2037_v61 = vsel %vm5905_vm11, %v5626_v56, -3.4028235e+38  ;;  %v2036_v44 = vsel %vm5905_vm11, %v5629_v22, -3.4028235e+38  ;;  %v2099_v59 = vsel %vm2098_vm5, 1, %v4740_v12 }
 0x4a9   :  { %v2103_v35 = vrot.slane %v2099_v59, %v5608_v2  ;;  %vm2144_vm5 = vcmp.eq.s32.totalorder %v5601_v51, 26 }
 0x4ab   :  { %1858 = vmax.xlane.f32.xlu0 %v1853_v46  ;;  %1856 = vmax.xlane.f32.xlu1 %v1852_v52  ;;  %v2057_v46 = vrot.slane %v2053_v54, %v5608_v2  ;;  %v2076_v52 = vsel %vm2075_vm0, 1, %v4740_v12  ;;  %vm2121_vm0 = vcmp.eq.s32.totalorder %v5601_v51, 25 }
 0x4ac   :  { %v2122_v10 = vsel %vm2121_vm0, 1, %v4740_v12  ;;  %vm2167_vm0 = vcmp.eq.s32.totalorder %v5601_v51, 27 }
 0x4ad   :  { %vm5918_vm13 = vcmp.eq.s32.totalorder %v2057_v46, 1  ;;  %v2126_v13 = vrot.slane %v2122_v10, %v5608_v2  ;;  %v8033_v10 = vmov 0 }
 0x4ae   :  { %v2060_v45 = vsel %vm5918_vm13, %v5626_v56, -3.4028235e+38 }
 0x4af   :  { %1881 = vmax.xlane.f32.xlu0 %v1876_v1  ;;  %1879 = vmax.xlane.f32.xlu1 %v1875_v23  ;;  %v8012_v1 = vmov 0  ;;  %v2080_v23 = vrot.slane %v2076_v52, %v5608_v2 }
 0x4b0   :  { %v8013_v1 = vsel %vm5918_vm13, 4294967295, %v8012_v1 }
 0x4b1   :  { %8014 = vst [vmem:[#allocation26_spill] sm:$0xff] %v8013_v1  ;;  %vm5931_vm11 = vcmp.eq.s32.totalorder %v2080_v23, 1  ;;  %v8030_v23 = vmov 0 }
 0x4b3   :  { %1904 = vmax.xlane.f32.xlu0 %v1899_v60  ;;  %1902 = vmax.xlane.f32.xlu1 %v1898_v31  ;;  %v2059_v60 = vsel %vm5918_vm13, %v5629_v22, -3.4028235e+38  ;;  %v8015_v31 = vmov 0  ;;  %vm5944_vm13 = vcmp.eq.s32.totalorder %v2103_v35, 1 }
 0x4b4   :  { %v8016_v31 = vsel %vm5931_vm11, 4294967295, %v8015_v31  ;;  %v8019_v28 = vsel %vm5944_vm13, 4294967295, %v8018_v28  ;;  %v2105_v0 = vsel %vm5944_vm13, %v5629_v22, -3.4028235e+38 }
 0x4b5   :  { %8017 = vst [vmem:[#allocation27_spill] sm:$0xff] %v8016_v31  ;;  %8020 = vst [vmem:[#allocation28_spill] sm:$0xff] %v8019_v28 }
 0x4b7   :  { %1927 = vmax.xlane.f32.xlu0 %v1922_v42  ;;  %1925 = vmax.xlane.f32.xlu1 %v1921_v17  ;;  %v2083_v42 = vsel %vm5931_vm11, %v5626_v56, -3.4028235e+38  ;;  %v2082_v17 = vsel %vm5931_vm11, %v5629_v22, -3.4028235e+38  ;;  %vm5957_vm11 = vcmp.eq.s32.totalorder %v2126_v13, 1 }
 0x4b8   :  { %v8022_v3 = vsel %vm5957_vm11, 4294967295, %v8021_v3  ;;  %v2129_v53 = vsel %vm5957_vm11, %v5626_v56, -3.4028235e+38  ;;  %v2128_v40 = vsel %vm5957_vm11, %v5629_v22, -3.4028235e+38 }
 0x4b9   :  { %8023 = vst [vmem:[#allocation29_spill] sm:$0xff] %v8022_v3 }
 0x4bb   :  { %1950 = vmax.xlane.f32.xlu0 %v1945_v21  ;;  %1948 = vmax.xlane.f32.xlu1 %v1944_v25  ;;  %v2145_v21 = vsel %vm2144_vm5, 1, %v4740_v12  ;;  %v2106_v25 = vsel %vm5944_vm13, %v5626_v56, -3.4028235e+38  ;;  %vm2190_vm5 = vcmp.eq.s32.totalorder %v5601_v51, 28 }
 0x4bc   :  { %v2191_v27 = vsel %vm2190_vm5, 1, %v4740_v12  ;;  %vm2236_vm5 = vcmp.eq.s32.totalorder %v5601_v51, 30 }
 0x4bd   :  { %v2195_v46 = vrot.slane %v2191_v27, %v5608_v2  ;;  %v1578_v27 = vsel %vm5617_vm1, %v5652_v33, -3.4028235e+38 }
 0x4bf   :  { %1973 = vmax.xlane.f32.xlu0 %v1968_v14  ;;  %1971 = vmax.xlane.f32.xlu1 %v1967_v26  ;;  %v2149_v14 = vrot.slane %v2145_v21, %v5608_v2  ;;  %v2168_v26 = vsel %vm2167_vm0, 1, %v4740_v12  ;;  %vm2213_vm0 = vcmp.eq.s32.totalorder %v5601_v51, 29  ;;  %v8036_v21 = vmov 0 }
 0x4c0   :  { %v2214_v52 = vsel %vm2213_vm0, 1, %v4740_v12  ;;  %vm2259_vm0 = vcmp.eq.s32.totalorder %v5601_v51, 31 }
 0x4c1   :  { %vm5970_vm13 = vcmp.eq.s32.totalorder %v2149_v14, 1  ;;  %v2218_v59 = vrot.slane %v2214_v52, %v5608_v2  ;;  %v8039_v14 = vmov 0  ;;  %v1602_v52 = vsel %vm5638_vm4, %v5648_v16, -3.4028235e+38 }
 0x4c2   :  { %v2152_v54 = vsel %vm5970_vm13, %v5626_v56, -3.4028235e+38 }
 0x4c3   :  { %1996 = vmax.xlane.f32.xlu0 %v1991_v19  ;;  %1994 = vmax.xlane.f32.xlu1 %v1990_v41  ;;  %v8024_v19 = vmov 0  ;;  %v2172_v41 = vrot.slane %v2168_v26, %v5608_v2 }
 0x4c4   :  { %v8025_v19 = vsel %vm5970_vm13, 4294967295, %v8024_v19 }
 0x4c5   :  { %8026 = vst [vmem:[#allocation30_spill] sm:$0xff] %v8025_v19  ;;  %vm5983_vm11 = vcmp.eq.s32.totalorder %v2172_v41, 1  ;;  %v1555_v41 = vsel %vm5621_vm9, %v5652_v33, -3.4028235e+38 }
 0x4c7   :  { %2019 = vmax.xlane.f32.xlu0 %v2014_v18  ;;  %2017 = vmax.xlane.f32.xlu1 %v2013_v37  ;;  %v2151_v18 = vsel %vm5970_vm13, %v5629_v22, -3.4028235e+38  ;;  %v8027_v37 = vmov 0  ;;  %vm5996_vm13 = vcmp.eq.s32.totalorder %v2195_v46, 1  ;;  %v1624_v46 = vsel %vm5663_vm8, %v5652_v33, -3.4028235e+38 }
 0x4c8   :  { %v8028_v37 = vsel %vm5983_vm11, 4294967295, %v8027_v37  ;;  %v8031_v23 = vsel %vm5996_vm13, 4294967295, %v8030_v23  ;;  %v2197_v35 = vsel %vm5996_vm13, %v5629_v22, -3.4028235e+38 }
 0x4c9   :  { %8029 = vst [vmem:[#allocation31_spill] sm:$0xff] %v8028_v37  ;;  %8032 = vst [vmem:[#allocation32_spill] sm:$0xff] %v8031_v23 }
 0x4cb   :  { %2042 = vmax.xlane.f32.xlu0 %v2037_v61  ;;  %2040 = vmax.xlane.f32.xlu1 %v2036_v44  ;;  %v2175_v61 = vsel %vm5983_vm11, %v5626_v56, -3.4028235e+38  ;;  %v2174_v44 = vsel %vm5983_vm11, %v5629_v22, -3.4028235e+38  ;;  %vm6009_vm11 = vcmp.eq.s32.totalorder %v2218_v59, 1 }
 0x4cc   :  { %v8034_v10 = vsel %vm6009_vm11, 4294967295, %v8033_v10  ;;  %v2221_v51 = vsel %vm6009_vm11, %v5626_v56, -3.4028235e+38  ;;  %v2220_v13 = vsel %vm6009_vm11, %v5629_v22, -3.4028235e+38 }
 0x4cd   :  { %8035 = vst [vmem:[#allocation33_spill] sm:$0xff] %v8034_v10 }
 0x4cf   :  { %2065 = vmax.xlane.f32.xlu0 %v2060_v45  ;;  %2063 = vmax.xlane.f32.xlu1 %v2059_v60  ;;  %v2237_v45 = vsel %vm2236_vm5, 1, %v4740_v12  ;;  %v2198_v60 = vsel %vm5996_vm13, %v5626_v56, -3.4028235e+38 }
 0x4d3   :  { %2088 = vmax.xlane.f32.xlu0 %v2083_v42  ;;  %2086 = vmax.xlane.f32.xlu1 %v2082_v17  ;;  %v2241_v42 = vrot.slane %v2237_v45, %v5608_v2  ;;  %v2260_v17 = vsel %vm2259_vm0, 1, %v4740_v12 }
 0x4d5   :  { %vm6021_vm5 = vcmp.eq.s32.totalorder %v2241_v42, 1  ;;  %v1670_v42 = vsel %vm5693_vm14, %v5652_v33, -3.4028235e+38 }
 0x4d6   :  { %v8037_v21 = vsel %vm6021_vm5, 4294967295, %v8036_v21  ;;  %v2244_v12 = vsel %vm6021_vm5, %v5626_v56, -3.4028235e+38 }
 0x4d7   :  { %2111 = vmax.xlane.f32.xlu0 %v2106_v25  ;;  %2109 = vmax.xlane.f32.xlu1 %v2105_v0  ;;  %8038 = vst [vmem:[#allocation34_spill] sm:$0xff] %v8037_v21  ;;  %v2264_v25 = vrot.slane %v2260_v17, %v5608_v2  ;;  %v2243_v0 = vsel %vm6021_vm5, %v5629_v22, -3.4028235e+38 }
 0x4d9   :  { %vm6032_vm0 = vcmp.eq.s32.totalorder %v2264_v25, 1  ;;  %v1648_v25 = vsel %vm5680_vm12, %v5648_v16, -3.4028235e+38 }
 0x4da   :  { %v8040_v14 = vsel %vm6032_vm0, 4294967295, %v8039_v14  ;;  %v2267_v26 = vsel %vm6032_vm0, %v5626_v56, -3.4028235e+38  ;;  %v1576_v56 = vsel %vm5617_vm1, %v5629_v22, -3.4028235e+38 }
 0x4db   :  { %2134 = vmax.xlane.f32.xlu0 %v2129_v53  ;;  %2132 = vmax.xlane.f32.xlu1 %v2128_v40  ;;  %8041 = vst [vmem:[#allocation35_spill] sm:$0xff] %v8040_v14  ;;  %v2266_v53 = vsel %vm6032_vm0, %v5629_v22, -3.4028235e+38  ;;  %v1553_v40 = vsel %vm5621_vm9, %v5629_v22, -3.4028235e+38 }
 0x4dc   :  { %v1579_v22 = vsel %vm5617_vm1, %v5648_v16, -3.4028235e+38  ;;  %v2269_v10 = vsel %vm6032_vm0, %v5648_v16, -3.4028235e+38 }
 0x4df   :  { %2157 = vmax.xlane.f32.xlu0 %v2152_v54  ;;  %2155 = vmax.xlane.f32.xlu1 %v2151_v18  ;;  %v1556_v54 = vsel %vm5621_vm9, %v5648_v16, -3.4028235e+38  ;;  %v1601_v18 = vsel %vm5638_vm4, %v5652_v33, -3.4028235e+38 }
 0x4e3   :  { %2180 = vmax.xlane.f32.xlu0 %v2175_v61  ;;  %2178 = vmax.xlane.f32.xlu1 %v2174_v44  ;;  %v1647_v61 = vsel %vm5680_vm12, %v5652_v33, -3.4028235e+38 }
 0x4e7   :  { %2203 = vmax.xlane.f32.xlu0 %v2198_v60  ;;  %2201 = vmax.xlane.f32.xlu1 %v2197_v35  ;;  %v1625_v35 = vsel %vm5663_vm8, %v5648_v16, -3.4028235e+38 }
 0x4eb   :  { %2226 = vmax.xlane.f32.xlu0 %v2221_v51  ;;  %2224 = vmax.xlane.f32.xlu1 %v2220_v13 }
 0x4ef   :  { %2249 = vmax.xlane.f32.xlu0 %v2244_v12  ;;  %2247 = vmax.xlane.f32.xlu1 %v2243_v0  ;;  %v1693_v12 = vsel %vm5706_vm15, %v5652_v33, -3.4028235e+38 }
 0x4f3   :  { %2272 = vmax.xlane.f32.xlu0 %v2267_v26  ;;  %2270 = vmax.xlane.f32.xlu1 %v2266_v53 }
 0x4f7   :  { %1557 = vmax.xlane.f32.xlu0 %v1553_v40  ;;  %1561 = vmax.xlane.f32.xlu1 %v1555_v41  ;;  %v1671_v40 = vsel %vm5693_vm14, %v5648_v16, -3.4028235e+38  ;;  %v1716_v41 = vsel %vm5719_vm10, %v5652_v33, -3.4028235e+38 }
 0x4fb   :  { %1580 = vmax.xlane.f32.xlu0 %v1576_v56  ;;  %1584 = vmax.xlane.f32.xlu1 %v1578_v27 }
 0x4ff   :  { %1563 = vmax.xlane.f32.xlu0 %v1556_v54  ;;  %1607 = vmax.xlane.f32.xlu1 %v1601_v18  ;;  %v1694_v18 = vsel %vm5706_vm15, %v5648_v16, -3.4028235e+38 }
 0x503   :  { %1586 = vmax.xlane.f32.xlu0 %v1579_v22  ;;  %1630 = vmax.xlane.f32.xlu1 %v1624_v46  ;;  %v1739_v22 = vsel %vm5732_vm3, %v5652_v33, -3.4028235e+38 }
 0x507   :  { %1609 = vmax.xlane.f32.xlu0 %v1602_v52  ;;  %1653 = vmax.xlane.f32.xlu1 %v1647_v61 }
 0x508   :  { %v1583_v44 = vpop.xlane.xlu0 %1582  ;;  %v1560_v59 = vpop.xlane.xlu1 %1559 }
 0x509   :  { %v1566_v45 = vsel %vm5621_vm9, %v1560_v59, 0.0  ;;  %v1762_v59 = vsel %vm5745_vm6, %v5652_v33, -3.4028235e+38 }
 0x50a   :  { %v1589_v60 = vsel %vm5617_vm1, %v1583_v44, %v1566_v45  ;;  %v1717_v44 = vsel %vm5719_vm10, %v5648_v16, -3.4028235e+38 }
 0x50b   :  { %1632 = vmax.xlane.f32.xlu0 %v1625_v35  ;;  %1676 = vmax.xlane.f32.xlu1 %v1670_v42  ;;  %v1740_v42 = vsel %vm5732_vm3, %v5648_v16, -3.4028235e+38 }
 0x50c   :  { %v1606_v17 = vpop.xlane.xlu0 %1605  ;;  %v6082_v51 = vpop.xlane.xlu1 %1603 }
 0x50d   :  { %v1612_v13 = vsel %vm5638_vm4, %v1606_v17, %v1589_v60  ;;  %v1785_v17 = vsel %vm5758_vm7, %v5652_v33, -3.4028235e+38 }
 0x50f   :  { %1655 = vmax.xlane.f32.xlu0 %v1648_v25  ;;  %1699 = vmax.xlane.f32.xlu1 %v1693_v12 }
 0x510   :  { %v1629_v0 = vpop.xlane.xlu0 %1628  ;;  %v6092_v26 = vpop.xlane.xlu1 %1626 }
 0x511   :  { %v1635_v53 = vsel %vm5663_vm8, %v1629_v0, %v1612_v13  ;;  %v1763_v0 = vsel %vm5745_vm6, %v5648_v16, -3.4028235e+38 }
 0x513   :  { %1678 = vmax.xlane.f32.xlu0 %v1671_v40  ;;  %1722 = vmax.xlane.f32.xlu1 %v1716_v41 }
 0x514   :  { %v1652_v56 = vpop.xlane.xlu0 %1651  ;;  %v6102_v27 = vpop.xlane.xlu1 %1649 }
 0x515   :  { %v1658_v54 = vsel %vm5680_vm12, %v1652_v56, %v1635_v53  ;;  %v1808_v53 = vsel %vm5771_vm2, %v5652_v33, -3.4028235e+38 }
 0x517   :  { %1701 = vmax.xlane.f32.xlu0 %v1694_v18  ;;  %1745 = vmax.xlane.f32.xlu1 %v1739_v22 }
 0x518   :  { %v1675_v46 = vpop.xlane.xlu0 %1674  ;;  %v6112_v52 = vpop.xlane.xlu1 %1672 }
 0x519   :  { %v1681_v61 = vsel %vm5693_vm14, %v1675_v46, %v1658_v54  ;;  %v1786_v54 = vsel %vm5758_vm7, %v5648_v16, -3.4028235e+38 }
 0x51b   :  { %1724 = vmax.xlane.f32.xlu0 %v1717_v44  ;;  %1768 = vmax.xlane.f32.xlu1 %v1762_v59  ;;  %v1809_v44 = vsel %vm5771_vm2, %v5648_v16, -3.4028235e+38 }
 0x51c   :  { %v1698_v45 = vpop.xlane.xlu0 %1697  ;;  %v6122_v60 = vpop.xlane.xlu1 %1695 }
 0x51d   :  { %v1704_v35 = vsel %vm5706_vm15, %v1698_v45, %v1681_v61 }
 0x51f   :  { %1747 = vmax.xlane.f32.xlu0 %v1740_v42  ;;  %1791 = vmax.xlane.f32.xlu1 %v1785_v17 }
 0x520   :  { %v1721_v13 = vpop.xlane.xlu0 %1720  ;;  %v6132_v25 = vpop.xlane.xlu1 %1718 }
 0x521   :  { %v1727_v12 = vsel %vm5719_vm10, %v1721_v13, %v1704_v35  ;;  %vm8042_vm10 = vnez %v7984_v5 }
 0x522   :  { %v1831_v18 = vsel %vm8042_vm10, %v5652_v33, -3.4028235e+38  ;;  %v1832_v17 = vsel %vm8042_vm10, %v5648_v16, -3.4028235e+38 }
 0x523   :  { %1770 = vmax.xlane.f32.xlu0 %v1763_v0  ;;  %1814 = vmax.xlane.f32.xlu1 %v1808_v53 }
 0x524   :  { %v1744_v40 = vpop.xlane.xlu0 %1743  ;;  %v6142_v41 = vpop.xlane.xlu1 %1741 }
 0x525   :  { %v1750_v56 = vsel %vm5732_vm3, %v1744_v40, %v1727_v12  ;;  %vm8043_vm3 = vnez %v7986_v24 }
 0x526   :  { %v1854_v59 = vsel %vm8043_vm3, %v5652_v33, -3.4028235e+38  ;;  %v1855_v40 = vsel %vm8043_vm3, %v5648_v16, -3.4028235e+38 }
 0x527   :  { %1793 = vmax.xlane.f32.xlu0 %v1786_v54  ;;  %1837 = vmax.xlane.f32.xlu1 %v1831_v18 }
 0x528   :  { %v1767_v22 = vpop.xlane.xlu0 %1766  ;;  %v6152_v46 = vpop.xlane.xlu1 %1764 }
 0x529   :  { %v1773_v61 = vsel %vm5745_vm6, %v1767_v22, %v1750_v56  ;;  %vm8044_vm6 = vnez %v7989_v7 }
 0x52a   :  { %v1877_v13 = vsel %vm8044_vm6, %v5652_v33, -3.4028235e+38 }
 0x52b   :  { %1816 = vmax.xlane.f32.xlu0 %v1809_v44  ;;  %1860 = vmax.xlane.f32.xlu1 %v1854_v59 }
 0x52c   :  { %v1790_v45 = vpop.xlane.xlu0 %1789  ;;  %v6162_v35 = vpop.xlane.xlu1 %1787 }
 0x52d   :  { %v1796_v42 = vsel %vm5758_vm7, %v1790_v45, %v1773_v61  ;;  %vm8045_vm7 = vnez %v7992_v36  ;;  %v1878_v61 = vsel %vm8044_vm6, %v5648_v16, -3.4028235e+38 }
 0x52e   :  { %v1900_v56 = vsel %vm8045_vm7, %v5652_v33, -3.4028235e+38 }
 0x52f   :  { %1839 = vmax.xlane.f32.xlu0 %v1832_v17  ;;  %1883 = vmax.xlane.f32.xlu1 %v1877_v13  ;;  %v1901_v17 = vsel %vm8045_vm7, %v5648_v16, -3.4028235e+38 }
 0x530   :  { %v1813_v12 = vpop.xlane.xlu0 %1812  ;;  %v6172_v0 = vpop.xlane.xlu1 %1810 }
 0x531   :  { %v1819_v53 = vsel %vm5771_vm2, %v1813_v12, %v1796_v42  ;;  %vm8046_vm2 = vnez %v7995_v8 }
 0x532   :  { %v1923_v44 = vsel %vm8046_vm2, %v5652_v33, -3.4028235e+38 }
 0x533   :  { %1862 = vmax.xlane.f32.xlu0 %v1855_v40  ;;  %1906 = vmax.xlane.f32.xlu1 %v1900_v56  ;;  %v1924_v56 = vsel %vm8046_vm2, %v5648_v16, -3.4028235e+38 }
 0x534   :  { %v1836_v54 = vpop.xlane.xlu0 %1835  ;;  %v6182_v18 = vpop.xlane.xlu1 %1833 }
 0x535   :  { %v1842_v22 = vsel %vm8042_vm10, %v1836_v54, %v1819_v53  ;;  %vm8047_vm10 = vnez %v7998_v49 }
 0x536   :  { %v1946_v13 = vsel %vm8047_vm10, %v5652_v33, -3.4028235e+38 }
 0x537   :  { %1885 = vmax.xlane.f32.xlu0 %v1878_v61  ;;  %1929 = vmax.xlane.f32.xlu1 %v1923_v44 }
 0x538   :  { %v1859_v59 = vpop.xlane.xlu0 %1858  ;;  %v6192_v45 = vpop.xlane.xlu1 %1856 }
 0x539   :  { %v1865_v42 = vsel %vm8043_vm3, %v1859_v59, %v1842_v22  ;;  %vm8048_vm3 = vnez %v8001_v34  ;;  %v1947_v59 = vsel %vm8047_vm10, %v5648_v16, -3.4028235e+38  ;;  %vm8051_vm10 = vnez %v8010_v6 }
 0x53a   :  { %v1969_v54 = vsel %vm8048_vm3, %v5652_v33, -3.4028235e+38 }
 0x53b   :  { %1908 = vmax.xlane.f32.xlu0 %v1901_v17  ;;  %1952 = vmax.xlane.f32.xlu1 %v1946_v13 }
 0x53c   :  { %v1882_v12 = vpop.xlane.xlu0 %1881  ;;  %v6202_v53 = vpop.xlane.xlu1 %1879 }
 0x53d   :  { %v1888_v40 = vsel %vm8044_vm6, %v1882_v12, %v1865_v42  ;;  %vm8049_vm6 = vnez %v8004_v39 }
 0x53e   :  { %v1992_v42 = vsel %vm8049_vm6, %v5652_v33, -3.4028235e+38 }
 0x53f   :  { %1931 = vmax.xlane.f32.xlu0 %v1924_v56  ;;  %1975 = vmax.xlane.f32.xlu1 %v1969_v54 }
 0x540   :  { %v1905_v22 = vpop.xlane.xlu0 %1904  ;;  %v6212_v61 = vpop.xlane.xlu1 %1902 }
 0x541   :  { %v6216_v44 = vsel %vm8045_vm7, %v1905_v22, %v1888_v40  ;;  %v1970_v40 = vsel %vm8048_vm3, %v5648_v16, -3.4028235e+38  ;;  %vm8050_vm7 = vnez %v8007_v57  ;;  %vm8052_vm3 = vnez %v8013_v1 }
 0x542   :  { %v2015_v56 = vsel %vm8050_vm7, %v5652_v33, -3.4028235e+38 }
 0x543   :  { %1954 = vmax.xlane.f32.xlu0 %v1947_v59  ;;  %1998 = vmax.xlane.f32.xlu1 %v1992_v42  ;;  %v1993_v59 = vsel %vm8049_vm6, %v5648_v16, -3.4028235e+38  ;;  %v2038_v42 = vsel %vm8051_vm10, %v5652_v33, -3.4028235e+38  ;;  %vm8054_vm6 = vnez %v8016_v31 }
 0x544   :  { %v6224_v17 = vpop.xlane.xlu0 %1927  ;;  %v6226_v13 = vpop.xlane.xlu1 %1925 }
 0x547   :  { %1977 = vmax.xlane.f32.xlu0 %v1970_v40  ;;  %2021 = vmax.xlane.f32.xlu1 %v2015_v56  ;;  %v2016_v40 = vsel %vm8050_vm7, %v5648_v16, -3.4028235e+38  ;;  %v2061_v56 = vsel %vm8052_vm3, %v5652_v33, -3.4028235e+38  ;;  %vm8056_vm7 = vnez %v8019_v28 }
 0x548   :  { %v6238_v54 = vpop.xlane.xlu0 %1950  ;;  %v6240_v22 = vpop.xlane.xlu1 %1948 }
 0x54b   :  { %2000 = vmax.xlane.f32.xlu0 %v1993_v59  ;;  %2044 = vmax.xlane.f32.xlu1 %v2038_v42  ;;  %v2039_v59 = vsel %vm8051_vm10, %v5648_v16, -3.4028235e+38  ;;  %v2084_v42 = vsel %vm8054_vm6, %v5652_v33, -3.4028235e+38  ;;  %vm8058_vm10 = vnez %v8022_v3 }
 0x54c   :  { %v6248_v12 = vpop.xlane.xlu0 %1973  ;;  %v6250_v2 = vpop.xlane.xlu1 %1971 }
 0x54f   :  { %2023 = vmax.xlane.f32.xlu0 %v2016_v40  ;;  %2067 = vmax.xlane.f32.xlu1 %v2061_v56  ;;  %v2062_v40 = vsel %vm8052_vm3, %v5648_v16, -3.4028235e+38  ;;  %v2107_v56 = vsel %vm8056_vm7, %v5652_v33, -3.4028235e+38  ;;  %vm8060_vm3 = vnez %v8025_v19 }
 0x550   :  { %v6258_v32 = vpop.xlane.xlu0 %1996  ;;  %v6260_v43 = vpop.xlane.xlu1 %1994 }
 0x551   :  { %8053 = vst [vmem:[#allocation36_spill] sm:$0xff] %v6260_v43 }
 0x553   :  { %2046 = vmax.xlane.f32.xlu0 %v2039_v59  ;;  %2090 = vmax.xlane.f32.xlu1 %v2084_v42  ;;  %v2085_v59 = vsel %vm8054_vm6, %v5648_v16, -3.4028235e+38  ;;  %v2130_v42 = vsel %vm8058_vm10, %v5652_v33, -3.4028235e+38  ;;  %vm8062_vm6 = vnez %v8028_v37 }
 0x554   :  { %v6268_v47 = vpop.xlane.xlu0 %2019  ;;  %v6270_v20 = vpop.xlane.xlu1 %2017 }
 0x555   :  { %8055 = vst [vmem:[#allocation37_spill] sm:$0xff] %v6270_v20 }
 0x557   :  { %2069 = vmax.xlane.f32.xlu0 %v2062_v40  ;;  %2113 = vmax.xlane.f32.xlu1 %v2107_v56  ;;  %v2108_v40 = vsel %vm8056_vm7, %v5648_v16, -3.4028235e+38  ;;  %v2153_v56 = vsel %vm8060_vm3, %v5652_v33, -3.4028235e+38 }
 0x558   :  { %v6278_v38 = vpop.xlane.xlu0 %2042  ;;  %v6280_v43 = vpop.xlane.xlu1 %2040 }
 0x559   :  { %8057 = vst [vmem:[#allocation38_spill] sm:$0xff] %v6280_v43 }
 0x55b   :  { %2092 = vmax.xlane.f32.xlu0 %v2085_v59  ;;  %2136 = vmax.xlane.f32.xlu1 %v2130_v42  ;;  %v2131_v59 = vsel %vm8058_vm10, %v5648_v16, -3.4028235e+38  ;;  %v2176_v42 = vsel %vm8062_vm6, %v5652_v33, -3.4028235e+38 }
 0x55c   :  { %v6288_v20 = vpop.xlane.xlu0 %2065  ;;  %v6290_v1 = vpop.xlane.xlu1 %2063 }
 0x55d   :  { %8059 = vst [vmem:[#allocation39_spill] sm:$0xff] %v6290_v1 }
 0x55f   :  { %2115 = vmax.xlane.f32.xlu0 %v2108_v40  ;;  %2159 = vmax.xlane.f32.xlu1 %v2153_v56  ;;  %v2154_v40 = vsel %vm8060_vm3, %v5648_v16, -3.4028235e+38  ;;  %v2199_v56 = vsel %vm5996_vm13, %v5652_v33, -3.4028235e+38 }
 0x560   :  { %v6298_v43 = vpop.xlane.xlu0 %2088  ;;  %v6300_v31 = vpop.xlane.xlu1 %2086 }
 0x561   :  { %8061 = vst [vmem:[#allocation40_spill] sm:$0xff] %v6300_v31 }
 0x563   :  { %2138 = vmax.xlane.f32.xlu0 %v2131_v59  ;;  %2182 = vmax.xlane.f32.xlu1 %v2176_v42  ;;  %v2177_v59 = vsel %vm8062_vm6, %v5648_v16, -3.4028235e+38  ;;  %v2222_v42 = vsel %vm6009_vm11, %v5652_v33, -3.4028235e+38 }
 0x564   :  { %v6308_v1 = vpop.xlane.xlu0 %2111  ;;  %v6310_v28 = vpop.xlane.xlu1 %2109 }
 0x565   :  { %8063 = vst [vmem:[#allocation41_spill] sm:$0xff] %v6310_v28 }
 0x567   :  { %2161 = vmax.xlane.f32.xlu0 %v2154_v40  ;;  %2205 = vmax.xlane.f32.xlu1 %v2199_v56  ;;  %v2200_v40 = vsel %vm5996_vm13, %v5648_v16, -3.4028235e+38  ;;  %v2245_v56 = vsel %vm6021_vm5, %v5652_v33, -3.4028235e+38 }
 0x568   :  { %v6318_v31 = vpop.xlane.xlu0 %2134  ;;  %v6320_v3 = vpop.xlane.xlu1 %2132 }
 0x569   :  { %8064 = vst [vmem:[#allocation42_spill] sm:$0xff] %v6320_v3 }
 0x56b   :  { %2184 = vmax.xlane.f32.xlu0 %v2177_v59  ;;  %2228 = vmax.xlane.f32.xlu1 %v2222_v42  ;;  %v2223_v59 = vsel %vm6009_vm11, %v5648_v16, -3.4028235e+38  ;;  %v2268_v42 = vsel %vm6032_vm0, %v5652_v33, -3.4028235e+38 }
 0x56c   :  { %v6328_v28 = vpop.xlane.xlu0 %2157  ;;  %v6330_v19 = vpop.xlane.xlu1 %2155 }
 0x56d   :  { %8065 = vst [vmem:[#allocation43_spill] sm:$0xff] %v6330_v19 }
 0x56f   :  { %2207 = vmax.xlane.f32.xlu0 %v2200_v40  ;;  %2251 = vmax.xlane.f32.xlu1 %v2245_v56  ;;  %v2246_v40 = vsel %vm6021_vm5, %v5648_v16, -3.4028235e+38 }
 0x570   :  { %v6338_v3 = vpop.xlane.xlu0 %2180  ;;  %v6340_v37 = vpop.xlane.xlu1 %2178 }
 0x571   :  { %8066 = vst [vmem:[#allocation44_spill] sm:$0xff] %v6340_v37 }
 0x573   :  { %2230 = vmax.xlane.f32.xlu0 %v2223_v59  ;;  %2274 = vmax.xlane.f32.xlu1 %v2268_v42 }
 0x574   :  { %v6348_v19 = vpop.xlane.xlu0 %2203  ;;  %v6350_v23 = vpop.xlane.xlu1 %2201 }
 0x575   :  { %8067 = vst [vmem:[#allocation45_spill] sm:$0xff] %v6348_v19  ;;  %8068 = vst [vmem:[#allocation46_spill] sm:$0xff] %v6350_v23 }
 0x577   :  { %2253 = vmax.xlane.f32.xlu0 %v2246_v40 }
 0x578   :  { %v6355_v56 = vpop.xlane.xlu0 %2226  ;;  %v6357_v37 = vpop.xlane.xlu1 %2224 }
 0x579   :  { %8069 = vst [vmem:[#allocation47_spill] sm:$0xff] %v6355_v56  ;;  %8070 = vst [vmem:[#allocation48_spill] sm:$0xff] %v6357_v37 }
 0x57b   :  { %2276 = vmax.xlane.f32.xlu0 %v2269_v10 }
 0x57c   :  { %v6362_v33 = vpop.xlane.xlu0 %2249  ;;  %v6364_v59 = vpop.xlane.xlu1 %2247 }
 0x580   :  { %v6366_v42 = vpop.xlane.xlu0 %2272  ;;  %v6368_v23 = vpop.xlane.xlu1 %2270 }
 0x581   :  { %8071 = vst [vmem:[#allocation49_spill] sm:$0xff] %v6368_v23 }
 0x584   :  { %v1558_v21 = vpop.xlane.xlu0 %1557  ;;  %v6370_v19 = vpop.xlane.xlu1 %1561 }
 0x585   :  { %8072 = vst [vmem:[#allocation50_spill] sm:$0xff] %v6370_v19  ;;  %v1565_v40 = vsel %vm5621_vm9, %v1558_v21, 0.0 }
 0x588   :  { %v1581_v37 = vpop.xlane.xlu0 %1580  ;;  %v6374_v56 = vpop.xlane.xlu1 %1584 }
 0x589   :  { %v1588_v16 = vsel %vm5617_vm1, %v1581_v37, %v1565_v40 }
 0x58a   :  { %v1611_v10 = vsel %vm5638_vm4, %v6082_v51, %v1588_v16  ;;  %vm8073_vm4 = vnez %v7971_v55 }
 0x58b   :  { %v1634_v23 = vsel %vm5663_vm8, %v6092_v26, %v1611_v10  ;;  %vm8074_vm8 = vnez %v7974_v58 }
 0x58c   :  { %v1657_v19 = vsel %vm5680_vm12, %v6102_v27, %v1634_v23  ;;  %v6387_v62 = vpop.xlane.xlu0 %1563  ;;  %v6389_v21 = vpop.xlane.xlu1 %1607  ;;  %vm8079_vm12 = vnez %v7984_v5 }
 0x58d   :  { %v1680_v37 = vsel %vm5693_vm14, %v6112_v52, %v1657_v19  ;;  %v2290_v19 = vld [vmem:[%s7701_s4 + $0x40] sm:$0xff]  ;;  %vm8075_vm14 = vnez %v7977_v11 }
 0x58e   :  { %v1703_v51 = vsel %vm5706_vm15, %v6122_v60, %v1680_v37  ;;  %vm8076_vm15 = vcmask 261120  }
 0x58f   :  { %v1726_v26 = vsel %vm8073_vm4, %v6132_v25, %v1703_v51  ;;  %4328 = vmatprep.mubr.msk.f32.mxu1 %vm8076_vm15, %v2290_v19  ;;  %vm8077_vm4 = vnez %v7980_v29  ;;  %vm8081_vm15 = vnez %v7989_v7 }
 0x590   :  { %v1749_v23 = vsel %vm8074_vm8, %v6142_v41, %v1726_v26  ;;  %v6403_v27 = vpop.xlane.xlu0 %1586  ;;  %v6405_v40 = vpop.xlane.xlu1 %1630  ;;  %vm8078_vm8 = vnez %v7982_v4 }
 0x591   :  { %v1772_v52 = vsel %vm8075_vm14, %v6152_v46, %v1749_v23  ;;  %vm8080_vm14 = vnez %v7986_v24  ;;  %v8090_v23 = vld [vmem:[#allocation26_spill] sm:$0xff] }
 0x592   :  { %v1795_v60 = vsel %vm8077_vm4, %v6162_v35, %v1772_v52  ;;  %vm8091_vm4 = vnez %v8090_v23 }
 0x593   :  { %v1818_v25 = vsel %vm8078_vm8, %v6172_v0, %v1795_v60  ;;  %v8082_v0 = vsel %vm8046_vm2, %v6224_v17, %v6216_v44  ;;  %vm8084_vm8 = vnez %v7992_v36  ;;  %v8093_v60 = vld [vmem:[#allocation27_spill] sm:$0xff] }
 0x594   :  { %v1841_v41 = vsel %vm8079_vm12, %v6182_v18, %v1818_v25  ;;  %v6423_v16 = vpop.xlane.xlu0 %1609  ;;  %v6425_v10 = vpop.xlane.xlu1 %1653  ;;  %vm8083_vm12 = vnez %v7998_v49  ;;  %v8095_v25 = vld [vmem:[#allocation38_spill] sm:$0xff] }
 0x595   :  { %v1864_v46 = vsel %vm8080_vm14, %v6192_v45, %v1841_v41  ;;  %v1957_v18 = vsel %vm8083_vm12, %v6238_v54, %v8082_v0  ;;  %vm8085_vm14 = vnez %v8001_v34  ;;  %v8089_v54 = vld [vmem:[#allocation36_spill] sm:$0xff]  ;;  %v8124_v49 = vld [vmem:[#allocation50_spill] sm:$0xff] }
 0x596   :  { %v1887_v35 = vsel %vm8081_vm15, %v6202_v53, %v1864_v46  ;;  %v1980_v45 = vsel %vm8085_vm14, %v6248_v12, %v1957_v18  ;;  %vm8086_vm15 = vnez %v8004_v39  ;;  %v1567_v36 = vsel %vm5621_vm9, %v8124_v49, 0.0 }
 0x597   :  { %v1910_v37 = vsel %vm8084_vm8, %v6212_v61, %v1887_v35  ;;  %v2003_v44 = vsel %vm8086_vm15, %v6258_v32, %v1980_v45  ;;  %vm8087_vm8 = vnez %v8007_v57  ;;  %v8097_v35 = vld [vmem:[#allocation39_spill] sm:$0xff]  ;;  %v8099_v45 = vld [vmem:[#allocation40_spill] sm:$0xff] }
 0x598   :  { %v1933_v53 = vsel %vm8046_vm2, %v6226_v13, %v1910_v37  ;;  %v6450_v51 = vpop.xlane.xlu0 %1632  ;;  %v6452_v26 = vpop.xlane.xlu1 %1676  ;;  %v2026_v17 = vsel %vm8087_vm8, %v6268_v47, %v2003_v44  ;;  %vm8088_vm2 = vnez %v8010_v6  ;;  %v8092_v47 = vld [vmem:[#allocation37_spill] sm:$0xff] }
 0x599   :  { %v1956_v61 = vsel %vm8083_vm12, %v6240_v22, %v1933_v53  ;;  %v2049_v12 = vsel %vm8088_vm2, %v6278_v38, %v2026_v17 }
 0x59a   :  { %v1979_v13 = vsel %vm8085_vm14, %v6250_v2, %v1956_v61  ;;  %v2072_v22 = vsel %vm8091_vm4, %v6288_v20, %v2049_v12  ;;  %vm8094_vm14 = vnez %v8093_v60 }
 0x59b   :  { %v2002_v32 = vsel %vm8086_vm15, %v8089_v54, %v1979_v13  ;;  %v2095_v38 = vsel %vm8094_vm14, %v6298_v43, %v2072_v22  ;;  %v8103_v54 = vld [vmem:[#allocation42_spill] sm:$0xff]  ;;  %v8104_v22 = vld [vmem:[#allocation45_spill] sm:$0xff] }
 0x59c   :  { %v6475_v19 = vpop.xlane.xlu0 %1655  ;;  %v6477_v52 = vpop.xlane.xlu1 %1699  ;;  %v2025_v2 = vsel %vm8087_vm8, %v8092_v47, %v2002_v32  ;;  %v2118_v20 = vsel %vm8056_vm7, %v6308_v1, %v2095_v38  ;;  %v8101_v1 = vld [vmem:[#allocation41_spill] sm:$0xff] }
 0x59d   :  { %v2048_v41 = vsel %vm8088_vm2, %v8095_v25, %v2025_v2  ;;  %v2141_v37 = vsel %vm8058_vm10, %v6318_v31, %v2118_v20  ;;  %v8106_v2 = vld [vmem:[#allocation43_spill] sm:$0xff] }
 0x59e   :  { %v2071_v0 = vsel %vm8091_vm4, %v8097_v35, %v2048_v41  ;;  %v2164_v44 = vsel %vm8060_vm3, %v6328_v28, %v2141_v37  ;;  %v8107_v25 = vld [vmem:[#allocation47_spill] sm:$0xff]  ;;  %v8109_v35 = vld [vmem:[#allocation44_spill] sm:$0xff] }
 0x59f   :  { %v2094_v43 = vsel %vm8094_vm14, %v8099_v45, %v2071_v0  ;;  %v2187_v31 = vsel %vm8062_vm6, %v6338_v3, %v2164_v44  ;;  %v8111_v44 = vld [vmem:[#allocation46_spill] sm:$0xff] }
 0x5a0   :  { %v6503_v61 = vpop.xlane.xlu0 %1678  ;;  %v6505_v17 = vpop.xlane.xlu1 %1722  ;;  %v2117_v13 = vsel %vm8056_vm7, %v8101_v1, %v2094_v43  ;;  %v2210_v28 = vsel %vm5996_vm13, %v8104_v22, %v2187_v31  ;;  %v8112_v31 = vld [vmem:[#allocation48_spill] sm:$0xff] }
 0x5a1   :  { %v2140_v32 = vsel %vm8058_vm10, %v8103_v54, %v2117_v13  ;;  %v2233_v20 = vsel %vm6009_vm11, %v8107_v25, %v2210_v28 }
 0x5a2   :  { %v2163_v38 = vsel %vm8060_vm3, %v8106_v2, %v2140_v32  ;;  %v2256_v37 = vsel %vm6021_vm5, %v6362_v33, %v2233_v20  ;;  %v8113_v32 = vld [vmem:[#allocation49_spill] sm:$0xff] }
 0x5a3   :  { %v2186_v3 = vsel %vm8062_vm6, %v8109_v35, %v2163_v38  ;;  %v2279_v13 = vsel %vm6032_vm0, %v6366_v42, %v2256_v37  ;;  %v4743_v42 = vmov 3   ;;  %v6559_v35 = vld [vmem:[%s7700_s5] sm:$0xff] }
 0x5a4   :  { %v6531_v45 = vpop.xlane.xlu0 %1701  ;;  %v6533_v43 = vpop.xlane.xlu1 %1745  ;;  %v2209_v1 = vsel %vm5996_vm13, %v8111_v44, %v2186_v3  ;;  %v2295_v28 = vmax.f32 %v2279_v13, 0.0  ;;  %4683 = vset.pattern.permute.xlu1 %v4743_v42  ;;  %4684 = vset.pattern.permute.xlu0 %v4743_v42  ;;  %8115 = vst [vmem:[#allocation37_spill] sm:$0xff] %v6559_v35 }
 0x5a5   :  { %v2232_v54 = vsel %vm6009_vm11, %v8112_v31, %v2209_v1  ;;  %2493 = vperm.xlu1 %4683, %v6559_v35   ;;  %v6575_v1 = vld [vmem:[%s7700_s5 + $0x10] sm:$0xff]  ;;  %vm8128_vm11 = vnez %v7962_v15 }
 0x5a6   :  { %v2255_v33 = vsel %vm6021_vm5, %v6364_v59, %v2232_v54  ;;  %v6565_v59 = vld [vmem:[%s7700_s5 + $0x8] sm:$0xff]  ;;  %8117 = vst [vmem:[#allocation39_spill] sm:$0xff] %v6575_v1  ;;  %v6581_v54 = vld [vmem:[%s7700_s5 + $0x18] sm:$0xff]  ;;  %vm8127_vm5 = vnez %v7958_v48 }
 0x5a7   :  { %v2278_v22 = vsel %vm6032_vm0, %v8113_v32, %v2255_v33  ;;  %8116 = vst [vmem:[#allocation38_spill] sm:$0xff] %v6565_v59  ;;  %2497 = vperm.xlu0 %4684, %v6565_v59   ;;  %8118 = vst [vmem:[#allocation40_spill] sm:$0xff] %v6581_v54  ;;  %vm8126_vm0 = vnez %v7953_v63 }
 0x5a8   :  { %v6550_v2 = vpop.xlane.xlu0 %1724  ;;  %v6552_v38 = vpop.xlane.xlu1 %1768  ;;  %v2294_v25 = vmax.f32 %v2278_v22, 0.0  ;;  %v6554_v20 = vpack.c.bf16 %v2279_v13, %v2278_v22 }
 0x5a9   :  { %2501 = vperm.xlu1 %4683, %v6575_v1  }
 0x5aa   :  { %8114 = vst [vmem:[#allocation36_spill] sm:$0xff] %v6554_v20  ;;  %v4518_v3 = vpack.c.bf16 %v2295_v28, %v2294_v25 }
 0x5ac   :  { %4519 = vmatprep.subr.bf16.mxu1 %v4518_v3  ;;  %v6568_v37 = vpop.xlane.xlu0 %1747  ;;  %v6570_v44 = vpop.xlane.xlu1 %1791 }
 0x5ad   :  { %4521 = vmatpush3.bf16.msra.mxu1 %v4518_v3  ;;  %2505 = vperm.xlu1 %4683, %v6581_v54  }
 0x5b0   :  { %v1771_v13 = vpop.xlane.xlu0 %1770  ;;  %v1815_v31 = vpop.xlane.xlu1 %1814 }
 0x5b4   :  { %v1794_v33 = vpop.xlane.xlu0 %1793  ;;  %v1838_v32 = vpop.xlane.xlu1 %1837 }
 0x5b8   :  { %v1817_v22 = vpop.xlane.xlu0 %1816  ;;  %v1861_v28 = vpop.xlane.xlu1 %1860 }
 0x5bc   :  { %v1840_v25 = vpop.xlane.xlu0 %1839  ;;  %v1884_v42 = vpop.xlane.xlu1 %1883 }
 0x5c0   :  { %v1863_v3 = vpop.xlane.xlu0 %1862  ;;  %v1907_v59 = vpop.xlane.xlu1 %1906 }
 0x5c4   :  { %v1886_v35 = vpop.xlane.xlu0 %1885  ;;  %v1930_v20 = vpop.xlane.xlu1 %1929 }
 0x5c8   :  { %v1909_v1 = vpop.xlane.xlu0 %1908  ;;  %v1953_v14 = vpop.xlane.xlu1 %1952 }
 0x5cc   :  { %v1932_v0 = vpop.xlane.xlu0 %1931  ;;  %v1976_v41 = vpop.xlane.xlu1 %1975 }
 0x5d0   :  { %v1955_v47 = vpop.xlane.xlu0 %1954  ;;  %v1999_v12 = vpop.xlane.xlu1 %1998 }
 0x5d4   :  { %v6584_v53 = vpop.xlane.xlu0 %1977  ;;  %v6586_v18 = vpop.xlane.xlu1 %2021 }
 0x5d5   :  { %8119 = vst [vmem:[#allocation41_spill] sm:$0xff] %v6584_v53  ;;  %8120 = vst [vmem:[#allocation42_spill] sm:$0xff] %v6586_v18  ;;  %v1590_v18 = vsel %vm5617_vm1, %v6374_v56, %v1567_v36 }
 0x5d8   :  { %v2001_v54 = vpop.xlane.xlu0 %2000  ;;  %v2045_v46 = vpop.xlane.xlu1 %2044 }
 0x5dc   :  { %v6588_v60 = vpop.xlane.xlu0 %2023  ;;  %v6590_v23 = vpop.xlane.xlu1 %2067 }
 0x5dd   :  { %8121 = vst [vmem:[#allocation45_spill] sm:$0xff] %v6590_v23  ;;  %v1568_v23 = vsel %vm5621_vm9, %v6387_v62, 0.0  ;;  %vm8131_vm9 = vnez %v7971_v55 }
 0x5e0   :  { %v2047_v6 = vpop.xlane.xlu0 %2046  ;;  %v2091_v57 = vpop.xlane.xlu1 %2090 }
 0x5e4   :  { %v6592_v39 = vpop.xlane.xlu0 %2069  ;;  %v6594_v34 = vpop.xlane.xlu1 %2113 }
 0x5e5   :  { %8122 = vst [vmem:[#allocation43_spill] sm:$0xff] %v6592_v39  ;;  %8123 = vst [vmem:[#allocation47_spill] sm:$0xff] %v6594_v34  ;;  %v1613_v39 = vsel %vm8126_vm0, %v6389_v21, %v1590_v18  ;;  %v1591_v34 = vsel %vm5617_vm1, %v6403_v27, %v1568_v23  ;;  %vm8129_vm1 = vnez %v7965_v30 }
 0x5e6   :  { %v1636_v49 = vsel %vm8127_vm5, %v6405_v40, %v1613_v39  ;;  %v1614_v36 = vsel %vm8126_vm0, %v6423_v16, %v1591_v34  ;;  %vm8130_vm0 = vnez %v7968_v9 }
 0x5e7   :  { %v1659_v62 = vsel %vm8128_vm11, %v6425_v10, %v1636_v49  ;;  %v1637_v21 = vsel %vm8127_vm5, %v6450_v51, %v1614_v36  ;;  %vm8132_vm5 = vnez %v7974_v58  ;;  %v8138_v36 = vld [vmem:[#allocation18_spill] sm:$0xff] }
 0x5e8   :  { %v2093_v7 = vpop.xlane.xlu0 %2092  ;;  %v2137_v53 = vpop.xlane.xlu1 %2136  ;;  %v1682_v27 = vsel %vm8129_vm1, %v6452_v26, %v1659_v62  ;;  %v1660_v39 = vsel %vm8128_vm11, %v6475_v19, %v1637_v21  ;;  %vm8135_vm11 = vnez %v7982_v4  ;;  %v8140_v62 = vld [vmem:[#allocation19_spill] sm:$0xff] }
 0x5e9   :  { %v1705_v34 = vsel %vm8130_vm0, %v6477_v52, %v1682_v27  ;;  %v1683_v40 = vsel %vm8129_vm1, %v6503_v61, %v1660_v39  ;;  %vm8133_vm1 = vnez %v7977_v11  ;;  %v8142_v27 = vld [vmem:[#allocation20_spill] sm:$0xff] }
 0x5ea   :  { %v1728_v16 = vsel %vm8131_vm9, %v6505_v17, %v1705_v34  ;;  %v1706_v10 = vsel %vm8130_vm0, %v6531_v45, %v1683_v40  ;;  %vm8134_vm0 = vnez %v7980_v29  ;;  %v8145_v40 = vld [vmem:[#allocation22_spill] sm:$0xff] }
 0x5eb   :  { %v1751_v51 = vsel %vm8132_vm5, %v6533_v43, %v1728_v16  ;;  %v1729_v19 = vsel %vm8131_vm9, %v6550_v2, %v1706_v10  ;;  %vm8136_vm9 = vnez %v7984_v5  ;;  %v8147_v16 = vld [vmem:[#allocation23_spill] sm:$0xff]  ;;  %v8148_v10 = vld [vmem:[#allocation41_spill] sm:$0xff] }
 0x5ec   :  { %v2116_v56 = vpop.xlane.xlu0 %2115  ;;  %v2160_v8 = vpop.xlane.xlu1 %2159  ;;  %v1774_v52 = vsel %vm8133_vm1, %v6552_v38, %v1751_v51  ;;  %v1752_v18 = vsel %vm8132_vm5, %v6568_v37, %v1729_v19  ;;  %vm8137_vm5 = vnez %v7986_v24  ;;  %v8150_v19 = vld [vmem:[#allocation24_spill] sm:$0xff] }
 0x5ed   :  { %v1797_v61 = vsel %vm8134_vm0, %v6570_v44, %v1774_v52  ;;  %v1775_v17 = vsel %vm8133_vm1, %v1771_v13, %v1752_v18  ;;  %vm8139_vm1 = vnez %v8138_v36  ;;  %v8151_v18 = vld [vmem:[#allocation25_spill] sm:$0xff] }
 0x5ee   :  { %v1820_v45 = vsel %vm8135_vm11, %v1815_v31, %v1797_v61  ;;  %v1798_v43 = vsel %vm8134_vm0, %v1794_v33, %v1775_v17  ;;  %vm8141_vm0 = vnez %v8140_v62  ;;  %v8153_v61 = vld [vmem:[#allocation26_spill] sm:$0xff] }
 0x5ef   :  { %v1843_v2 = vsel %vm8136_vm9, %v1838_v32, %v1820_v45  ;;  %v1821_v37 = vsel %vm8135_vm11, %v1817_v22, %v1798_v43  ;;  %vm8143_vm11 = vnez %v8142_v27 }
 0x5f0   :  { %v2139_v26 = vpop.xlane.xlu0 %2138  ;;  %v2183_v23 = vpop.xlane.xlu1 %2182  ;;  %v1866_v44 = vsel %vm8137_vm5, %v1861_v28, %v1843_v2  ;;  %v1844_v13 = vsel %vm8136_vm9, %v1840_v25, %v1821_v37  ;;  %v8154_v2 = vld [vmem:[#allocation27_spill] sm:$0xff] }
 0x5f1   :  { %v1889_v31 = vsel %vm8139_vm1, %v1884_v42, %v1866_v44  ;;  %v1867_v33 = vsel %vm8137_vm5, %v1863_v3, %v1844_v13  ;;  %vm8146_vm5 = vnez %v8145_v40  ;;  %v8155_v44 = vld [vmem:[#allocation43_spill] sm:$0xff]  ;;  %v8157_v13 = vld [vmem:[#allocation28_spill] sm:$0xff] }
 0x5f2   :  { %v1912_v32 = vsel %vm8141_vm0, %v1907_v59, %v1889_v31  ;;  %v1890_v21 = vsel %vm8139_vm1, %v1886_v35, %v1867_v33 }
 0x5f3   :  { %v1935_v22 = vsel %vm8143_vm11, %v1930_v20, %v1912_v32  ;;  %v1913_v25 = vsel %vm8141_vm0, %v1909_v1, %v1890_v21  ;;  %v8149_v1 = vld [vmem:[#allocation42_spill] sm:$0xff]  ;;  %v8158_v32 = vld [vmem:[#allocation29_spill] sm:$0xff] }
 0x5f4   :  { %v2162_v38 = vpop.xlane.xlu0 %2161  ;;  %v2206_v49 = vpop.xlane.xlu1 %2205  ;;  %v1958_v42 = vsel %vm8083_vm12, %v1953_v14, %v1935_v22  ;;  %v1936_v3 = vsel %vm8143_vm11, %v1932_v0, %v1913_v25  ;;  %v8159_v22 = vld [vmem:[#allocation30_spill] sm:$0xff] }
 0x5f5   :  { %v1981_v59 = vsel %vm8146_vm5, %v1976_v41, %v1958_v42  ;;  %v1959_v35 = vsel %vm8083_vm12, %v1955_v47, %v1936_v3  ;;  %v8160_v42 = vld [vmem:[#allocation31_spill] sm:$0xff] }
 0x5f6   :  { %v2004_v20 = vsel %vm8086_vm15, %v1999_v12, %v1981_v59  ;;  %v1982_v51 = vsel %vm8146_vm5, %v8148_v10, %v1959_v35  ;;  %v8152_v12 = vld [vmem:[#allocation45_spill] sm:$0xff]  ;;  %v8161_v35 = vld [vmem:[#allocation32_spill] sm:$0xff] }
 0x5f7   :  { %v2027_v14 = vsel %vm8087_vm8, %v8149_v1, %v2004_v20  ;;  %v2005_v0 = vsel %vm8086_vm15, %v2001_v54, %v1982_v51  ;;  %v8162_v10 = vld [vmem:[#allocation33_spill] sm:$0xff]  ;;  %v8164_v51 = vld [vmem:[#allocation34_spill] sm:$0xff]  ;;  %v8166_v1 = vld [vmem:[#allocation35_spill] sm:$0xff] }
 0x5f8   :  { %v2185_v39 = vpop.xlane.xlu0 %2184  ;;  %v2229_v28 = vpop.xlane.xlu1 %2228  ;;  %v2050_v41 = vsel %vm8088_vm2, %v2045_v46, %v2027_v14  ;;  %v2028_v47 = vsel %vm8087_vm8, %v6588_v60, %v2005_v0  ;;  %v8156_v46 = vld [vmem:[#allocation47_spill] sm:$0xff] }
 0x5f9   :  { %v2073_v17 = vsel %vm8091_vm4, %v8152_v12, %v2050_v41  ;;  %v2051_v43 = vsel %vm8088_vm2, %v2047_v6, %v2028_v47  ;;  %v8168_v12 = vld [vmem:[#allocation8_spill] sm:$0xff] }
 0x5fa   :  { %v2096_v37 = vsel %vm8094_vm14, %v2091_v57, %v2073_v17  ;;  %v2074_v54 = vsel %vm8091_vm4, %v8155_v44, %v2051_v43  ;;  %v2292_v17 = vld [vmem:[%s7701_s4 + $0x50] sm:$0xff]  ;;  %v8171_v43 = vld [vmem:[#allocation17_spill] sm:$0xff]  ;;  %v2283_v44 = vld [vmem:[%s7701_s4 + $0x28] sm:$0xff] }
 0x5fb   :  { %v2119_v31 = vsel %vm8056_vm7, %v8156_v46, %v2096_v37  ;;  %v2097_v33 = vsel %vm8094_vm14, %v2093_v7, %v2074_v54  ;;  %v2282_v37 = vld [vmem:[%s7701_s4 + $0x20] sm:$0xff]  ;;  %v8174_v54 = vld [vmem:[#allocation36_spill] sm:$0xff] }
 0x5fc   :  { %v2208_v52 = vpop.xlane.xlu0 %2207  ;;  %v2252_v45 = vpop.xlane.xlu1 %2251  ;;  %v2142_v21 = vsel %vm8058_vm10, %v2137_v53, %v2119_v31  ;;  %v2120_v6 = vsel %vm8056_vm7, %v2116_v56, %v2097_v33  ;;  %vm8163_vm7 = vnez %v8162_v10  ;;  %v2284_v46 = vld [vmem:[%s7701_s4 + $0x30] sm:$0xff]  ;;  %v2516_v33 = vld [vmem:[%s7701_s4 + $0xa0] sm:$0xff] }
 0x5fd   :  { %v2165_v57 = vsel %vm8060_vm3, %v2160_v8, %v2142_v21  ;;  %v2143_v25 = vsel %vm8058_vm10, %v2139_v26, %v2120_v6  ;;  %vm8165_vm10 = vnez %v8164_v51  ;;  %v2517_v21 = vld [vmem:[%s7701_s4 + $0xa8] sm:$0xff] }
 0x5fe   :  { %v2188_v3 = vsel %vm8062_vm6, %v2183_v23, %v2165_v57  ;;  %v2166_v59 = vsel %vm8060_vm3, %v2162_v38, %v2143_v25  ;;  %vm8167_vm3 = vnez %v8166_v1  ;;  %v8178_v6 = vld [vmem:[#allocation7_spill] sm:$0xff]  ;;  %v8180_v57 = vld [vmem:[#allocation10_spill] sm:$0xff]  ;;  %v2518_v25 = vld [vmem:[%s7701_s4 + $0xb0] sm:$0xff] }
 0x5ff   :  { %v2211_v7 = vsel %vm5996_vm13, %v2206_v49, %v2188_v3  ;;  %v2189_v56 = vsel %vm8062_vm6, %v2185_v39, %v2166_v59  ;;  %v2519_v3 = vld [vmem:[%s7701_s4 + $0xb8] sm:$0xff]  ;;  %v2512_v59 = vld [vmem:[%s7701_s4 + $0x80] sm:$0xff] }
 0x600   :  { %v2231_v60 = vpop.xlane.xlu0 %2230  ;;  %v2275_v20 = vpop.xlane.xlu1 %2274  ;;  %v2234_v8 = vsel %vm8163_vm7, %v2229_v28, %v2211_v7  ;;  %v2212_v26 = vsel %vm5996_vm13, %v2208_v52, %v2189_v56  ;;  %v2291_v52 = vld [vmem:[%s7701_s4 + $0x48] sm:$0xff]  ;;  %v2714_v56 = vld [vmem:[%s7701_s4 + $0x60] sm:$0xff] }
 0x601   :  { %v2257_v23 = vsel %vm8165_vm10, %v2252_v45, %v2234_v8  ;;  %v2235_v38 = vsel %vm8163_vm7, %v2231_v60, %v2212_v26  ;;  %v2293_v45 = vld [vmem:[%s7701_s4 + $0x58] sm:$0xff]  ;;  %v2513_v7 = vld [vmem:[%s7701_s4 + $0x88] sm:$0xff]  ;;  %v4744_v8 = vmov 4  }
 0x602   :  { %v2280_v49 = vsel %vm8167_vm3, %v2275_v20, %v2257_v23  ;;  %v2285_v60 = vld [vmem:[%s7701_s4 + $0x38] sm:$0xff]  ;;  %v2514_v20 = vld [vmem:[%s7701_s4 + $0x90] sm:$0xff]  ;;  %4685 = vset.pattern.permute.xlu1 %v4744_v8  ;;  %v8187_v23 = vld [vmem:[#allocation38_spill] sm:$0xff] }
 0x603   :  { %v2296_v28 = vmax.f32 %v2280_v49, 0.0  ;;  %v8186_v26 = vld [vmem:[#allocation37_spill] sm:$0xff] }
 0x604   :  { %v2254_v53 = vpop.xlane.xlu0 %2253  ;;  %2824 = vperm.xlu1 %4685, %v8186_v26   ;;  %v8193_v8 = vld [vmem:[#allocation5_spill] sm:$0xff] }
 0x605   :  { %v2258_v14 = vsel %vm8165_vm10, %v2254_v53, %v2235_v38  ;;  %vm8169_vm10 = vcmask 261120   ;;  %v2515_v53 = vld [vmem:[%s7701_s4 + $0x98] sm:$0xff]  ;;  %v8188_v38 = vld [vmem:[#allocation39_spill] sm:$0xff] }
 0x608   :  { %v2277_v0 = vpop.xlane.xlu0 %2276  ;;  %2828 = vperm.xlu1 %4685, %v8187_v23  }
 0x609   :  { %v2281_v39 = vsel %vm8167_vm3, %v2277_v0, %v2258_v14  ;;  %vm8170_vm3 = vmmov %vm8169_vm10 }
 0x60a   :  { %v2297_v41 = vmax.f32 %v2281_v39, 0.0  ;;  %vm8172_vm7 = vmmov %vm8170_vm3  ;;  %v4538_v31 = vpack.c.bf16 %v2281_v39, %v2280_v49  ;;  %v8189_v49 = vld [vmem:[#allocation40_spill] sm:$0xff] }
 0x60b   :  { %vm8173_vm13 = vmmov %vm8170_vm3 }
 0x60c   :  { %v4522_v47 = vpack.c.bf16 %v2297_v41, %v2296_v28  ;;  %vm8185_vm6 = vmmov %vm8170_vm3  ;;  %2832 = vperm.xlu1 %4685, %v8188_v38  }
 0x60e   :  { %4523 = vmatprep.subr.bf16.mxu1 %v4522_v47 }
 0x60f   :  { %4525 = vmatpush3.bf16.msra.mxu1 %v4522_v47 }
 0x610   :  { %4527 = vmatprep.subr.bf16.mxu1 %v8168_v12  ;;  %2836 = vperm.xlu1 %4685, %v8189_v49  }
 0x612   :  { %4329 = vmatmul.mubr.msk.f32.vlgmr.msra.gmra.mrb[8].mxu1 %vm8169_vm10, %v2291_v52  ;;  %vm8175_vm10 = vmmov %vm8170_vm3 }
 0x613   :  { %4529 = vmatpush3.bf16.msra.mxu1 %v8168_v12  ;;  %4331 = vmatprep.mubr.msk.f32.mxu1 %vm8170_vm3, %v2292_v17 }
 0x614   :  { %4531 = vmatprep.subr.bf16.mxu1 %v8171_v43 }
 0x616   :  { %4332 = vmatmul.mubr.msk.f32.gmra.mrb[10].mxu1 %vm8172_vm7, %v2293_v45  ;;  %vm8176_vm7 = vmmov %vm8170_vm3 }
 0x617   :  { %4533 = vmatpush3.bf16.msra.mxu1 %v8171_v43  ;;  %4342 = vmatprep.mubr.msk.f32.mxu1 %vm8173_vm13, %v2282_v37  ;;  %vm8177_vm13 = vmmov %vm8170_vm3 }
 0x618   :  { %4535 = vmatprep.subr.bf16.mxu1 %v8174_v54 }
 0x61a   :  { %4343 = vmatmul.mubr.msk.f32.vlgmr.msra.gmra.mrb[8].mxu1 %vm8175_vm10, %v2283_v44  ;;  %vm8179_vm10 = vmmov %vm8170_vm3 }
 0x61b   :  { %4537 = vmatpush3.bf16.msra.mxu1 %v8174_v54  ;;  %4345 = vmatprep.mubr.msk.f32.mxu1 %vm8170_vm3, %v2284_v46 }
 0x61c   :  { %4539 = vmatprep.subr.bf16.mxu1 %v4538_v31 }
 0x61e   :  { %4346 = vmatmul.mubr.msk.f32.gmra.mrb[10].mxu1 %vm8176_vm7, %v2285_v60  ;;  %vm8181_vm7 = vmmov %vm8170_vm3 }
 0x61f   :  { %4541 = vmatpush3.bf16.msra.mxu1 %v4538_v31  ;;  %4356 = vmatprep.mubr.msk.f32.mxu1 %vm8177_vm13, %v2516_v33  ;;  %vm8182_vm13 = vmmov %vm8170_vm3 }
 0x620   :  { %4543 = vmatprep.subr.bf16.mxu1 %v8178_v6 }
 0x622   :  { %4357 = vmatmul.mubr.msk.f32.vlgmr.msra.gmra.mrb[12].mxu1 %vm8179_vm10, %v2517_v21  ;;  %vm8183_vm10 = vmmov %vm8170_vm3  ;;  %v2715_v21 = vld [vmem:[%s7701_s4 + $0x68] sm:$0xff] }
 0x623   :  { %4545 = vmatpush3.bf16.msra.mxu1 %v8178_v6  ;;  %4359 = vmatprep.mubr.msk.f32.mxu1 %vm8170_vm3, %v2518_v25  ;;  %v2716_v6 = vld [vmem:[%s7701_s4 + $0x70] sm:$0xff] }
 0x624   :  { %4547 = vmatprep.subr.bf16.mxu1 %v8180_v57  ;;  %v2494_v14 = vpop.permute.xlu1 %2493 }
 0x626   :  { %4360 = vmatmul.mubr.msk.f32.gmra.mrb[14].mxu1 %vm8181_vm7, %v2519_v3  ;;  %vm8184_vm7 = vmmov %vm8170_vm3  ;;  %v2498_v39 = vpop.permute.xlu0 %2497 }
 0x627   :  { %4549 = vmatpush3.bf16.msra.mxu1 %v8180_v57  ;;  %4370 = vmatprep.mubr.msk.f32.mxu1 %vm8182_vm13, %v2512_v59  ;;  %vm8191_vm13 = vmmov %vm8170_vm3  ;;  %v2717_v57 = vld [vmem:[%s7701_s4 + $0x78] sm:$0xff] }
 0x628   :  { %v2502_v0 = vpop.permute.xlu1 %2501 }
 0x62a   :  { %4371 = vmatmul.mubr.msk.f32.vlgmr.msra.gmra.mrb[12].mxu1 %vm8183_vm10, %v2513_v7  ;;  %vm8192_vm10 = vmmov %vm8170_vm3 }
 0x62b   :  { %4373 = vmatprep.mubr.msk.f32.mxu1 %vm8170_vm3, %v2514_v20 }
 0x62c   :  { %v2506_v45 = vpop.permute.xlu1 %2505 }
 0x62e   :  { %4374 = vmatmul.mubr.msk.f32.gmra.mrb[14].mxu1 %vm8184_vm7, %v2515_v53  ;;  %vm8196_vm7 = vnez %v7947_v50 }
 0x62f   :  { %4384 = vmatprep.mubr.msk.f32.mxu1 %vm8185_vm6, %v2714_v56  ;;  %vm8190_vm6 = vmmov %vm8170_vm3  ;;  %vm8194_vm3 = vnez %v8193_v8 }
 0x683   :  { %v2825_v25 = vpop.permute.xlu1 %2824 }
 0x687   :  { %v2829_v3 = vpop.permute.xlu1 %2828 }
 0x68b   :  { %v2833_v59 = vpop.permute.xlu1 %2832 }
 0x68f   :  { %v2837_v23 = vpop.permute.xlu1 %2836 }
 0x6ed   :  { %v4344_v28 = vpop.f32.mrb[8].mxu1 }
 0x6ee   :  { %v2509_v41 = vadd.f32 %v4344_v28, %v2498_v39  ;;  %v2473_v47 = vpop.f32.mrb[9].mxu1 }
 0x6ef   :  { %v2508_v52 = vadd.f32 %v2494_v14, %v2473_v47 }
 0x6f0   :  { %v2719_v12 = vmax.f32 %v2509_v41, 0.0 }
 0x6f1   :  { %v2718_v17 = vmax.f32 %v2508_v52, 0.0  ;;  %v4347_v43 = vpop.f32.mrb[10].mxu1 }
 0x6f2   :  { %v2511_v37 = vadd.f32 %v4347_v43, %v2506_v45  ;;  %v2483_v44 = vpop.f32.mrb[11].mxu1 }
 0x6f3   :  { %v4550_v54 = vpack.c.bf16 %v2719_v12, %v2718_v17  ;;  %v2510_v46 = vadd.f32 %v2502_v0, %v2483_v44 }
 0x6f4   :  { %v2721_v31 = vmax.f32 %v2511_v37, 0.0 }
 0x6f5   :  { %v2720_v60 = vmax.f32 %v2510_v46, 0.0  ;;  %4551 = vmatprep.subr.bf16.mxu1 %v4550_v54 }
 0x6f6   :  { %4553 = vmatpush3.bf16.msra.mxu1 %v4550_v54 }
 0x6f7   :  { %v4554_v33 = vpack.c.bf16 %v2721_v31, %v2720_v60 }
 0x6f9   :  { %4555 = vmatprep.subr.bf16.mxu1 %v4554_v33 }
 0x6fa   :  { %4557 = vmatpush3.bf16.msra.mxu1 %v4554_v33 }
 0x6fd   :  { %4385 = vmatmul.mubr.msk.f32.vlgmr.msra.gmra.mrb[12].mxu1 %vm8190_vm6, %v2715_v21  ;;  %vm8199_vm6 = vnez %v7953_v63 }
 0x6fe   :  { %4387 = vmatprep.mubr.msk.f32.mxu1 %vm8191_vm13, %v2716_v6  ;;  %vm8200_vm13 = vnez %v7958_v48 }
 0x701   :  { %4388 = vmatmul.mubr.msk.f32.gmra.mrb[14].mxu1 %vm8192_vm10, %v2717_v57  ;;  %vm8201_vm10 = vnez %v7962_v15 }
 0x7d0   :  { %v4386_v7 = vpop.f32.mrb[12].mxu1 }
 0x7d1   :  { %v6840_v20 = vadd.f32 %v4386_v7, %v2829_v3  ;;  %v2800_v53 = vpop.f32.mrb[13].mxu1 }
 0x7d2   :  { %v6842_v56 = vadd.f32 %v2825_v25, %v2800_v53 }
 0x7d3   :  { %v2844_v26 = vsel %vm8194_vm3, %v6840_v20, -3.4028235e+38  ;;  %v3360_v41 = vmax.f32 %v6840_v20, 0.0  ;;  %v2860_v52 = vsel %vm8196_vm7, %v6840_v20, -3.4028235e+38 }
 0x7d4   :  { %v4389_v38 = vpop.f32.mrb[14].mxu1  ;;  %2849 = vmax.xlane.f32.xlu0 %v2844_v26  ;;  %v2843_v49 = vsel %vm8194_vm3, %v6842_v56, -3.4028235e+38  ;;  %v3359_v14 = vmax.f32 %v6842_v56, 0.0  ;;  %v6853_v0 = vpack.c.bf16 %v6840_v20, %v6842_v56  ;;  %v2859_v17 = vsel %vm8196_vm7, %v6842_v56, -3.4028235e+38 }
 0x7d5   :  { %v6855_v39 = vadd.f32 %v4389_v38, %v2837_v23  ;;  %v2810_v28 = vpop.f32.mrb[15].mxu1  ;;  %2847 = vmax.xlane.f32.xlu1 %v2843_v49  ;;  %v2876_v43 = vsel %vm8199_vm6, %v6840_v20, -3.4028235e+38  ;;  %v2875_v37 = vsel %vm8199_vm6, %v6842_v56, -3.4028235e+38  ;;  %vm8202_vm6 = vnez %v7965_v30 }
 0x7d6   :  { %8195 = vst [vmem:[#allocation44_spill] sm:$0xff] %v6853_v0  ;;  %v6858_v47 = vadd.f32 %v2833_v59, %v2810_v28  ;;  %v6863_v12 = vpack.c.bf16 %v3360_v41, %v3359_v14  ;;  %v2892_v44 = vsel %vm8200_vm13, %v6840_v20, -3.4028235e+38  ;;  %v2891_v54 = vsel %vm8200_vm13, %v6842_v56, -3.4028235e+38 }
 0x7d7   :  { %v2908_v46 = vsel %vm8201_vm10, %v6840_v20, -3.4028235e+38  ;;  %v2907_v31 = vsel %vm8201_vm10, %v6842_v56, -3.4028235e+38  ;;  %v2924_v60 = vsel %vm8202_vm6, %v6840_v20, -3.4028235e+38  ;;  %vm8203_vm13 = vnez %v7968_v9 }
 0x7d8   :  { %8197 = vst [vmem:[#allocation46_spill] sm:$0xff] %v6863_v12  ;;  %2865 = vmax.xlane.f32.xlu0 %v2860_v52  ;;  %v6870_v45 = vpack.c.bf16 %v6855_v39, %v6858_v47  ;;  %v2923_v33 = vsel %vm8202_vm6, %v6842_v56, -3.4028235e+38  ;;  %v2940_v21 = vsel %vm8203_vm13, %v6840_v20, -3.4028235e+38  ;;  %vm8204_vm10 = vnez %v7971_v55 }
 0x7d9   :  { %2863 = vmax.xlane.f32.xlu1 %v2859_v17  ;;  %v2939_v6 = vsel %vm8203_vm13, %v6842_v56, -3.4028235e+38  ;;  %v2956_v57 = vsel %vm8204_vm10, %v6840_v20, -3.4028235e+38  ;;  %v2955_v25 = vsel %vm8204_vm10, %v6842_v56, -3.4028235e+38  ;;  %vm8205_vm6 = vnez %v7974_v58 }
 0x7da   :  { %8198 = vst [vmem:[#allocation48_spill] sm:$0xff] %v6870_v45  ;;  %v2972_v3 = vsel %vm8205_vm6, %v6840_v20, -3.4028235e+38  ;;  %v2971_v59 = vsel %vm8205_vm6, %v6842_v56, -3.4028235e+38  ;;  %vm8206_vm13 = vnez %v7977_v11  ;;  %vm8207_vm10 = vnez %v7980_v29 }
 0x7db   :  { %v2988_v7 = vsel %vm8206_vm13, %v6840_v20, -3.4028235e+38  ;;  %v2987_v53 = vsel %vm8206_vm13, %v6842_v56, -3.4028235e+38  ;;  %v3004_v26 = vsel %vm8207_vm10, %v6840_v20, -3.4028235e+38  ;;  %vm8208_vm6 = vnez %v7982_v4 }
 0x7dc   :  { %2881 = vmax.xlane.f32.xlu0 %v2876_v43  ;;  %v3003_v23 = vsel %vm8207_vm10, %v6842_v56, -3.4028235e+38  ;;  %v3361_v38 = vmax.f32 %v6858_v47, 0.0  ;;  %v3362_v49 = vmax.f32 %v6855_v39, 0.0  ;;  %v3020_v14 = vsel %vm8208_vm6, %v6840_v20, -3.4028235e+38 }
 0x7dd   :  { %2879 = vmax.xlane.f32.xlu1 %v2875_v37  ;;  %v3019_v28 = vsel %vm8208_vm6, %v6842_v56, -3.4028235e+38  ;;  %v3036_v52 = vsel %vm8136_vm9, %v6840_v20, -3.4028235e+38  ;;  %v3035_v17 = vsel %vm8136_vm9, %v6842_v56, -3.4028235e+38  ;;  %vm8210_vm10 = vnez %v7986_v24 }
 0x7de   :  { %v6934_v41 = vpack.c.bf16 %v3362_v49, %v3361_v38  ;;  %v3052_v43 = vsel %vm8210_vm10, %v6840_v20, -3.4028235e+38  ;;  %v3051_v37 = vsel %vm8210_vm10, %v6842_v56, -3.4028235e+38  ;;  %v3196_v38 = vsel %vm8091_vm4, %v6840_v20, -3.4028235e+38 }
 0x7df   :  { %v3195_v49 = vsel %vm8091_vm4, %v6842_v56, -3.4028235e+38  ;;  %vm8212_vm4 = vnez %v8158_v32 }
 0x7e0   :  { %2897 = vmax.xlane.f32.xlu0 %v2892_v44  ;;  %8209 = vst [vmem:[#allocation49_spill] sm:$0xff] %v6934_v41  ;;  %v3068_v44 = vsel %vm8139_vm1, %v6840_v20, -3.4028235e+38 }
 0x7e1   :  { %2895 = vmax.xlane.f32.xlu1 %v2891_v54  ;;  %v3067_v54 = vsel %vm8139_vm1, %v6842_v56, -3.4028235e+38 }
 0x7e4   :  { %2913 = vmax.xlane.f32.xlu0 %v2908_v46  ;;  %v3084_v46 = vsel %vm8141_vm0, %v6840_v20, -3.4028235e+38 }
 0x7e5   :  { %2911 = vmax.xlane.f32.xlu1 %v2907_v31  ;;  %v3083_v31 = vsel %vm8141_vm0, %v6842_v56, -3.4028235e+38 }
 0x7e8   :  { %2929 = vmax.xlane.f32.xlu0 %v2924_v60  ;;  %v3100_v60 = vsel %vm8143_vm11, %v6840_v20, -3.4028235e+38 }
 0x7e9   :  { %2927 = vmax.xlane.f32.xlu1 %v2923_v33  ;;  %v3099_v33 = vsel %vm8143_vm11, %v6842_v56, -3.4028235e+38 }
 0x7ec   :  { %2945 = vmax.xlane.f32.xlu0 %v2940_v21  ;;  %v3116_v21 = vsel %vm8083_vm12, %v6840_v20, -3.4028235e+38 }
 0x7ed   :  { %2943 = vmax.xlane.f32.xlu1 %v2939_v6  ;;  %v3115_v6 = vsel %vm8083_vm12, %v6842_v56, -3.4028235e+38 }
 0x7f0   :  { %2961 = vmax.xlane.f32.xlu0 %v2956_v57  ;;  %v3132_v57 = vsel %vm8146_vm5, %v6840_v20, -3.4028235e+38 }
 0x7f1   :  { %2959 = vmax.xlane.f32.xlu1 %v2955_v25  ;;  %v3131_v25 = vsel %vm8146_vm5, %v6842_v56, -3.4028235e+38 }
 0x7f4   :  { %2977 = vmax.xlane.f32.xlu0 %v2972_v3  ;;  %v3148_v3 = vsel %vm8086_vm15, %v6840_v20, -3.4028235e+38 }
 0x7f5   :  { %2975 = vmax.xlane.f32.xlu1 %v2971_v59  ;;  %v3147_v59 = vsel %vm8086_vm15, %v6842_v56, -3.4028235e+38 }
 0x7f8   :  { %2993 = vmax.xlane.f32.xlu0 %v2988_v7  ;;  %v3164_v7 = vsel %vm8087_vm8, %v6840_v20, -3.4028235e+38 }
 0x7f9   :  { %2991 = vmax.xlane.f32.xlu1 %v2987_v53  ;;  %v3163_v53 = vsel %vm8087_vm8, %v6842_v56, -3.4028235e+38  ;;  %vm8222_vm8 = vnez %v7965_v30 }
 0x7fc   :  { %3009 = vmax.xlane.f32.xlu0 %v3004_v26  ;;  %v3180_v26 = vsel %vm8088_vm2, %v6840_v20, -3.4028235e+38 }
 0x7fd   :  { %3007 = vmax.xlane.f32.xlu1 %v3003_v23  ;;  %v3179_v23 = vsel %vm8088_vm2, %v6842_v56, -3.4028235e+38  ;;  %vm8211_vm2 = vnez %v8157_v13 }
 0x800   :  { %3025 = vmax.xlane.f32.xlu0 %v3020_v14  ;;  %v3212_v14 = vsel %vm8094_vm14, %v6840_v20, -3.4028235e+38 }
 0x801   :  { %3023 = vmax.xlane.f32.xlu1 %v3019_v28  ;;  %v3211_v28 = vsel %vm8094_vm14, %v6842_v56, -3.4028235e+38  ;;  %vm8213_vm14 = vnez %v8159_v22 }
 0x804   :  { %3041 = vmax.xlane.f32.xlu0 %v3036_v52  ;;  %v3228_v52 = vsel %vm8211_vm2, %v6840_v20, -3.4028235e+38 }
 0x805   :  { %3039 = vmax.xlane.f32.xlu1 %v3035_v17  ;;  %v3227_v17 = vsel %vm8211_vm2, %v6842_v56, -3.4028235e+38  ;;  %vm8214_vm2 = vnez %v8160_v42 }
 0x808   :  { %3057 = vmax.xlane.f32.xlu0 %v3052_v43  ;;  %v3244_v43 = vsel %vm8212_vm4, %v6840_v20, -3.4028235e+38 }
 0x809   :  { %3055 = vmax.xlane.f32.xlu1 %v3051_v37  ;;  %v3243_v37 = vsel %vm8212_vm4, %v6842_v56, -3.4028235e+38  ;;  %vm8215_vm4 = vnez %v8161_v35 }
 0x80c   :  { %3073 = vmax.xlane.f32.xlu0 %v3068_v44  ;;  %v3260_v44 = vsel %vm8213_vm14, %v6840_v20, -3.4028235e+38 }
 0x80d   :  { %3071 = vmax.xlane.f32.xlu1 %v3067_v54  ;;  %v3259_v54 = vsel %vm8213_vm14, %v6842_v56, -3.4028235e+38  ;;  %vm8216_vm14 = vnez %v8162_v10 }
 0x810   :  { %3089 = vmax.xlane.f32.xlu0 %v3084_v46  ;;  %v3276_v46 = vsel %vm8214_vm2, %v6840_v20, -3.4028235e+38 }
 0x811   :  { %3087 = vmax.xlane.f32.xlu1 %v3083_v31  ;;  %v3275_v31 = vsel %vm8214_vm2, %v6842_v56, -3.4028235e+38  ;;  %vm8217_vm2 = vnez %v8164_v51 }
 0x814   :  { %3105 = vmax.xlane.f32.xlu0 %v3100_v60  ;;  %v3292_v60 = vsel %vm8215_vm4, %v6840_v20, -3.4028235e+38 }
 0x815   :  { %3103 = vmax.xlane.f32.xlu1 %v3099_v33  ;;  %v3291_v33 = vsel %vm8215_vm4, %v6842_v56, -3.4028235e+38  ;;  %vm8218_vm4 = vnez %v8166_v1 }
 0x818   :  { %3121 = vmax.xlane.f32.xlu0 %v3116_v21  ;;  %v3308_v21 = vsel %vm8216_vm14, %v6840_v20, -3.4028235e+38 }
 0x819   :  { %3119 = vmax.xlane.f32.xlu1 %v3115_v6  ;;  %v3307_v6 = vsel %vm8216_vm14, %v6842_v56, -3.4028235e+38  ;;  %vm8221_vm14 = vnez %v7962_v15 }
 0x81c   :  { %3137 = vmax.xlane.f32.xlu0 %v3132_v57  ;;  %v3324_v57 = vsel %vm8217_vm2, %v6840_v20, -3.4028235e+38 }
 0x81d   :  { %3135 = vmax.xlane.f32.xlu1 %v3131_v25  ;;  %v3323_v25 = vsel %vm8217_vm2, %v6842_v56, -3.4028235e+38  ;;  %vm8220_vm2 = vnez %v7958_v48 }
 0x820   :  { %3153 = vmax.xlane.f32.xlu0 %v3148_v3  ;;  %v3340_v3 = vsel %vm8218_vm4, %v6840_v20, -3.4028235e+38  ;;  %v2862_v20 = vsel %vm8196_vm7, %v6855_v39, -3.4028235e+38 }
 0x821   :  { %3151 = vmax.xlane.f32.xlu1 %v3147_v59  ;;  %v3339_v59 = vsel %vm8218_vm4, %v6842_v56, -3.4028235e+38  ;;  %v2861_v56 = vsel %vm8196_vm7, %v6858_v47, -3.4028235e+38  ;;  %vm8219_vm4 = vnez %v7953_v63 }
 0x824   :  { %3169 = vmax.xlane.f32.xlu0 %v3164_v7  ;;  %v2846_v7 = vsel %vm8194_vm3, %v6855_v39, -3.4028235e+38 }
 0x825   :  { %3167 = vmax.xlane.f32.xlu1 %v3163_v53  ;;  %v2845_v53 = vsel %vm8194_vm3, %v6858_v47, -3.4028235e+38 }
 0x828   :  { %3185 = vmax.xlane.f32.xlu0 %v3180_v26  ;;  %v2878_v26 = vsel %vm8219_vm4, %v6855_v39, -3.4028235e+38 }
 0x829   :  { %3183 = vmax.xlane.f32.xlu1 %v3179_v23  ;;  %v2877_v23 = vsel %vm8219_vm4, %v6858_v47, -3.4028235e+38 }
 0x82c   :  { %3201 = vmax.xlane.f32.xlu0 %v3196_v38  ;;  %v2894_v38 = vsel %vm8220_vm2, %v6855_v39, -3.4028235e+38 }
 0x82d   :  { %3199 = vmax.xlane.f32.xlu1 %v3195_v49  ;;  %v2893_v49 = vsel %vm8220_vm2, %v6858_v47, -3.4028235e+38 }
 0x830   :  { %3217 = vmax.xlane.f32.xlu0 %v3212_v14 }
 0x831   :  { %3215 = vmax.xlane.f32.xlu1 %v3211_v28 }
 0x834   :  { %3233 = vmax.xlane.f32.xlu0 %v3228_v52  ;;  %v2910_v52 = vsel %vm8221_vm14, %v6855_v39, -3.4028235e+38 }
 0x835   :  { %3231 = vmax.xlane.f32.xlu1 %v3227_v17  ;;  %v2909_v17 = vsel %vm8221_vm14, %v6858_v47, -3.4028235e+38 }
 0x838   :  { %3249 = vmax.xlane.f32.xlu0 %v3244_v43 }
 0x839   :  { %3247 = vmax.xlane.f32.xlu1 %v3243_v37 }
 0x83c   :  { %3265 = vmax.xlane.f32.xlu0 %v3260_v44 }
 0x83d   :  { %3263 = vmax.xlane.f32.xlu1 %v3259_v54 }
 0x840   :  { %3281 = vmax.xlane.f32.xlu0 %v3276_v46 }
 0x841   :  { %3279 = vmax.xlane.f32.xlu1 %v3275_v31 }
 0x844   :  { %3297 = vmax.xlane.f32.xlu0 %v3292_v60  ;;  %v2926_v60 = vsel %vm8222_vm8, %v6855_v39, -3.4028235e+38 }
 0x845   :  { %3295 = vmax.xlane.f32.xlu1 %v3291_v33  ;;  %v2925_v33 = vsel %vm8222_vm8, %v6858_v47, -3.4028235e+38 }
 0x848   :  { %3313 = vmax.xlane.f32.xlu0 %v3308_v21 }
 0x849   :  { %3311 = vmax.xlane.f32.xlu1 %v3307_v6 }
 0x84c   :  { %3329 = vmax.xlane.f32.xlu0 %v3324_v57 }
 0x84d   :  { %3327 = vmax.xlane.f32.xlu1 %v3323_v25 }
 0x850   :  { %3345 = vmax.xlane.f32.xlu0 %v3340_v3 }
 0x851   :  { %3343 = vmax.xlane.f32.xlu1 %v3339_v59 }
 0x854   :  { %2853 = vmax.xlane.f32.xlu0 %v2846_v7 }
 0x855   :  { %2851 = vmax.xlane.f32.xlu1 %v2845_v53 }
 0x858   :  { %2869 = vmax.xlane.f32.xlu0 %v2862_v20 }
 0x859   :  { %2867 = vmax.xlane.f32.xlu1 %v2861_v56 }
 0x85c   :  { %2885 = vmax.xlane.f32.xlu0 %v2878_v26 }
 0x85d   :  { %2883 = vmax.xlane.f32.xlu1 %v2877_v23 }
 0x860   :  { %2901 = vmax.xlane.f32.xlu0 %v2894_v38 }
 0x861   :  { %v2850_v14 = vpop.xlane.xlu0 %2849  ;;  %2899 = vmax.xlane.f32.xlu1 %v2893_v49 }
 0x862   :  { %v2848_v28 = vpop.xlane.xlu1 %2847  ;;  %v2856_v43 = vsel %vm8194_vm3, %v2850_v14, 0.0 }
 0x863   :  { %v2855_v44 = vsel %vm8194_vm3, %v2848_v28, 0.0  ;;  %vm8232_vm3 = vnez %v8158_v32 }
 0x864   :  { %2917 = vmax.xlane.f32.xlu0 %v2910_v52  ;;  %v3245_v12 = vsel %vm8232_vm3, %v6858_v47, -3.4028235e+38 }
 0x865   :  { %v2866_v37 = vpop.xlane.xlu0 %2865  ;;  %2915 = vmax.xlane.f32.xlu1 %v2909_v17 }
 0x866   :  { %v2872_v54 = vsel %vm8196_vm7, %v2866_v37, %v2856_v43  ;;  %v2864_v46 = vpop.xlane.xlu1 %2863 }
 0x867   :  { %v2871_v31 = vsel %vm8196_vm7, %v2864_v46, %v2855_v44  ;;  %vm8223_vm7 = vnez %v7968_v9  ;;  %v2990_v46 = vsel %vm8206_vm13, %v6855_v39, -3.4028235e+38 }
 0x868   :  { %2933 = vmax.xlane.f32.xlu0 %v2926_v60  ;;  %v2942_v3 = vsel %vm8223_vm7, %v6855_v39, -3.4028235e+38  ;;  %v2941_v59 = vsel %vm8223_vm7, %v6858_v47, -3.4028235e+38 }
 0x869   :  { %v2882_v21 = vpop.xlane.xlu0 %2881  ;;  %2931 = vmax.xlane.f32.xlu1 %v2925_v33 }
 0x86a   :  { %v2888_v6 = vsel %vm8219_vm4, %v2882_v21, %v2872_v54  ;;  %v2880_v57 = vpop.xlane.xlu1 %2879 }
 0x86b   :  { %v2887_v25 = vsel %vm8219_vm4, %v2880_v57, %v2871_v31  ;;  %vm8224_vm4 = vnez %v7971_v55  ;;  %v2989_v31 = vsel %vm8206_vm13, %v6858_v47, -3.4028235e+38 }
 0x86c   :  { %2949 = vmax.xlane.f32.xlu0 %v2942_v3  ;;  %v2958_v26 = vsel %vm8224_vm4, %v6855_v39, -3.4028235e+38  ;;  %v2957_v23 = vsel %vm8224_vm4, %v6858_v47, -3.4028235e+38 }
 0x86d   :  { %v2898_v7 = vpop.xlane.xlu0 %2897  ;;  %2947 = vmax.xlane.f32.xlu1 %v2941_v59 }
 0x86e   :  { %v2904_v53 = vsel %vm8220_vm2, %v2898_v7, %v2888_v6  ;;  %v2896_v20 = vpop.xlane.xlu1 %2895 }
 0x86f   :  { %v2903_v56 = vsel %vm8220_vm2, %v2896_v20, %v2887_v25  ;;  %vm8225_vm2 = vnez %v7974_v58  ;;  %v3022_v20 = vsel %vm8208_vm6, %v6855_v39, -3.4028235e+38 }
 0x870   :  { %2965 = vmax.xlane.f32.xlu0 %v2958_v26  ;;  %v2974_v52 = vsel %vm8225_vm2, %v6855_v39, -3.4028235e+38  ;;  %v2973_v17 = vsel %vm8225_vm2, %v6858_v47, -3.4028235e+38 }
 0x871   :  { %v2914_v38 = vpop.xlane.xlu0 %2913  ;;  %2963 = vmax.xlane.f32.xlu1 %v2957_v23 }
 0x872   :  { %v2920_v49 = vsel %vm8221_vm14, %v2914_v38, %v2904_v53  ;;  %v2912_v14 = vpop.xlane.xlu1 %2911 }
 0x873   :  { %v2919_v28 = vsel %vm8221_vm14, %v2912_v14, %v2903_v56  ;;  %v3021_v56 = vsel %vm8208_vm6, %v6858_v47, -3.4028235e+38  ;;  %v3038_v14 = vsel %vm8136_vm9, %v6855_v39, -3.4028235e+38  ;;  %vm8231_vm14 = vnez %v8157_v13 }
 0x874   :  { %2981 = vmax.xlane.f32.xlu0 %v2974_v52  ;;  %v3229_v0 = vsel %vm8231_vm14, %v6858_v47, -3.4028235e+38 }
 0x875   :  { %v2930_v43 = vpop.xlane.xlu0 %2929  ;;  %2979 = vmax.xlane.f32.xlu1 %v2973_v17 }
 0x876   :  { %v2936_v37 = vsel %vm8222_vm8, %v2930_v43, %v2920_v49  ;;  %v2928_v44 = vpop.xlane.xlu1 %2927 }
 0x877   :  { %v2935_v54 = vsel %vm8222_vm8, %v2928_v44, %v2919_v28  ;;  %vm8226_vm8 = vnez %v7980_v29  ;;  %v3037_v28 = vsel %vm8136_vm9, %v6858_v47, -3.4028235e+38  ;;  %v3054_v44 = vsel %vm8210_vm10, %v6855_v39, -3.4028235e+38 }
 0x878   :  { %2997 = vmax.xlane.f32.xlu0 %v2990_v46  ;;  %v3006_v57 = vsel %vm8226_vm8, %v6855_v39, -3.4028235e+38  ;;  %v3005_v25 = vsel %vm8226_vm8, %v6858_v47, -3.4028235e+38 }
 0x879   :  { %v2946_v60 = vpop.xlane.xlu0 %2945  ;;  %2995 = vmax.xlane.f32.xlu1 %v2989_v31 }
 0x87a   :  { %v2952_v33 = vsel %vm8223_vm7, %v2946_v60, %v2936_v37  ;;  %v2944_v21 = vpop.xlane.xlu1 %2943  ;;  %v3070_v60 = vsel %vm8139_vm1, %v6855_v39, -3.4028235e+38 }
 0x87b   :  { %v2951_v6 = vsel %vm8223_vm7, %v2944_v21, %v2935_v54  ;;  %v3053_v54 = vsel %vm8210_vm10, %v6858_v47, -3.4028235e+38  ;;  %vm8230_vm7 = vnez %v8154_v2 }
 0x87c   :  { %3013 = vmax.xlane.f32.xlu0 %v3006_v57  ;;  %v3086_v57 = vsel %vm8141_vm0, %v6855_v39, -3.4028235e+38 }
 0x87d   :  { %v2962_v3 = vpop.xlane.xlu0 %2961  ;;  %3011 = vmax.xlane.f32.xlu1 %v3005_v25  ;;  %v3085_v25 = vsel %vm8141_vm0, %v6858_v47, -3.4028235e+38 }
 0x87e   :  { %v2968_v59 = vsel %vm8224_vm4, %v2962_v3, %v2952_v33  ;;  %v2960_v7 = vpop.xlane.xlu1 %2959  ;;  %v3069_v33 = vsel %vm8139_vm1, %v6858_v47, -3.4028235e+38 }
 0x87f   :  { %v2967_v53 = vsel %vm8224_vm4, %v2960_v7, %v2951_v6  ;;  %v3102_v7 = vsel %vm8143_vm11, %v6855_v39, -3.4028235e+38  ;;  %vm8229_vm4 = vnez %v8153_v61 }
 0x880   :  { %3029 = vmax.xlane.f32.xlu0 %v3022_v20 }
 0x881   :  { %v2978_v26 = vpop.xlane.xlu0 %2977  ;;  %3027 = vmax.xlane.f32.xlu1 %v3021_v56 }
 0x882   :  { %v2984_v23 = vsel %vm8225_vm2, %v2978_v26, %v2968_v59  ;;  %v2976_v38 = vpop.xlane.xlu1 %2975  ;;  %v3118_v26 = vsel %vm8083_vm12, %v6855_v39, -3.4028235e+38 }
 0x883   :  { %v2983_v49 = vsel %vm8225_vm2, %v2976_v38, %v2967_v53  ;;  %v3101_v53 = vsel %vm8143_vm11, %v6858_v47, -3.4028235e+38  ;;  %vm8228_vm2 = vnez %v8151_v18 }
 0x884   :  { %3045 = vmax.xlane.f32.xlu0 %v3038_v14  ;;  %v3134_v14 = vsel %vm8146_vm5, %v6855_v39, -3.4028235e+38 }
 0x885   :  { %v2994_v52 = vpop.xlane.xlu0 %2993  ;;  %3043 = vmax.xlane.f32.xlu1 %v3037_v28  ;;  %v3133_v28 = vsel %vm8146_vm5, %v6858_v47, -3.4028235e+38 }
 0x886   :  { %v7172_v17 = vsel %vm8206_vm13, %v2994_v52, %v2984_v23  ;;  %v2992_v43 = vpop.xlane.xlu1 %2991  ;;  %v3117_v23 = vsel %vm8083_vm12, %v6858_v47, -3.4028235e+38 }
 0x887   :  { %v7176_v37 = vsel %vm8206_vm13, %v2992_v43, %v2983_v49  ;;  %vm8227_vm13 = vnez %v8150_v19 }
 0x888   :  { %3061 = vmax.xlane.f32.xlu0 %v3054_v44  ;;  %v3150_v44 = vsel %vm8086_vm15, %v6855_v39, -3.4028235e+38 }
 0x889   :  { %v7184_v46 = vpop.xlane.xlu0 %3009  ;;  %3059 = vmax.xlane.f32.xlu1 %v3053_v54  ;;  %v3149_v54 = vsel %vm8086_vm15, %v6858_v47, -3.4028235e+38 }
 0x88a   :  { %v7186_v31 = vpop.xlane.xlu1 %3007 }
 0x88c   :  { %3077 = vmax.xlane.f32.xlu0 %v3070_v60 }
 0x88d   :  { %v7194_v21 = vpop.xlane.xlu0 %3025  ;;  %3075 = vmax.xlane.f32.xlu1 %v3069_v33 }
 0x88e   :  { %v7196_v6 = vpop.xlane.xlu1 %3023 }
 0x890   :  { %3093 = vmax.xlane.f32.xlu0 %v3086_v57  ;;  %v3166_v57 = vsel %vm8227_vm13, %v6855_v39, -3.4028235e+38 }
 0x891   :  { %v7204_v3 = vpop.xlane.xlu0 %3041  ;;  %3091 = vmax.xlane.f32.xlu1 %v3085_v25  ;;  %v3165_v25 = vsel %vm8227_vm13, %v6858_v47, -3.4028235e+38 }
 0x892   :  { %v7206_v59 = vpop.xlane.xlu1 %3039 }
 0x894   :  { %3109 = vmax.xlane.f32.xlu0 %v3102_v7 }
 0x895   :  { %v7214_v20 = vpop.xlane.xlu0 %3057  ;;  %3107 = vmax.xlane.f32.xlu1 %v3101_v53 }
 0x896   :  { %v7216_v56 = vpop.xlane.xlu1 %3055 }
 0x898   :  { %3125 = vmax.xlane.f32.xlu0 %v3118_v26  ;;  %v3182_v26 = vsel %vm8228_vm2, %v6855_v39, -3.4028235e+38 }
 0x899   :  { %v7224_v38 = vpop.xlane.xlu0 %3073  ;;  %3123 = vmax.xlane.f32.xlu1 %v3117_v23  ;;  %v3181_v23 = vsel %vm8228_vm2, %v6858_v47, -3.4028235e+38 }
 0x89a   :  { %v7226_v49 = vpop.xlane.xlu1 %3071 }
 0x89c   :  { %3141 = vmax.xlane.f32.xlu0 %v3134_v14 }
 0x89d   :  { %v7234_v52 = vpop.xlane.xlu0 %3089  ;;  %3139 = vmax.xlane.f32.xlu1 %v3133_v28 }
 0x89e   :  { %v7236_v43 = vpop.xlane.xlu1 %3087 }
 0x8a0   :  { %3157 = vmax.xlane.f32.xlu0 %v3150_v44  ;;  %v3198_v44 = vsel %vm8229_vm4, %v6855_v39, -3.4028235e+38 }
 0x8a1   :  { %v7244_v60 = vpop.xlane.xlu0 %3105  ;;  %3155 = vmax.xlane.f32.xlu1 %v3149_v54  ;;  %v3197_v54 = vsel %vm8229_vm4, %v6858_v47, -3.4028235e+38 }
 0x8a2   :  { %v7246_v33 = vpop.xlane.xlu1 %3103 }
 0x8a4   :  { %3173 = vmax.xlane.f32.xlu0 %v3166_v57 }
 0x8a5   :  { %v7254_v7 = vpop.xlane.xlu0 %3121  ;;  %3171 = vmax.xlane.f32.xlu1 %v3165_v25 }
 0x8a6   :  { %v7256_v53 = vpop.xlane.xlu1 %3119 }
 0x8a8   :  { %3189 = vmax.xlane.f32.xlu0 %v3182_v26  ;;  %v3214_v26 = vsel %vm8230_vm7, %v6855_v39, -3.4028235e+38 }
 0x8a9   :  { %v7264_v14 = vpop.xlane.xlu0 %3137  ;;  %3187 = vmax.xlane.f32.xlu1 %v3181_v23  ;;  %v3213_v23 = vsel %vm8230_vm7, %v6858_v47, -3.4028235e+38  ;;  %vm8235_vm7 = vnez %v8161_v35 }
 0x8aa   :  { %v7266_v28 = vpop.xlane.xlu1 %3135 }
 0x8ac   :  { %3205 = vmax.xlane.f32.xlu0 %v3198_v44 }
 0x8ad   :  { %v7274_v57 = vpop.xlane.xlu0 %3153  ;;  %3203 = vmax.xlane.f32.xlu1 %v3197_v54  ;;  %v3230_v54 = vsel %vm8231_vm14, %v6855_v39, -3.4028235e+38  ;;  %vm8233_vm14 = vnez %v8159_v22 }
 0x8ae   :  { %v7276_v25 = vpop.xlane.xlu1 %3151  ;;  %v3261_v58 = vsel %vm8233_vm14, %v6858_v47, -3.4028235e+38 }
 0x8b0   :  { %3221 = vmax.xlane.f32.xlu0 %v3214_v26 }
 0x8b1   :  { %v7284_v45 = vpop.xlane.xlu0 %3169  ;;  %3219 = vmax.xlane.f32.xlu1 %v3213_v23  ;;  %v3246_v23 = vsel %vm8232_vm3, %v6855_v39, -3.4028235e+38  ;;  %vm8234_vm3 = vnez %v8160_v42 }
 0x8b2   :  { %v7286_v44 = vpop.xlane.xlu1 %3167  ;;  %v3278_v9 = vsel %vm8234_vm3, %v6855_v39, -3.4028235e+38 }
 0x8b4   :  { %3237 = vmax.xlane.f32.xlu0 %v3230_v54 }
 0x8b5   :  { %v7294_v41 = vpop.xlane.xlu0 %3185  ;;  %3235 = vmax.xlane.f32.xlu1 %v3229_v0  ;;  %v3262_v0 = vsel %vm8233_vm14, %v6855_v39, -3.4028235e+38  ;;  %vm8236_vm14 = vnez %v8162_v10 }
 0x8b6   :  { %v7296_v26 = vpop.xlane.xlu1 %3183 }
 0x8b8   :  { %3253 = vmax.xlane.f32.xlu0 %v3246_v23 }
 0x8b9   :  { %v7304_v11 = vpop.xlane.xlu0 %3201  ;;  %3251 = vmax.xlane.f32.xlu1 %v3245_v12  ;;  %v3277_v12 = vsel %vm8234_vm3, %v6858_v47, -3.4028235e+38 }
 0x8ba   :  { %v7306_v54 = vpop.xlane.xlu1 %3199 }
 0x8bc   :  { %3269 = vmax.xlane.f32.xlu0 %v3262_v0  ;;  %v3294_v0 = vsel %vm8235_vm7, %v6855_v39, -3.4028235e+38 }
 0x8bd   :  { %v3218_v55 = vpop.xlane.xlu0 %3217  ;;  %3267 = vmax.xlane.f32.xlu1 %v3261_v58  ;;  %v3293_v58 = vsel %vm8235_vm7, %v6858_v47, -3.4028235e+38 }
 0x8be   :  { %v3216_v23 = vpop.xlane.xlu1 %3215 }
 0x8c0   :  { %3285 = vmax.xlane.f32.xlu0 %v3278_v9  ;;  %v3310_v9 = vsel %vm8236_vm14, %v6855_v39, -3.4028235e+38 }
 0x8c1   :  { %v3234_v30 = vpop.xlane.xlu0 %3233  ;;  %3283 = vmax.xlane.f32.xlu1 %v3277_v12  ;;  %v3309_v12 = vsel %vm8236_vm14, %v6858_v47, -3.4028235e+38  ;;  %vm8237_vm14 = vnez %v8164_v51 }
 0x8c2   :  { %v3232_v15 = vpop.xlane.xlu1 %3231 }
 0x8c4   :  { %3301 = vmax.xlane.f32.xlu0 %v3294_v0  ;;  %v3016_v0 = vsel %vm8226_vm8, %v7184_v46, %v7172_v17  ;;  %v3326_v46 = vsel %vm8237_vm14, %v6855_v39, -3.4028235e+38 }
 0x8c5   :  { %v3250_v48 = vpop.xlane.xlu0 %3249  ;;  %3299 = vmax.xlane.f32.xlu1 %v3293_v58  ;;  %v3015_v58 = vsel %vm8226_vm8, %v7186_v31, %v7176_v37 }
 0x8c6   :  { %v3248_v63 = vpop.xlane.xlu1 %3247  ;;  %v3031_v10 = vsel %vm8208_vm6, %v7196_v6, %v3015_v58 }
 0x8c7   :  { %v3047_v37 = vsel %vm8136_vm9, %v7206_v59, %v3031_v10 }
 0x8c8   :  { %3317 = vmax.xlane.f32.xlu0 %v3310_v9  ;;  %v3032_v9 = vsel %vm8208_vm6, %v7194_v21, %v3016_v0  ;;  %v3325_v21 = vsel %vm8237_vm14, %v6858_v47, -3.4028235e+38  ;;  %v3063_v6 = vsel %vm8210_vm10, %v7216_v56, %v3047_v37 }
 0x8c9   :  { %v3266_v50 = vpop.xlane.xlu0 %3265  ;;  %3315 = vmax.xlane.f32.xlu1 %v3309_v12  ;;  %v3048_v17 = vsel %vm8136_vm9, %v7204_v3, %v3032_v9  ;;  %v3079_v10 = vsel %vm8139_vm1, %v7226_v49, %v3063_v6  ;;  %v8243_v6 = vld [vmem:[#allocation33_spill] sm:$0xff] }
 0x8ca   :  { %v3264_v8 = vpop.xlane.xlu1 %3263  ;;  %v3064_v31 = vsel %vm8210_vm10, %v7214_v20, %v3048_v17  ;;  %v3095_v0 = vsel %vm8141_vm0, %v7236_v43, %v3079_v10  ;;  %vm8238_vm10 = vnez %v8166_v1 }
 0x8cb   :  { %v3080_v3 = vsel %vm8139_vm1, %v7224_v38, %v3064_v31  ;;  %v3342_v38 = vsel %vm8238_vm10, %v6855_v39, -3.4028235e+38  ;;  %v3111_v49 = vsel %vm8143_vm11, %v7246_v33, %v3095_v0  ;;  %v3341_v43 = vsel %vm8238_vm10, %v6858_v47, -3.4028235e+38 }
 0x8cc   :  { %3333 = vmax.xlane.f32.xlu0 %v3326_v46  ;;  %v3096_v59 = vsel %vm8141_vm0, %v7234_v52, %v3080_v3 }
 0x8cd   :  { %v3282_v12 = vpop.xlane.xlu0 %3281  ;;  %3331 = vmax.xlane.f32.xlu1 %v3325_v21  ;;  %v3112_v56 = vsel %vm8143_vm11, %v7244_v60, %v3096_v59  ;;  %v3127_v60 = vsel %vm8083_vm12, %v7256_v53, %v3111_v49 }
 0x8ce   :  { %v3280_v20 = vpop.xlane.xlu1 %3279  ;;  %v3128_v52 = vsel %vm8083_vm12, %v7254_v7, %v3112_v56  ;;  %v3143_v33 = vsel %vm8146_vm5, %v7266_v28, %v3127_v60 }
 0x8cf   :  { %v3144_v39 = vsel %vm8146_vm5, %v7264_v14, %v3128_v52  ;;  %v3159_v47 = vsel %vm8086_vm15, %v7276_v25, %v3143_v33 }
 0x8d0   :  { %3349 = vmax.xlane.f32.xlu0 %v3342_v38  ;;  %v3160_v7 = vsel %vm8086_vm15, %v7274_v57, %v3144_v39  ;;  %v3175_v14 = vsel %vm8227_vm13, %v7286_v44, %v3159_v47  ;;  %vm8239_vm15 = vnez %v8154_v2  ;;  %v8246_v39 = vld [vmem:[#allocation5_spill] sm:$0xff] }
 0x8d1   :  { %v3298_v58 = vpop.xlane.xlu0 %3297  ;;  %3347 = vmax.xlane.f32.xlu1 %v3341_v43  ;;  %v3176_v53 = vsel %vm8227_vm13, %v7284_v45, %v3160_v7  ;;  %v3191_v57 = vsel %vm8228_vm2, %v7296_v26, %v3175_v14  ;;  %vm8240_vm13 = vnez %v8157_v13  ;;  %v3363_v14 = vld [vmem:[%s7701_s4 + $0xe0] sm:$0xff] }
 0x8d2   :  { %v3296_v9 = vpop.xlane.xlu1 %3295  ;;  %v3192_v28 = vsel %vm8228_vm2, %v7294_v41, %v3176_v53  ;;  %v3207_v45 = vsel %vm8229_vm4, %v7306_v54, %v3191_v57  ;;  %vm8241_vm2 = vnez %v8158_v32 }
 0x8d3   :  { %v3208_v25 = vsel %vm8229_vm4, %v7304_v11, %v3192_v28  ;;  %v3223_v41 = vsel %vm8239_vm15, %v3216_v23, %v3207_v45  ;;  %vm8242_vm4 = vnez %v8159_v22 }
 0x8d4   :  { %v3224_v44 = vsel %vm8239_vm15, %v3218_v55, %v3208_v25  ;;  %v3239_v26 = vsel %vm8240_vm13, %v3232_v15, %v3223_v41  ;;  %v8251_v25 = vld [vmem:[#allocation6_spill] sm:$0xff]  ;;  %v8253_v41 = vld [vmem:[#allocation9_spill] sm:$0xff] }
 0x8d5   :  { %v3314_v17 = vpop.xlane.xlu0 %3313  ;;  %v3240_v37 = vsel %vm8240_vm13, %v3234_v30, %v3224_v44  ;;  %v3255_v31 = vsel %vm8241_vm2, %v3248_v63, %v3239_v26 }
 0x8d6   :  { %v3312_v46 = vpop.xlane.xlu1 %3311  ;;  %v3256_v11 = vsel %vm8241_vm2, %v3250_v48, %v3240_v37  ;;  %v3271_v21 = vsel %vm8242_vm4, %v3264_v8, %v3255_v31  ;;  %vm8244_vm2 = vnez %v8243_v6 }
 0x8d7   :  { %v3272_v54 = vsel %vm8242_vm4, %v3266_v50, %v3256_v11  ;;  %v3287_v15 = vsel %vm8234_vm3, %v3280_v20, %v3271_v21 }
 0x8d8   :  { %v3288_v23 = vsel %vm8234_vm3, %v3282_v12, %v3272_v54  ;;  %v3303_v63 = vsel %vm8235_vm7, %v3296_v9, %v3287_v15  ;;  %v8248_v9 = vld [vmem:[#allocation4_spill] sm:$0xff]  ;;  %v8255_v54 = vld [vmem:[#allocation11_spill] sm:$0xff] }
 0x8d9   :  { %v3330_v55 = vpop.xlane.xlu0 %3329  ;;  %v3304_v48 = vsel %vm8235_vm7, %v3298_v58, %v3288_v23  ;;  %v3319_v3 = vsel %vm8244_vm2, %v3312_v46, %v3303_v63  ;;  %vm8252_vm7 = vnez %v8251_v25  ;;  %v8257_v15 = vld [vmem:[#allocation12_spill] sm:$0xff] }
 0x8da   :  { %v3328_v30 = vpop.xlane.xlu1 %3327  ;;  %v3320_v50 = vsel %vm8244_vm2, %v3314_v17, %v3304_v48  ;;  %vm8247_vm2 = vnez %v8246_v39  ;;  %v4729_v39 = vld [vmem:[%s7700_s5 + $0x8] sm:$0xff] }
 0x8db   :  { %v3336_v8 = vsel %vm8237_vm14, %v3330_v55, %v3320_v50  ;;  %v3335_v10 = vsel %vm8237_vm14, %v3328_v30, %v3319_v3  ;;  %vm8249_vm14 = vnez %v8248_v9 }
 0x8dd   :  { %v3346_v12 = vpop.xlane.xlu0 %3345 }
 0x8de   :  { %v3352_v59 = vsel %vm8238_vm10, %v3346_v12, %v3336_v8  ;;  %v3344_v20 = vpop.xlane.xlu1 %3343  ;;  %v8259_v8 = vld [vmem:[#allocation13_spill] sm:$0xff] }
 0x8df   :  { %v3368_v0 = vmax.f32 %v3352_v59, 0.0  ;;  %v3351_v56 = vsel %vm8238_vm10, %v3344_v20, %v3335_v10  ;;  %vm8250_vm10 = vcmask 261120  }
 0x8e0   :  { %v3367_v38 = vmax.f32 %v3351_v56, 0.0  ;;  %v7460_v49 = vpack.c.bf16 %v3352_v59, %v3351_v56  ;;  %4398 = vmatprep.mubr.msk.f32.mxu0 %vm8250_vm10, %v3363_v14  ;;  %vm8258_vm10 = vnez %v8257_v15 }
 0x8e1   :  { %v2854_v52 = vpop.xlane.xlu0 %2853 }
 0x8e2   :  { %8245 = vst [vmem:[#allocation50_spill] sm:$0xff] %v7460_v49  ;;  %v2852_v43 = vpop.xlane.xlu1 %2851  ;;  %v4558_v60 = vpack.c.bf16 %v3368_v0, %v3367_v38  ;;  %v2858_v58 = vsel %vm8247_vm2, %v2854_v52, 0.0  ;;  %v8261_v0 = vld [vmem:[#allocation14_spill] sm:$0xff]  ;;  %v4745_v52 = vmov 5  }
 0x8e3   :  { %v2857_v7 = vsel %vm8247_vm2, %v2852_v43, 0.0  ;;  %vm8254_vm2 = vnez %v8253_v41  ;;  %4686 = vset.pattern.permute.xlu1 %v4745_v52  ;;  %4687 = vset.pattern.permute.xlu0 %v4745_v52 }
 0x8e4   :  { %4559 = vmatprep.subr.bf16.mxu0 %v4558_v60 }
 0x8e5   :  { %v2870_v33 = vpop.xlane.xlu0 %2869  ;;  %4561 = vmatpush3.bf16.msra.mxu0 %v4558_v60  ;;  %v4728_v60 = vld [vmem:[%s7700_s5] sm:$0xff] }
 0x8e6   :  { %v2874_v47 = vsel %vm8249_vm14, %v2870_v33, %v2858_v58  ;;  %v2868_v53 = vpop.xlane.xlu1 %2867  ;;  %3566 = vperm.xlu1 %4686, %v4728_v60   ;;  %3570 = vperm.xlu0 %4687, %v4729_v39   ;;  %v8263_v33 = vld [vmem:[#allocation15_spill] sm:$0xff] }
 0x8e7   :  { %v2873_v28 = vsel %vm8249_vm14, %v2868_v53, %v2857_v7  ;;  %vm8256_vm14 = vnez %v8255_v54  ;;  %v4730_v53 = vld [vmem:[%s7700_s5 + $0x10] sm:$0xff] }
 0x8e9   :  { %v2886_v57 = vpop.xlane.xlu0 %2885 }
 0x8ea   :  { %v2890_v17 = vsel %vm8252_vm7, %v2886_v57, %v2874_v47  ;;  %v2884_v45 = vpop.xlane.xlu1 %2883  ;;  %3574 = vperm.xlu1 %4686, %v4730_v53  }
 0x8eb   :  { %v2889_v44 = vsel %vm8252_vm7, %v2884_v45, %v2873_v28  ;;  %vm8260_vm7 = vnez %v8259_v8  ;;  %v8265_v28 = vld [vmem:[#allocation16_spill] sm:$0xff]  ;;  %v4731_v45 = vld [vmem:[%s7700_s5 + $0x18] sm:$0xff] }
 0x8ed   :  { %v2902_v46 = vpop.xlane.xlu0 %2901 }
 0x8ee   :  { %v2906_v37 = vsel %vm8254_vm2, %v2902_v46, %v2890_v17  ;;  %v2900_v26 = vpop.xlane.xlu1 %2899  ;;  %3578 = vperm.xlu1 %4686, %v4731_v45  }
 0x8ef   :  { %v2905_v11 = vsel %vm8254_vm2, %v2900_v26, %v2889_v44  ;;  %vm8262_vm2 = vnez %v8261_v0 }
 0x8f1   :  { %v2918_v31 = vpop.xlane.xlu0 %2917 }
 0x8f2   :  { %v2922_v55 = vsel %vm8256_vm14, %v2918_v31, %v2906_v37  ;;  %v2916_v21 = vpop.xlane.xlu1 %2915 }
 0x8f3   :  { %v2921_v23 = vsel %vm8256_vm14, %v2916_v21, %v2905_v11  ;;  %vm8264_vm14 = vnez %v8263_v33 }
 0x8f5   :  { %v2934_v30 = vpop.xlane.xlu0 %2933 }
 0x8f6   :  { %v2938_v48 = vsel %vm8258_vm10, %v2934_v30, %v2922_v55  ;;  %v2932_v63 = vpop.xlane.xlu1 %2931 }
 0x8f7   :  { %v2937_v50 = vsel %vm8258_vm10, %v2932_v63, %v2921_v23  ;;  %vm8266_vm10 = vnez %v8265_v28 }
 0x8f9   :  { %v2950_v3 = vpop.xlane.xlu0 %2949 }
 0x8fa   :  { %v2954_v12 = vsel %vm8260_vm7, %v2950_v3, %v2938_v48  ;;  %v2948_v10 = vpop.xlane.xlu1 %2947 }
 0x8fb   :  { %v2953_v59 = vsel %vm8260_vm7, %v2948_v10, %v2937_v50  ;;  %vm8267_vm7 = vnez %v7986_v24 }
 0x8fd   :  { %v2966_v20 = vpop.xlane.xlu0 %2965 }
 0x8fe   :  { %v2970_v56 = vsel %vm8262_vm2, %v2966_v20, %v2954_v12  ;;  %v2964_v38 = vpop.xlane.xlu1 %2963 }
 0x8ff   :  { %v2969_v43 = vsel %vm8262_vm2, %v2964_v38, %v2953_v59 }
 0x901   :  { %v2982_v58 = vpop.xlane.xlu0 %2981 }
 0x902   :  { %v2986_v7 = vsel %vm8264_vm14, %v2982_v58, %v2970_v56  ;;  %v2980_v9 = vpop.xlane.xlu1 %2979 }
 0x903   :  { %v2985_v47 = vsel %vm8264_vm14, %v2980_v9, %v2969_v43 }
 0x905   :  { %v2998_v14 = vpop.xlane.xlu0 %2997 }
 0x906   :  { %v3002_v57 = vsel %vm8266_vm10, %v2998_v14, %v2986_v7  ;;  %v2996_v25 = vpop.xlane.xlu1 %2995 }
 0x907   :  { %v3001_v17 = vsel %vm8266_vm10, %v2996_v25, %v2985_v47 }
 0x909   :  { %v3014_v44 = vpop.xlane.xlu0 %3013 }
 0x90a   :  { %v3012_v46 = vpop.xlane.xlu1 %3011  ;;  %v3018_v9 = vsel %vm8226_vm8, %v3014_v44, %v3002_v57 }
 0x90b   :  { %v3017_v53 = vsel %vm8226_vm8, %v3012_v46, %v3001_v17  ;;  %vm8271_vm8 = vnez %v8153_v61 }
 0x90d   :  { %v3030_v41 = vpop.xlane.xlu0 %3029 }
 0x90e   :  { %v3028_v37 = vpop.xlane.xlu1 %3027  ;;  %v3034_v14 = vsel %vm8208_vm6, %v3030_v41, %v3018_v9  ;;  %v3355_v9 = vld [vmem:[%s7701_s4 + $0xc0] sm:$0xff] }
 0x90f   :  { %v3033_v25 = vsel %vm8208_vm6, %v3028_v37, %v3017_v53  ;;  %v8283_v53 = vld [vmem:[#allocation50_spill] sm:$0xff] }
 0x911   :  { %v3046_v26 = vpop.xlane.xlu0 %3045 }
 0x912   :  { %v3044_v11 = vpop.xlane.xlu1 %3043  ;;  %v3050_v45 = vsel %vm8136_vm9, %v3046_v26, %v3034_v14  ;;  %v3357_v14 = vld [vmem:[%s7701_s4 + $0xd0] sm:$0xff] }
 0x913   :  { %v3049_v49 = vsel %vm8136_vm9, %v3044_v11, %v3033_v25  ;;  %vm8270_vm9 = vnez %v8151_v18  ;;  %v3587_v25 = vld [vmem:[%s7701_s4 + $0x120] sm:$0xff] }
 0x915   :  { %v3062_v31 = vpop.xlane.xlu0 %3061 }
 0x916   :  { %v3060_v54 = vpop.xlane.xlu1 %3059  ;;  %v3066_v57 = vsel %vm8267_vm7, %v3062_v31, %v3050_v45  ;;  %v3588_v45 = vld [vmem:[%s7701_s4 + $0x128] sm:$0xff] }
 0x917   :  { %v3065_v29 = vsel %vm8267_vm7, %v3060_v54, %v3049_v49 }
 0x919   :  { %v3078_v55 = vpop.xlane.xlu0 %3077 }
 0x91a   :  { %v3076_v21 = vpop.xlane.xlu1 %3075  ;;  %v3082_v17 = vsel %vm8139_vm1, %v3078_v55, %v3066_v57  ;;  %v8288_v57 = vld [vmem:[#allocation44_spill] sm:$0xff] }
 0x91b   :  { %v3081_v4 = vsel %vm8139_vm1, %v3076_v21, %v3065_v29  ;;  %vm8268_vm1 = vnez %v8147_v16  ;;  %v8290_v29 = vld [vmem:[#allocation48_spill] sm:$0xff] }
 0x91d   :  { %v3094_v23 = vpop.xlane.xlu0 %3093 }
 0x91e   :  { %v3092_v30 = vpop.xlane.xlu1 %3091  ;;  %v3098_v46 = vsel %vm8141_vm0, %v3094_v23, %v3082_v17  ;;  %v3585_v17 = vld [vmem:[%s7701_s4 + $0x110] sm:$0xff] }
 0x91f   :  { %v3097_v5 = vsel %vm8141_vm0, %v3092_v30, %v3081_v4  ;;  %vm8274_vm0 = vnez %v8243_v6  ;;  %v3364_v6 = vld [vmem:[%s7701_s4 + $0xe8] sm:$0xff]  ;;  %v3751_v4 = vld [vmem:[%s7701_s4 + $0x100] sm:$0xff] }
 0x921   :  { %v3110_v15 = vpop.xlane.xlu0 %3109 }
 0x922   :  { %v3108_v48 = vpop.xlane.xlu1 %3107  ;;  %v3114_v37 = vsel %vm8143_vm11, %v3110_v15, %v3098_v46  ;;  %v3840_v46 = vld [vmem:[%s7700_s5] sm:$0xff] }
 0x923   :  { %v3113_v24 = vsel %vm8143_vm11, %v3108_v48, %v3097_v5  ;;  %vm8269_vm11 = vnez %v8150_v19 }
 0x925   :  { %v3126_v63 = vpop.xlane.xlu0 %3125 }
 0x926   :  { %v3124_v50 = vpop.xlane.xlu1 %3123  ;;  %v3130_v49 = vsel %vm8083_vm12, %v3126_v63, %v3114_v37  ;;  %v4733_v37 = vld [vmem:[%s7702_s1] ss:$0 sm:$0xff] }
 0x927   :  { %v3129_v36 = vsel %vm8083_vm12, %v3124_v50, %v3113_v24  ;;  %vm8272_vm12 = vnez %v8158_v32  ;;  %v4746_v24 = vmov 6  }
 0x928   :  { %4688 = vset.pattern.permute.xlu1 %v4746_v24  ;;  %4689 = vset.pattern.permute.xlu0 %v4746_v24 }
 0x929   :  { %v3142_v3 = vpop.xlane.xlu0 %3141  ;;  %3844 = vperm.xlu1 %4688, %v3840_v46  }
 0x92a   :  { %v3140_v8 = vpop.xlane.xlu1 %3139  ;;  %v3146_v26 = vsel %vm8146_vm5, %v3142_v3, %v3130_v49 }
 0x92b   :  { %v3145_v62 = vsel %vm8146_vm5, %v3140_v8, %v3129_v36  ;;  %vm8273_vm5 = vnez %v8161_v35 }
 0x92d   :  { %v3158_v12 = vpop.xlane.xlu0 %3157 }
 0x92e   :  { %v3156_v10 = vpop.xlane.xlu1 %3155  ;;  %v3162_v31 = vsel %vm8268_vm1, %v3158_v12, %v3146_v26  ;;  %v3841_v26 = vld [vmem:[%s7700_s5 + $0x8] sm:$0xff] }
 0x92f   :  { %v3161_v27 = vsel %vm8268_vm1, %v3156_v10, %v3145_v62  ;;  %3849 = vperm.xlu1 %4688, %v3841_v26  }
 0x931   :  { %v3174_v59 = vpop.xlane.xlu0 %3173 }
 0x932   :  { %v3172_v20 = vpop.xlane.xlu1 %3171  ;;  %v3178_v55 = vsel %vm8269_vm11, %v3174_v59, %v3162_v31 }
 0x933   :  { %v3177_v34 = vsel %vm8269_vm11, %v3172_v20, %v3161_v27 }
 0x935   :  { %v3190_v0 = vpop.xlane.xlu0 %3189 }
 0x936   :  { %v3188_v56 = vpop.xlane.xlu1 %3187  ;;  %v3194_v21 = vsel %vm8270_vm9, %v3190_v0, %v3178_v55 }
 0x937   :  { %v3193_v40 = vsel %vm8270_vm9, %v3188_v56, %v3177_v34 }
 0x939   :  { %v3206_v38 = vpop.xlane.xlu0 %3205 }
 0x93a   :  { %v3204_v52 = vpop.xlane.xlu1 %3203  ;;  %v3210_v23 = vsel %vm8271_vm8, %v3206_v38, %v3194_v21 }
 0x93b   :  { %v3209_v16 = vsel %vm8271_vm8, %v3204_v52, %v3193_v40 }
 0x93d   :  { %v3222_v43 = vpop.xlane.xlu0 %3221 }
 0x93e   :  { %v3220_v60 = vpop.xlane.xlu1 %3219  ;;  %v3226_v15 = vsel %vm8239_vm15, %v3222_v43, %v3210_v23 }
 0x93f   :  { %v3225_v19 = vsel %vm8239_vm15, %v3220_v60, %v3209_v16  ;;  %vm8276_vm15 = vnez %v8166_v1  ;;  %v3366_v1 = vld [vmem:[%s7701_s4 + $0xf8] sm:$0xff] }
 0x941   :  { %v3238_v39 = vpop.xlane.xlu0 %3237 }
 0x942   :  { %v3236_v58 = vpop.xlane.xlu1 %3235  ;;  %v3242_v63 = vsel %vm8240_vm13, %v3238_v39, %v3226_v15 }
 0x943   :  { %v3241_v18 = vsel %vm8240_vm13, %v3236_v58, %v3225_v19 }
 0x945   :  { %v3254_v33 = vpop.xlane.xlu0 %3253 }
 0x946   :  { %v3252_v7 = vpop.xlane.xlu1 %3251  ;;  %v3258_v50 = vsel %vm8272_vm12, %v3254_v33, %v3242_v63  ;;  %v8277_v33 = vld [vmem:[#allocation46_spill] sm:$0xff] }
 0x947   :  { %v3257_v61 = vsel %vm8272_vm12, %v3252_v7, %v3241_v18  ;;  %v8280_v7 = vld [vmem:[#allocation49_spill] sm:$0xff] }
 0x949   :  { %v3270_v47 = vpop.xlane.xlu0 %3269 }
 0x94a   :  { %v3268_v28 = vpop.xlane.xlu1 %3267  ;;  %v3274_v3 = vsel %vm8242_vm4, %v3270_v47, %v3258_v50  ;;  %v3356_v47 = vld [vmem:[%s7701_s4 + $0xc8] sm:$0xff] }
 0x94b   :  { %v3273_v2 = vsel %vm8242_vm4, %v3268_v28, %v3257_v61  ;;  %vm8275_vm4 = vnez %v8164_v51  ;;  %v3365_v51 = vld [vmem:[%s7701_s4 + $0xf0] sm:$0xff]  ;;  %v3358_v28 = vld [vmem:[%s7701_s4 + $0xd8] sm:$0xff] }
 0x94d   :  { %v3286_v44 = vpop.xlane.xlu0 %3285 }
 0x94e   :  { %v3284_v41 = vpop.xlane.xlu1 %3283  ;;  %v3290_v12 = vsel %vm8234_vm3, %v3286_v44, %v3274_v3  ;;  %v3586_v44 = vld [vmem:[%s7701_s4 + $0x118] sm:$0xff]  ;;  %v3752_v3 = vld [vmem:[%s7701_s4 + $0x108] sm:$0xff] }
 0x94f   :  { %v3289_v13 = vsel %vm8234_vm3, %v3284_v41, %v3273_v2  ;;  %vm8278_vm3 = vcmask 261120   ;;  %v8294_v41 = vld [vmem:[#allocation2_spill] sm:$0xff] }
 0x950   :  { %vm8279_vm6 = vmmov %vm8278_vm3  ;;  %v3856_v5 = vadd.s32 8, %v8294_v41  ;;  %v3857_v49 = vadd.s32 16, %v8294_v41  ;;  %v3858_v36 = vadd.s32 24, %v8294_v41 }
 0x951   :  { %v3302_v11 = vpop.xlane.xlu0 %3301  ;;  %vm8281_vm13 = vmmov %vm8278_vm3 }
 0x952   :  { %v3300_v54 = vpop.xlane.xlu1 %3299  ;;  %v3306_v59 = vsel %vm8273_vm5, %v3302_v11, %v3290_v12  ;;  %vm8282_vm2 = vmmov %vm8278_vm3  ;;  %v4747_v11 = vmov 1.0|1.0  }
 0x953   :  { %v3305_v32 = vsel %vm8273_vm5, %v3300_v54, %v3289_v13  ;;  %vm8284_vm14 = vmmov %vm8282_vm2  ;;  %vm3863_vm5 = vcmp.eq.s32.totalorder %v8294_v41, %v4733_v37 }
 0x954   :  { %vm8285_vm10 = vmmov %vm8282_vm2 }
 0x955   :  { %v3318_v30 = vpop.xlane.xlu0 %3317  ;;  %vm8286_vm7 = vmmov %vm8282_vm2 }
 0x956   :  { %v3316_v48 = vpop.xlane.xlu1 %3315  ;;  %v3322_v20 = vsel %vm8274_vm0, %v3318_v30, %v3306_v59  ;;  %vm8287_vm1 = vmmov %vm8282_vm2 }
 0x957   :  { %v3321_v22 = vsel %vm8274_vm0, %v3316_v48, %v3305_v32  ;;  %vm8289_vm11 = vmmov %vm8287_vm1  ;;  %vm3864_vm0 = vcmp.eq.s32.totalorder %v3856_v5, %v4733_v37  ;;  %v3950_v32 = vld [vmem:[%s7702_s1 + $0x1] sm:$0x1]  ;;  %s4748_s1 = smov 112  }
 0x958   :  { %vm8291_vm9 = vmmov %vm8287_vm1 }
 0x959   :  { %v3334_v8 = vpop.xlane.xlu0 %3333  ;;  %vm8292_vm8 = vmmov %vm8287_vm1 }
 0x95a   :  { %v3332_v10 = vpop.xlane.xlu1 %3331  ;;  %v3338_v0 = vsel %vm8275_vm4, %v3334_v8, %v3322_v20  ;;  %vm8293_vm12 = vmmov %vm8287_vm1  ;;  %v3951_v20 = vcvt.s32.f32 %v3950_v32 }
 0x95b   :  { %v3337_v42 = vsel %vm8275_vm4, %v3332_v10, %v3321_v22  ;;  %vm4598_vm4 = vmpackc.low %vm3864_vm0, %vm3863_vm5 }
 0x95c   :  { %4599 = vmatprep.subr.msk.bf16.mxu1 %vm4598_vm4, %v4747_v11  ;;  %v3952_v22 = vmax.f32 %v3951_v20, 1.0 }
 0x95d   :  { %v3350_v56 = vpop.xlane.xlu0 %3349  ;;  %4601 = vmatpush3.bf16.xpose.msk.msra.mxu1 %vm4598_vm4, %v4747_v11 }
 0x95e   :  { %v3354_v38 = vsel %vm8276_vm15, %v3350_v56, %v3338_v0  ;;  %v3348_v52 = vpop.xlane.xlu1 %3347  ;;  %v8296_v0 = vld [vmem:[#allocation3_spill] sm:$0xff] }
 0x95f   :  { %v3370_v43 = vmax.f32 %v3354_v38, 0.0  ;;  %v3353_v35 = vsel %vm8276_vm15, %v3348_v52, %v3337_v42  ;;  %vm3865_vm15 = vcmp.eq.s32.totalorder %v3857_v49, %v4733_v37  ;;  %v3956_v56 = vrot.slane %v3952_v22, %v8296_v0 }
 0x960   :  { %v3369_v60 = vmax.f32 %v3353_v35, 0.0  ;;  %v4578_v39 = vpack.c.bf16 %v3354_v38, %v3353_v35 }
 0x961   :  { %4722 = vrcp.f32 %v3956_v56 }
 0x962   :  { %v4562_v58 = vpack.c.bf16 %v3370_v43, %v3369_v60 }
 0x964   :  { %4563 = vmatprep.subr.bf16.mxu0 %v4562_v58 }
 0x965   :  { %4565 = vmatpush3.bf16.msra.mxu0 %v4562_v58  ;;  %v3567_v62 = vpop.permute.xlu1 %3566  ;;  %v3571_v54 = vpop.permute.xlu0 %3570 }
 0x966   :  { %4567 = vmatprep.subr.bf16.mxu0 %v8277_v33 }
 0x968   :  { %4399 = vmatmul.mubr.msk.f32.vlgmr.msra.gmra.mrb[16].mxu0 %vm8278_vm3, %v3364_v6  ;;  %vm3866_vm3 = vcmp.eq.s32.totalorder %v3858_v36, %v4733_v37 }
 0x969   :  { %4569 = vmatpush3.bf16.msra.mxu0 %v8277_v33  ;;  %4401 = vmatprep.mubr.msk.f32.mxu0 %vm8279_vm6, %v3365_v51  ;;  %vm4602_vm6 = vmpackc.low %vm3866_vm3, %vm3865_vm15  ;;  %v3575_v31 = vpop.permute.xlu1 %3574 }
 0x96a   :  { %4571 = vmatprep.subr.bf16.mxu0 %v8280_v7  ;;  %4603 = vmatprep.subr.msk.bf16.mxu1 %vm4602_vm6, %v4747_v11 }
 0x96b   :  { %4605 = vmatpush3.bf16.xpose.msk.msra.mxu1 %vm4602_vm6, %v4747_v11  ;;  %v4723_v42 = vpop.eup %4722 }
 0x96c   :  { %4402 = vmatmul.mubr.msk.f32.gmra.mrb[18].mxu0 %vm8281_vm13, %v3366_v1  ;;  %vm8295_vm13 = vmmov %vm8287_vm1 }
 0x96d   :  { %4573 = vmatpush3.bf16.msra.mxu0 %v8280_v7  ;;  %4412 = vmatprep.mubr.msk.f32.mxu0 %vm8282_vm2, %v3355_v9  ;;  %v3579_v30 = vpop.permute.xlu1 %3578  ;;  %vm3960_vm2 = vcmask 130048  }
 0x96e   :  { %4575 = vmatprep.subr.bf16.mxu0 %v8283_v53 }
 0x970   :  { %4413 = vmatmul.mubr.msk.f32.vlgmr.msra.gmra.mrb[16].mxu0 %vm8284_vm14, %v3356_v47 }
 0x971   :  { %4577 = vmatpush3.bf16.msra.mxu0 %v8283_v53  ;;  %4415 = vmatprep.mubr.msk.f32.mxu0 %vm8285_vm10, %v3357_v14 }
 0x972   :  { %4579 = vmatprep.subr.bf16.mxu0 %v4578_v39 }
 0x974   :  { %4416 = vmatmul.mubr.msk.f32.gmra.mrb[18].mxu0 %vm8286_vm7, %v3358_v28 }
 0x975   :  { %4581 = vmatpush3.bf16.msra.mxu0 %v4578_v39  ;;  %4426 = vmatprep.mubr.msk.f32.mxu0 %vm8287_vm1, %v3587_v25 }
 0x976   :  { %4583 = vmatprep.subr.bf16.mxu0 %v8288_v57 }
 0x978   :  { %4427 = vmatmul.mubr.msk.f32.vlgmr.msra.gmra.mrb[20].mxu0 %vm8289_vm11, %v3588_v45 }
 0x979   :  { %4585 = vmatpush3.bf16.msra.mxu0 %v8288_v57  ;;  %4437 = vmatprep.mubr.msk.f32.mxu0 %vm8291_vm9, %v3585_v17 }
 0x97a   :  { %4587 = vmatprep.subr.bf16.mxu0 %v8290_v29 }
 0x97d   :  { %4589 = vmatpush3.bf16.msra.mxu0 %v8290_v29 }
 0x980   :  { %4438 = vmatmul.mubr.msk.f32.vlgmr.msra.gmra.mrb[20].mxu0 %vm8292_vm8, %v3586_v44 }
 0x981   :  { %4448 = vmatprep.mubr.msk.f32.mxu0 %vm8293_vm12, %v3751_v4 }
 0x9a8   :  { %v3845_v8 = vpop.permute.xlu1 %3844 }
 0x9ae   :  { %v3850_v10 = vpop.permute.xlu1 %3849 }
 0xa43   :  { %v4414_v27 = vpop.f32.mrb[16].mxu0 }
 0xa44   :  { %v3582_v55 = vadd.f32 %v4414_v27, %v3571_v54  ;;  %v3546_v34 = vpop.f32.mrb[17].mxu0 }
 0xa45   :  { %v3581_v21 = vadd.f32 %v3567_v62, %v3546_v34 }
 0xa46   :  { %v3754_v40 = vmax.f32 %v3582_v55, 0.0 }
 0xa47   :  { %v3753_v23 = vmax.f32 %v3581_v21, 0.0  ;;  %v4417_v16 = vpop.f32.mrb[18].mxu0 }
 0xa48   :  { %v3584_v15 = vadd.f32 %v4417_v16, %v3579_v30  ;;  %v3556_v48 = vpop.f32.mrb[19].mxu0 }
 0xa49   :  { %v4590_v19 = vpack.c.bf16 %v3754_v40, %v3753_v23  ;;  %v3583_v63 = vadd.f32 %v3575_v31, %v3556_v48 }
 0xa4a   :  { %v3756_v18 = vmax.f32 %v3584_v15, 0.0 }
 0xa4b   :  { %v3755_v50 = vmax.f32 %v3583_v63, 0.0  ;;  %4591 = vmatprep.subr.bf16.mxu0 %v4590_v19 }
 0xa4c   :  { %4593 = vmatpush3.bf16.msra.mxu0 %v4590_v19 }
 0xa4d   :  { %v4594_v61 = vpack.c.bf16 %v3756_v18, %v3755_v50 }
 0xa4f   :  { %4595 = vmatprep.subr.bf16.mxu0 %v4594_v61 }
 0xa50   :  { %4597 = vmatpush3.bf16.msra.mxu0 %v4594_v61 }
 0xa53   :  { %4449 = vmatmul.mubr.msk.f32.vlgmr.msra.gmra.mrb[20].mxu0 %vm8295_vm13, %v3752_v3 }
 0xb26   :  { %v4450_v2 = vpop.f32.mrb[20].mxu0 }
 0xb27   :  { %v3829_v12 = vpop.f32.mrb[21].mxu0  ;;  %v3853_v59 = vadd.f32 %v4450_v2, %v3850_v10 }
 0xb28   :  { %v3852_v13 = vadd.f32 %v3845_v8, %v3829_v12 }
 0xb2a   :  { %4459 = vmatprep.mubr.f32.mxu1 %v3852_v13 }
 0xb2b   :  { %4460 = vmatmul.mubr.f32.vlgmr.msra.gmra.mrb[16].mxu1 %v3853_v59 }
 0xbfe   :  { %v4461_v38 = vpop.f32.mrb[16].mxu1 }
 0xbff   :  { %v3959_v52 = vmul.f32 %v4723_v42, %v4461_v38  ;;  %v3941_v43 = vpop.f32.mrb[17].mxu1 }
 0xc00   :  { %v3958_v35 = vmul.f32 %v4723_v42, %v3941_v43 }
 0xc01   :  { %3962 = vst.msk [vmem:[%s7703_s6 + $0x8] sm:$0xff] %vm3960_vm2, %v3959_v52 }
 0xc02   :  { %3961 = vst.msk [vmem:[%s7703_s6] sm:$0xff] %vm3960_vm2, %v3958_v35  ;;  %3965 = vrot.lane.b32.xlu1 %v3958_v35, %s4748_s1 }
 0xc06   :  { %3967 = vrot.lane.b32.xlu1 %v3959_v52, %s4748_s1 }
 0xc74   :  { %v3966_v60 = vpop.permute.xlu1 %3965 }
 0xc75   :  { %4081 = vst.msk [vmem:[%s7703_s6 + $0x10] sm:$0xff] %vm3960_vm2, %v3966_v60 }
 0xc78   :  { %v3968_v39 = vpop.permute.xlu1 %3967 }
 0xc79   :  { %4082 = vst.msk [vmem:[%s7703_s6 + $0x18] sm:$0xff] %vm3960_vm2, %v3968_v39 }

</bundles_post_ra>
